<compile_context>
chip_gen: v7x
topology: tpu7x:2x2x1
jax: 0.10.0
libtpu: 0.0.40
codegen_flags: <defaults>
</compile_context>

<pallas_src>
import functools

import jax
import jax.numpy as jnp
from jax.experimental import pallas as pl
from jax.experimental.pallas import tpu as pltpu

_EPS = 1e-5                              # PyTorch BatchNorm2d default eps
_TM = 256                                # GEMM row tile (multiple of 16 for bf16)
_TK = 128                                # GEMM reduction tile
_LANE = 128                              # lane-dense channel padding
_VMEM_LIMIT = 32 * 1024 * 1024
_FUSED_VMEM_BUDGET = 10 * 1024 * 1024    # threshold for the single-call path


# ----------------------------- Pallas kernels ------------------------------ #
def _fused_layer_kernel(*refs, relu, add_residual, inv_m):
    """Whole layer in one shot (fits in VMEM):
       GEMM -> global BN stats -> y*scale+shift [-> ReLU] [-> +residual]."""
    if add_residual:
        p_ref, w_ref, g_ref, b_ref, r_ref, o_ref = refs
    else:
        p_ref, w_ref, g_ref, b_ref, o_ref = refs

    y = jnp.dot(p_ref[...], w_ref[...], preferred_element_type=jnp.float32)
    csum = jnp.sum(y, axis=0, keepdims=True)          # (1, Cpad)
    csq = jnp.sum(y * y, axis=0, keepdims=True)       # (1, Cpad)
    mean = csum * inv_m                                # padded rows are zero
    var = jnp.maximum(csq * inv_m - mean * mean, 0.0)
    scale = g_ref[...] * jax.lax.rsqrt(var + _EPS)
    shift = b_ref[...] - mean * scale

    out = y * scale + shift
    if relu:
        out = jnp.maximum(out, 0.0)
    if add_residual:
        out = out + r_ref[...]
    o_ref[...] = out.astype(o_ref.dtype)


def _matmul_stats_kernel(p_ref, w_ref, y_ref, ssum_ref, ssq_ref, acc_ref):
    """Tiled (tm,tk)@(tk,Cpad) accumulation; on the last k step write the f32
    result tile plus its per-column sum / sum-of-squares (for global BN)."""
    @pl.when(pl.program_id(1) == 0)
    def _():
        acc_ref[...] = jnp.zeros_like(acc_ref)

    acc_ref[...] += jnp.dot(p_ref[...], w_ref[...],
                            preferred_element_type=jnp.float32)

    @pl.when(pl.program_id(1) == pl.num_programs(1) - 1)
    def _():
        acc = acc_ref[...]
        y_ref[...] = acc
        ssum_ref[...] = jnp.broadcast_to(
            jnp.sum(acc, axis=0, keepdims=True), ssum_ref.shape)
        ssq_ref[...] = jnp.broadcast_to(
            jnp.sum(acc * acc, axis=0, keepdims=True), ssq_ref.shape)


def _affine_act_kernel(*refs, relu, add_residual):
    """y*scale + shift  [+ ReLU]  [+ residual]   (lane-dense)."""
    if add_residual:
        y_ref, r_ref, sc_ref, sh_ref, o_ref = refs
    else:
        y_ref, sc_ref, sh_ref, o_ref = refs
    y = y_ref[...] * sc_ref[...] + sh_ref[...]
    if relu:
        y = jnp.maximum(y, 0.0)
    if add_residual:
        y = y + r_ref[...]
    o_ref[...] = y.astype(o_ref.dtype)


# ---------------------------- Pallas wrappers ------------------------------ #
def _fused_layer(patches, wmat, gamma_pad, beta_pad, res, *, relu, out_dtype, m):
    mpad, kpad = patches.shape
    _, cpad = wmat.shape

    def full2(shape):
        return pl.BlockSpec(shape, lambda i: (0, 0))

    in_specs = [full2((mpad, kpad)), full2((kpad, cpad)),
                full2((1, cpad)), full2((1, cpad))]
    args = [patches, wmat, gamma_pad, beta_pad]
    if res is not None:
        in_specs.append(full2((mpad, cpad)))
        args.append(res)

    kern = functools.partial(_fused_layer_kernel, relu=relu,
                             add_residual=res is not None, inv_m=1.0 / m)
    flops = 2 * mpad * kpad * cpad
    bytes_accessed = ((mpad * kpad + kpad * cpad) * 2
                      + mpad * cpad * 4 * (2 if res is not None else 1))
    return pl.pallas_call(
        kern,
        out_shape=jax.ShapeDtypeStruct((mpad, cpad), out_dtype),
        grid_spec=pltpu.PrefetchScalarGridSpec(
            num_scalar_prefetch=0,
            grid=(1,),
            in_specs=in_specs,
            out_specs=full2((mpad, cpad))),
        compiler_params=pltpu.CompilerParams(
            dimension_semantics=("arbitrary",),
            vmem_limit_bytes=_VMEM_LIMIT),
        cost_estimate=pl.CostEstimate(flops=flops, transcendentals=0,
                                      bytes_accessed=bytes_accessed),
    )(*args)


def _matmul_stats(patches, wmat, *, tm=_TM, tk=_TK):
    mpad, kpad = patches.shape
    _, cpad = wmat.shape
    gm, gk = mpad // tm, kpad // tk
    flops = 2 * mpad * kpad * cpad
    bytes_accessed = (mpad * kpad + kpad * cpad) * 2 + mpad * cpad * 4
    return pl.pallas_call(
        _matmul_stats_kernel,
        out_shape=(jax.ShapeDtypeStruct((mpad, cpad), jnp.float32),
                   jax.ShapeDtypeStruct((gm * 8, cpad), jnp.float32),
                   jax.ShapeDtypeStruct((gm * 8, cpad), jnp.float32)),
        grid_spec=pltpu.PrefetchScalarGridSpec(
            num_scalar_prefetch=0,
            grid=(gm, gk),
            in_specs=[pl.BlockSpec((tm, tk), lambda i, k: (i, k)),
                      pl.BlockSpec((tk, cpad), lambda i, k: (k, 0))],
            out_specs=(pl.BlockSpec((tm, cpad), lambda i, k: (i, 0)),
                       pl.BlockSpec((8, cpad), lambda i, k: (i, 0)),
                       pl.BlockSpec((8, cpad), lambda i, k: (i, 0))),
            scratch_shapes=[pltpu.VMEM((tm, cpad), jnp.float32)]),
        compiler_params=pltpu.CompilerParams(
            dimension_semantics=("parallel", "arbitrary"),
            vmem_limit_bytes=_VMEM_LIMIT),
        cost_estimate=pl.CostEstimate(flops=flops, transcendentals=0,
                                      bytes_accessed=bytes_accessed),
    )(patches, wmat)


def _affine_act(y, scale, shift, res, *, relu, out_dtype, tm=_TM):
    mpad, cpad = y.shape
    row = pl.BlockSpec((tm, cpad), lambda i: (i, 0))
    vec = pl.BlockSpec((1, cpad), lambda i: (0, 0))
    if res is not None:
        in_specs = [row, row, vec, vec]
        args = (y, res, scale, shift)
    else:
        in_specs = [row, vec, vec]
        args = (y, scale, shift)
    kern = functools.partial(_affine_act_kernel, relu=relu,
                             add_residual=res is not None)
    return pl.pallas_call(
        kern,
        out_shape=jax.ShapeDtypeStruct((mpad, cpad), out_dtype),
        grid_spec=pltpu.PrefetchScalarGridSpec(
            num_scalar_prefetch=0,
            grid=(mpad // tm,),
            in_specs=in_specs,
            out_specs=row),
        compiler_params=pltpu.CompilerParams(
            dimension_semantics=("parallel",),
            vmem_limit_bytes=_VMEM_LIMIT),
    )(*args)


# ------------------------------- JAX glue ---------------------------------- #
def _im2col_nhwc(xp, k, oh, ow):
    """xp: (N, Hp, Wp, C) already padded; stride-1 3x3 patch extraction."""
    n, _, _, c = xp.shape
    cols = [xp[:, kh:kh + oh, kw:kw + ow, :] for kh in range(k) for kw in range(k)]
    p = jnp.stack(cols, axis=3)                  # (N, OH, OW, k*k, C)
    return p.reshape(n * oh * ow, k * k * c)     # column = (kh*k+kw)*C + cin


def _pack_weight(w, *, tk=_TK, lane=_LANE):
    """PyTorch OIHW conv weight -> lane-dense bf16 (Kpad, Cpad) GEMM matrix."""
    cout, cin, kh, kw = w.shape
    kdim = kh * kw * cin
    kpad = pl.cdiv(kdim, tk) * tk
    cpad = pl.cdiv(cout, lane) * lane
    wmat = jnp.transpose(w, (2, 3, 1, 0)).reshape(kdim, cout)
    wmat = jnp.pad(wmat, ((0, kpad - kdim), (0, cpad - cout)))
    return wmat.astype(jnp.bfloat16)


def _conv_bn_layer(x_nhwc, wmat_pad, gamma, beta, *, relu, residual_flat=None,
                   out_dtype=jnp.float32, tm=_TM, tk=_TK):
    """ReflectPad(1) -> Conv3x3(no bias) -> BatchNorm(train) -> [ReLU] [+res]."""
    n, h, w, c = x_nhwc.shape
    k = 3
    m = n * h * w
    kdim = k * k * c
    kpad, cpad = wmat_pad.shape

    xp = jnp.pad(x_nhwc, ((0, 0), (1, 1), (1, 1), (0, 0)), mode="reflect")
    patches = _im2col_nhwc(xp, k, h, w).astype(jnp.bfloat16)       # (M, 9C) bf16

    gpad = jnp.pad(gamma.astype(jnp.float32), (0, cpad - c)).reshape(1, cpad)
    bpad = jnp.pad(beta.astype(jnp.float32), (0, cpad - c)).reshape(1, cpad)

    mpad_f = pl.cdiv(m, 16) * 16
    fused_bytes = mpad_f * kpad * 2 + kpad * cpad * 2 + 4 * mpad_f * cpad * 4

    if fused_bytes <= _FUSED_VMEM_BUDGET:
        # Small-shape fast path: one Pallas call fuses GEMM + global BN stats
        # + affine + ReLU (+ residual), everything resident in VMEM.
        mpad = mpad_f
        p = jnp.pad(patches, ((0, mpad - m), (0, kpad - kdim)))
        res = None
        if residual_flat is not None:
            res = jnp.pad(residual_flat.astype(jnp.float32),
                          ((0, mpad - m), (0, cpad - c)))
        out = _fused_layer(p, wmat_pad, gpad, bpad, res,
                           relu=relu, out_dtype=out_dtype, m=m)
    else:
        # Large-shape path: tiled GEMM emitting per-tile BN partial sums
        # (stats stay GLOBAL over all N*H*W rows), then a lane-dense
        # elementwise pass.
        mpad = pl.cdiv(m, tm) * tm
        p = jnp.pad(patches, ((0, mpad - m), (0, kpad - kdim)))
        y, ssum, ssq = _matmul_stats(p, wmat_pad, tm=tm, tk=tk)
        colsum = jnp.sum(ssum.reshape(-1, 8, cpad)[:, 0, :], axis=0)
        colsq = jnp.sum(ssq.reshape(-1, 8, cpad)[:, 0, :], axis=0)
        mean = colsum / m
        var = jnp.maximum(colsq / m - mean * mean, 0.0)
        scale = gpad[0] * jax.lax.rsqrt(var + _EPS)
        shift = bpad[0] - mean * scale
        scale = scale.reshape(1, cpad)
        shift = shift.reshape(1, cpad)
        res = None
        if residual_flat is not None:
            res = jnp.pad(residual_flat.astype(jnp.float32),
                          ((0, mpad - m), (0, cpad - c)))
        out = _affine_act(y, scale, shift, res, relu=relu,
                          out_dtype=out_dtype, tm=tm)

    return out[:m, :c].reshape(n, h, w, c)


# --------------------------- ResnetBlock forward --------------------------- #
def build_resnet_block_params(key, dim, k=3):
    k1, k2, k3, k4, k5, k6 = jax.random.split(key, 6)
    w1 = 0.05 * jax.random.normal(k1, (dim, dim, k, k), jnp.float32)   # OIHW
    w2 = 0.05 * jax.random.normal(k2, (dim, dim, k, k), jnp.float32)
    g1 = 1.0 + 0.1 * jax.random.normal(k3, (dim,), jnp.float32)
    b1 = 0.1 * jax.random.normal(k4, (dim,), jnp.float32)
    g2 = 1.0 + 0.1 * jax.random.normal(k5, (dim,), jnp.float32)
    b2 = 0.1 * jax.random.normal(k6, (dim,), jnp.float32)
    return dict(w1=w1, w2=w2,
                wmat1=_pack_weight(w1), wmat2=_pack_weight(w2),
                gamma1=g1, beta1=b1, gamma2=g2, beta2=b2)


def resnet_block_forward(x_nchw, params):
    """out = x + conv_block(x); input/output are NCHW like the PyTorch module."""
    x = jnp.transpose(x_nchw, (0, 2, 3, 1))                  # NHWC internally
    n, h, w, c = x.shape
    res_flat = x.reshape(n * h * w, c)

    # Layer-1 output kept in bf16 (it is re-cast to bf16 for the next conv
    # anyway) -> halves the inter-layer HBM traffic.
    h1 = _conv_bn_layer(x, params["wmat1"], params["gamma1"], params["beta1"],
                        relu=True, out_dtype=jnp.bfloat16)
    # TODO(synk): nn.Dropout(0.5) (use_dropout=True) would be applied here.
    h2 = _conv_bn_layer(h1, params["wmat2"], params["gamma2"], params["beta2"],
                        relu=False, residual_flat=res_flat,
                        out_dtype=jnp.float32)
    return jnp.transpose(h2, (0, 3, 1, 2))                   # back to NCHW


# --------------------------- pure-JAX reference ----------------------------- #
def _ref_forward(x, params):
    def conv(v, w):
        vp = jnp.pad(v, ((0, 0), (0, 0), (1, 1), (1, 1)), mode="reflect")
        return jax.lax.conv_general_dilated(
            vp.astype(jnp.bfloat16), w.astype(jnp.bfloat16),
            window_strides=(1, 1), padding="VALID",
            dimension_numbers=("NCHW", "OIHW", "NCHW"),
            preferred_element_type=jnp.float32)

    def bn(y, g, b):
        mean = jnp.mean(y, axis=(0, 2, 3), keepdims=True)
        var = jnp.mean(jnp.square(y - mean), axis=(0, 2, 3), keepdims=True)
        return ((y - mean) * jax.lax.rsqrt(var + _EPS)
                * g.reshape(1, -1, 1, 1) + b.reshape(1, -1, 1, 1))

    h = jnp.maximum(bn(conv(x, params["w1"]), params["gamma1"], params["beta1"]), 0.0)
    h = bn(conv(h.astype(jnp.bfloat16).astype(jnp.float32), params["w2"]),
           params["gamma2"], params["beta2"])
    return x + h


if __name__ == "__main__":
    # ResnetBlock(dim=32, padding_type='reflect', norm_layer=BatchNorm2d,
    #             use_dropout=False, use_bias=False) on a (2, 32, 16, 16) input.
    dim, batch, hw = 32, 2, 16
    key = jax.random.PRNGKey(0)
    k_in, k_par = jax.random.split(key)
    params = build_resnet_block_params(k_par, dim)
    x = jax.random.normal(k_in, (batch, dim, hw, hw), jnp.float32)

    fwd = jax.jit(resnet_block_forward)
    out = jax.block_until_ready(fwd(x, params))

    ref = jax.block_until_ready(_ref_forward(x, params))
    assert out.shape == (batch, dim, hw, hw), out.shape
    err = float(jnp.max(jnp.abs(out - ref)))
    assert err < 5e-2, f"max abs error {err}"

    print("KERNEL_OK")
</pallas_src>

<mosaic_0001>
module attributes {stable_mosaic.version = 11 : i64} {
  func.func @_fused_layer_kernel(%arg0: i32, %arg1: memref<512x384xbf16, #tpu.memory_space<vmem>>, %arg2: memref<384x128xbf16, #tpu.memory_space<vmem>>, %arg3: memref<1x128xf32, #tpu.memory_space<vmem>>, %arg4: memref<1x128xf32, #tpu.memory_space<vmem>>, %arg5: memref<512x128xbf16, #tpu.memory_space<vmem>>) attributes {dimension_semantics = [#tpu.dimension_semantics<arbitrary>], iteration_bounds = array<i64: 1>, scalar_prefetch = 0 : i64, scratch_operands = 0 : i64, tpu.core_type = #tpu.core_type<tc>, window_params = [{pipeline_mode = #tpu.pipeline_mode<synchronous>, transform_indices = @transform_0, window_bounds = array<i64: 512, 384>}, {pipeline_mode = #tpu.pipeline_mode<synchronous>, transform_indices = @transform_1, window_bounds = array<i64: 384, 128>}, {pipeline_mode = #tpu.pipeline_mode<synchronous>, transform_indices = @transform_2, window_bounds = array<i64: 1, 128>}, {pipeline_mode = #tpu.pipeline_mode<synchronous>, transform_indices = @transform_3, window_bounds = array<i64: 1, 128>}, {pipeline_mode = #tpu.pipeline_mode<synchronous>, transform_indices = @transform_4, window_bounds = array<i64: 512, 128>}]} {
    %c0 = arith.constant 0 : index
    %c0_0 = arith.constant 0 : index
    %0 = vector.load %arg1[%c0, %c0_0] : memref<512x384xbf16, #tpu.memory_space<vmem>>, vector<512x384xbf16>
    %c0_1 = arith.constant 0 : index
    %c0_2 = arith.constant 0 : index
    %1 = vector.load %arg2[%c0_1, %c0_2] : memref<384x128xbf16, #tpu.memory_space<vmem>>, vector<384x128xbf16>
    %cst = arith.constant dense<0.000000e+00> : vector<512x128xf32>
    %2 = tpu.matmul %0, %1, %cst {dimension_numbers = #tpu.dot_dimension_numbers<[1], [0], [0], [1], [0, 0, 1, 1], [], []>} : vector<512x384xbf16>, vector<384x128xbf16>, vector<512x128xf32> -> vector<512x128xf32>
    %cst_3 = arith.constant dense<0.000000e+00> : vector<128xf32>
    %3 = vector.multi_reduction <add>, %2, %cst_3 [0] : vector<512x128xf32> to vector<128xf32>
    %4 = vector.shape_cast %3 : vector<128xf32> to vector<1x128xf32>
    %5 = arith.mulf %2, %2 : vector<512x128xf32>
    %cst_4 = arith.constant dense<0.000000e+00> : vector<128xf32>
    %6 = vector.multi_reduction <add>, %5, %cst_4 [0] : vector<512x128xf32> to vector<128xf32>
    %7 = vector.shape_cast %6 : vector<128xf32> to vector<1x128xf32>
    %cst_5 = arith.constant 0.001953125 : f32
    %8 = vector.broadcast %cst_5 : f32 to vector<1x128xf32>
    %9 = arith.mulf %4, %8 : vector<1x128xf32>
    %cst_6 = arith.constant 0.001953125 : f32
    %10 = vector.broadcast %cst_6 : f32 to vector<1x128xf32>
    %11 = arith.mulf %7, %10 : vector<1x128xf32>
    %12 = arith.mulf %9, %9 : vector<1x128xf32>
    %13 = arith.subf %11, %12 : vector<1x128xf32>
    %cst_7 = arith.constant 0.000000e+00 : f32
    %14 = vector.broadcast %cst_7 : f32 to vector<1x128xf32>
    %15 = arith.maximumf %13, %14 : vector<1x128xf32>
    %c0_8 = arith.constant 0 : index
    %c0_9 = arith.constant 0 : index
    %16 = vector.load %arg3[%c0_8, %c0_9] : memref<1x128xf32, #tpu.memory_space<vmem>>, vector<1x128xf32>
    %cst_10 = arith.constant 9.99999974E-6 : f32
    %17 = vector.broadcast %cst_10 : f32 to vector<1x128xf32>
    %18 = arith.addf %15, %17 : vector<1x128xf32>
    %19 = math.rsqrt %18 : vector<1x128xf32>
    %20 = arith.mulf %16, %19 : vector<1x128xf32>
    %c0_11 = arith.constant 0 : index
    %c0_12 = arith.constant 0 : index
    %21 = vector.load %arg4[%c0_11, %c0_12] : memref<1x128xf32, #tpu.memory_space<vmem>>, vector<1x128xf32>
    %22 = arith.mulf %9, %20 : vector<1x128xf32>
    %23 = arith.subf %21, %22 : vector<1x128xf32>
    %24 = vector.broadcast %20 : vector<1x128xf32> to vector<512x128xf32>
    %25 = arith.mulf %2, %24 : vector<512x128xf32>
    %26 = vector.broadcast %23 : vector<1x128xf32> to vector<512x128xf32>
    %27 = arith.addf %25, %26 : vector<512x128xf32>
    %cst_13 = arith.constant 0.000000e+00 : f32
    %28 = vector.broadcast %cst_13 : f32 to vector<512x128xf32>
    %29 = arith.maximumf %27, %28 : vector<512x128xf32>
    %30 = arith.truncf %29 : vector<512x128xf32> to vector<512x128xbf16>
    %c0_14 = arith.constant 0 : index
    %c0_15 = arith.constant 0 : index
    %31 = vector.load %arg5[%c0_14, %c0_15] : memref<512x128xbf16, #tpu.memory_space<vmem>>, vector<512x128xbf16>
    tpu.vector_store %arg5[%c0_14, %c0_15], %30 {strides = array<i32>} : memref<512x128xbf16, #tpu.memory_space<vmem>>, vector<512x128xbf16>,
    return
  }
  func.func @transform_0(%arg0: i32) -> (i32, i32) {
    %c0_i32 = arith.constant 0 : i32
    %c0_i32_0 = arith.constant 0 : i32
    %c0_i32_1 = arith.constant 0 : i32
    return %c0_i32, %c0_i32_0 : i32, i32
  }
  func.func @transform_1(%arg0: i32) -> (i32, i32) {
    %c0_i32 = arith.constant 0 : i32
    %c0_i32_0 = arith.constant 0 : i32
    %c0_i32_1 = arith.constant 0 : i32
    return %c0_i32, %c0_i32_0 : i32, i32
  }
  func.func @transform_2(%arg0: i32) -> (i32, i32) {
    %c0_i32 = arith.constant 0 : i32
    %c0_i32_0 = arith.constant 0 : i32
    %c0_i32_1 = arith.constant 0 : i32
    return %c0_i32, %c0_i32_0 : i32, i32
  }
  func.func @transform_3(%arg0: i32) -> (i32, i32) {
    %c0_i32 = arith.constant 0 : i32
    %c0_i32_0 = arith.constant 0 : i32
    %c0_i32_1 = arith.constant 0 : i32
    return %c0_i32, %c0_i32_0 : i32, i32
  }
  func.func @transform_4(%arg0: i32) -> (i32, i32) {
    %c0_i32 = arith.constant 0 : i32
    %c0_i32_0 = arith.constant 0 : i32
    %c0_i32_1 = arith.constant 0 : i32
    return %c0_i32, %c0_i32_0 : i32, i32
  }
}

module attributes {stable_mosaic.version = 11 : i64} {
  func.func @_fused_layer_kernel(%arg0: i32, %arg1: memref<512x384xbf16, #tpu.memory_space<vmem>>, %arg2: memref<384x128xbf16, #tpu.memory_space<vmem>>, %arg3: memref<1x128xf32, #tpu.memory_space<vmem>>, %arg4: memref<1x128xf32, #tpu.memory_space<vmem>>, %arg5: memref<512x128xf32, #tpu.memory_space<vmem>>, %arg6: memref<512x128xf32, #tpu.memory_space<vmem>>) attributes {dimension_semantics = [#tpu.dimension_semantics<arbitrary>], iteration_bounds = array<i64: 1>, scalar_prefetch = 0 : i64, scratch_operands = 0 : i64, tpu.core_type = #tpu.core_type<tc>, window_params = [{pipeline_mode = #tpu.pipeline_mode<synchronous>, transform_indices = @transform_0, window_bounds = array<i64: 512, 384>}, {pipeline_mode = #tpu.pipeline_mode<synchronous>, transform_indices = @transform_1, window_bounds = array<i64: 384, 128>}, {pipeline_mode = #tpu.pipeline_mode<synchronous>, transform_indices = @transform_2, window_bounds = array<i64: 1, 128>}, {pipeline_mode = #tpu.pipeline_mode<synchronous>, transform_indices = @transform_3, window_bounds = array<i64: 1, 128>}, {pipeline_mode = #tpu.pipeline_mode<synchronous>, transform_indices = @transform_4, window_bounds = array<i64: 512, 128>}, {pipeline_mode = #tpu.pipeline_mode<synchronous>, transform_indices = @transform_5, window_bounds = array<i64: 512, 128>}]} {
    %c0 = arith.constant 0 : index
    %c0_0 = arith.constant 0 : index
    %0 = vector.load %arg1[%c0, %c0_0] : memref<512x384xbf16, #tpu.memory_space<vmem>>, vector<512x384xbf16>
    %c0_1 = arith.constant 0 : index
    %c0_2 = arith.constant 0 : index
    %1 = vector.load %arg2[%c0_1, %c0_2] : memref<384x128xbf16, #tpu.memory_space<vmem>>, vector<384x128xbf16>
    %cst = arith.constant dense<0.000000e+00> : vector<512x128xf32>
    %2 = tpu.matmul %0, %1, %cst {dimension_numbers = #tpu.dot_dimension_numbers<[1], [0], [0], [1], [0, 0, 1, 1], [], []>} : vector<512x384xbf16>, vector<384x128xbf16>, vector<512x128xf32> -> vector<512x128xf32>
    %cst_3 = arith.constant dense<0.000000e+00> : vector<128xf32>
    %3 = vector.multi_reduction <add>, %2, %cst_3 [0] : vector<512x128xf32> to vector<128xf32>
    %4 = vector.shape_cast %3 : vector<128xf32> to vector<1x128xf32>
    %5 = arith.mulf %2, %2 : vector<512x128xf32>
    %cst_4 = arith.constant dense<0.000000e+00> : vector<128xf32>
    %6 = vector.multi_reduction <add>, %5, %cst_4 [0] : vector<512x128xf32> to vector<128xf32>
    %7 = vector.shape_cast %6 : vector<128xf32> to vector<1x128xf32>
    %cst_5 = arith.constant 0.001953125 : f32
    %8 = vector.broadcast %cst_5 : f32 to vector<1x128xf32>
    %9 = arith.mulf %4, %8 : vector<1x128xf32>
    %cst_6 = arith.constant 0.001953125 : f32
    %10 = vector.broadcast %cst_6 : f32 to vector<1x128xf32>
    %11 = arith.mulf %7, %10 : vector<1x128xf32>
    %12 = arith.mulf %9, %9 : vector<1x128xf32>
    %13 = arith.subf %11, %12 : vector<1x128xf32>
    %cst_7 = arith.constant 0.000000e+00 : f32
    %14 = vector.broadcast %cst_7 : f32 to vector<1x128xf32>
    %15 = arith.maximumf %13, %14 : vector<1x128xf32>
    %c0_8 = arith.constant 0 : index
    %c0_9 = arith.constant 0 : index
    %16 = vector.load %arg3[%c0_8, %c0_9] : memref<1x128xf32, #tpu.memory_space<vmem>>, vector<1x128xf32>
    %cst_10 = arith.constant 9.99999974E-6 : f32
    %17 = vector.broadcast %cst_10 : f32 to vector<1x128xf32>
    %18 = arith.addf %15, %17 : vector<1x128xf32>
    %19 = math.rsqrt %18 : vector<1x128xf32>
    %20 = arith.mulf %16, %19 : vector<1x128xf32>
    %c0_11 = arith.constant 0 : index
    %c0_12 = arith.constant 0 : index
    %21 = vector.load %arg4[%c0_11, %c0_12] : memref<1x128xf32, #tpu.memory_space<vmem>>, vector<1x128xf32>
    %22 = arith.mulf %9, %20 : vector<1x128xf32>
    %23 = arith.subf %21, %22 : vector<1x128xf32>
    %24 = vector.broadcast %20 : vector<1x128xf32> to vector<512x128xf32>
    %25 = arith.mulf %2, %24 : vector<512x128xf32>
    %26 = vector.broadcast %23 : vector<1x128xf32> to vector<512x128xf32>
    %27 = arith.addf %25, %26 : vector<512x128xf32>
    %c0_13 = arith.constant 0 : index
    %c0_14 = arith.constant 0 : index
    %28 = vector.load %arg5[%c0_13, %c0_14] : memref<512x128xf32, #tpu.memory_space<vmem>>, vector<512x128xf32>
    %29 = arith.addf %27, %28 : vector<512x128xf32>
    %c0_15 = arith.constant 0 : index
    %c0_16 = arith.constant 0 : index
    %30 = vector.load %arg6[%c0_15, %c0_16] : memref<512x128xf32, #tpu.memory_space<vmem>>, vector<512x128xf32>
    tpu.vector_store %arg6[%c0_15, %c0_16], %29 {strides = array<i32>} : memref<512x128xf32, #tpu.memory_space<vmem>>, vector<512x128xf32>,
    return
  }
  func.func @transform_0(%arg0: i32) -> (i32, i32) {
    %c0_i32 = arith.constant 0 : i32
    %c0_i32_0 = arith.constant 0 : i32
    %c0_i32_1 = arith.constant 0 : i32
    return %c0_i32, %c0_i32_0 : i32, i32
  }
  func.func @transform_1(%arg0: i32) -> (i32, i32) {
    %c0_i32 = arith.constant 0 : i32
    %c0_i32_0 = arith.constant 0 : i32
    %c0_i32_1 = arith.constant 0 : i32
    return %c0_i32, %c0_i32_0 : i32, i32
  }
  func.func @transform_2(%arg0: i32) -> (i32, i32) {
    %c0_i32 = arith.constant 0 : i32
    %c0_i32_0 = arith.constant 0 : i32
    %c0_i32_1 = arith.constant 0 : i32
    return %c0_i32, %c0_i32_0 : i32, i32
  }
  func.func @transform_3(%arg0: i32) -> (i32, i32) {
    %c0_i32 = arith.constant 0 : i32
    %c0_i32_0 = arith.constant 0 : i32
    %c0_i32_1 = arith.constant 0 : i32
    return %c0_i32, %c0_i32_0 : i32, i32
  }
  func.func @transform_4(%arg0: i32) -> (i32, i32) {
    %c0_i32 = arith.constant 0 : i32
    %c0_i32_0 = arith.constant 0 : i32
    %c0_i32_1 = arith.constant 0 : i32
    return %c0_i32, %c0_i32_0 : i32, i32
  }
  func.func @transform_5(%arg0: i32) -> (i32, i32) {
    %c0_i32 = arith.constant 0 : i32
    %c0_i32_0 = arith.constant 0 : i32
    %c0_i32_1 = arith.constant 0 : i32
    return %c0_i32, %c0_i32_0 : i32, i32
  }
}

</mosaic_0001>

<bundles_post_ra>
// kernel: resnet_block_forward.2
= control target key start
LH: loop header
LB: loop body
LE: loop exit
PB: predicated region body
PF: predicated region fallthrough
CT: control target
= control target key end

     0   :  { %v2916_v0 = vmov 0   ;;  %s4455_s1 = inlined_call_operand.vmem [shape: bf16[384,128], index: 1, kind: input, shape index: {}]   ;;  %s4456_s0 = inlined_call_operand.vmem [shape: bf16[512,384], index: 0, kind: input, shape index: {}]   ;;  %s4457_s2 = inlined_call_operand.vmem [shape: f32[1,128], index: 2, kind: input, shape index: {}]   ;;  %s4458_s3 = inlined_call_operand.vmem [shape: f32[1,128], index: 3, kind: input, shape index: {}]   ;;  %s4459_s4 = inlined_call_operand.vmem [shape: bf16[512,128], index: 4, kind: output, shape index: {}]  }
   0x1   :  { %850 = vmatprep.subr.bf16.mxu0 %v2916_v0  ;;  %2729 = vmatprep.subr.bf16.mxu1 %v2916_v0  ;;  %v2762_v1 = vld [vmem:[%s4455_s1] sm:$0xff]   ;;  %v2763_v2 = vld [vmem:[%s4455_s1 + $0x8] sm:$0xff]   ;;  %v2764_v3 = vld [vmem:[%s4455_s1 + $0x10] sm:$0xff]  }
   0x2   :  { %851 = vmatpush1.bf16.msra.mxu0 %v2762_v1  ;;  %2745 = vmatpush1.bf16.msra.mxu1 %v2762_v1  ;;  %v2765_v4 = vld [vmem:[%s4455_s1 + $0x18] sm:$0xff]   ;;  %v2766_v5 = vld [vmem:[%s4455_s1 + $0x20] sm:$0xff]   ;;  %v2767_v7 = vld [vmem:[%s4455_s1 + $0x28] sm:$0xff]  }
   0x3   :  { %852 = vmatprep.subr.bf16.mxu0 %v2916_v0  ;;  %2730 = vmatprep.subr.bf16.mxu1 %v2916_v0  ;;  %v2780_v6 = vld [vmem:[%s4456_s0 + $0x4] ss:$12 sps:$4 sm:$0xff]   ;;  %v2769_v10 = vld [vmem:[%s4455_s1 + $0x38] sm:$0xff]   ;;  %v2771_v12 = vld [vmem:[%s4455_s1 + $0x48] sm:$0xff]  }
   0x4   :  { %v2783_v8 = vld [vmem:[%s4456_s0 + $0x244] ss:$12 sps:$4 sm:$0xff]   ;;  %882 = vmatprep.mubr.bf16.mxu0 %v2780_v6  ;;  %v2773_v14 = vld [vmem:[%s4455_s1 + $0x58] sm:$0xff]   ;;  %v2775_v16 = vld [vmem:[%s4455_s1 + $0x68] sm:$0xff]  }
   0x5   :  { %1074 = vmatprep.mubr.bf16.mxu1 %v2783_v8  ;;  %v2768_v9 = vld [vmem:[%s4455_s1 + $0x30] sm:$0xff]   ;;  %v2770_v11 = vld [vmem:[%s4455_s1 + $0x40] sm:$0xff]   ;;  %v2777_v18 = vld [vmem:[%s4455_s1 + $0x78] sm:$0xff]  }
   0x6   :  { %853 = vmatpush1.bf16.msra.mxu0 %v2763_v2  ;;  %2746 = vmatpush1.bf16.msra.mxu1 %v2763_v2  ;;  %v2772_v13 = vld [vmem:[%s4455_s1 + $0x50] sm:$0xff]   ;;  %v2774_v15 = vld [vmem:[%s4455_s1 + $0x60] sm:$0xff]   ;;  %v2784_v22 = vld [vmem:[%s4456_s0 + $0x1c] ss:$12 sps:$4 sm:$0xff]  }
   0x7   :  { %854 = vmatprep.subr.bf16.mxu0 %v2916_v0  ;;  %2731 = vmatprep.subr.bf16.mxu1 %v2916_v0  ;;  %v2776_v17 = vld [vmem:[%s4455_s1 + $0x70] sm:$0xff]   ;;  %v2802_v19 = vld [vmem:[%s4455_s1 + $0x80] sm:$0xff]   ;;  %v2786_v23 = vld [vmem:[%s4456_s0 + $0x25c] ss:$12 sps:$4 sm:$0xff]  }
   0x8   :  { %v2778_v20 = vld [vmem:[%s4456_s0] ss:$12 sps:$4 sm:$0xff]   ;;  %v2788_v25 = vld [vmem:[%s4456_s0 + $0x18] ss:$12 sps:$4 sm:$0xff]   ;;  %v2816_v26 = vld [vmem:[%s4455_s1 + $0x90] sm:$0xff]  }
   0x9   :  { %v2781_v21 = vld [vmem:[%s4456_s0 + $0x240] ss:$12 sps:$4 sm:$0xff]   ;;  %v2789_v27 = vld [vmem:[%s4456_s0 + $0x258] ss:$12 sps:$4 sm:$0xff]   ;;  %v2794_v31 = vld [vmem:[%s4456_s0 + $0x30] ss:$12 sps:$4 sm:$0xff]  }
   0xa   :  { %855 = vmatpush1.bf16.msra.mxu0 %v2764_v3  ;;  %2747 = vmatpush1.bf16.msra.mxu1 %v2764_v3  ;;  %v2809_v24 = vld [vmem:[%s4455_s1 + $0x88] sm:$0xff]   ;;  %v2790_v28 = vld [vmem:[%s4456_s0 + $0x34] ss:$12 sps:$4 sm:$0xff]   ;;  %v2817_v30 = vld [vmem:[%s4455_s1 + $0x98] sm:$0xff]  }
   0xb   :  { %856 = vmatprep.subr.bf16.mxu0 %v2916_v0  ;;  %2732 = vmatprep.subr.bf16.mxu1 %v2916_v0  ;;  %v2792_v29 = vld [vmem:[%s4456_s0 + $0x274] ss:$12 sps:$4 sm:$0xff]   ;;  %v2795_v33 = vld [vmem:[%s4456_s0 + $0x270] ss:$12 sps:$4 sm:$0xff]   ;;  %v2796_v34 = vld [vmem:[%s4456_s0 + $0x4c] ss:$12 sps:$4 sm:$0xff]  }
   0xc   :  { %v2824_v32 = vld [vmem:[%s4455_s1 + $0xa0] sm:$0xff]   ;;  %v2798_v35 = vld [vmem:[%s4456_s0 + $0x28c] ss:$12 sps:$4 sm:$0xff]   ;;  %v2800_v37 = vld [vmem:[%s4456_s0 + $0x48] ss:$12 sps:$4 sm:$0xff]  }
   0xd   :  { %v2825_v36 = vld [vmem:[%s4455_s1 + $0xa8] sm:$0xff]   ;;  %v2803_v39 = vld [vmem:[%s4456_s0 + $0x64] ss:$12 sps:$4 sm:$0xff]   ;;  %v2833_v42 = vld [vmem:[%s4455_s1 + $0xb8] sm:$0xff]  }
   0xe   :  { %857 = vmatpush1.bf16.msra.mxu0 %v2765_v4  ;;  %2748 = vmatpush1.bf16.msra.mxu1 %v2765_v4  ;;  %v2801_v38 = vld [vmem:[%s4456_s0 + $0x288] ss:$12 sps:$4 sm:$0xff]   ;;  %v2805_v40 = vld [vmem:[%s4456_s0 + $0x2a4] ss:$12 sps:$4 sm:$0xff]   ;;  %v2807_v43 = vld [vmem:[%s4456_s0 + $0x60] ss:$12 sps:$4 sm:$0xff]  }
   0xf   :  { %858 = vmatprep.subr.bf16.mxu0 %v2916_v0  ;;  %2733 = vmatprep.subr.bf16.mxu1 %v2916_v0  ;;  %v2832_v41 = vld [vmem:[%s4455_s1 + $0xb0] sm:$0xff]   ;;  %v2808_v44 = vld [vmem:[%s4456_s0 + $0x2a0] ss:$12 sps:$4 sm:$0xff]   ;;  %v2810_v45 = vld [vmem:[%s4456_s0 + $0x7c] ss:$12 sps:$4 sm:$0xff]  }
  0x10   :  { %v2812_v46 = vld [vmem:[%s4456_s0 + $0x2bc] ss:$12 sps:$4 sm:$0xff]   ;;  %v2814_v47 = vld [vmem:[%s4456_s0 + $0x78] ss:$12 sps:$4 sm:$0xff]   ;;  %v2818_v49 = vld [vmem:[%s4456_s0 + $0x94] ss:$12 sps:$4 sm:$0xff]  }
  0x11   :  { %v2815_v48 = vld [vmem:[%s4456_s0 + $0x2b8] ss:$12 sps:$4 sm:$0xff]   ;;  %v2820_v50 = vld [vmem:[%s4456_s0 + $0x2d4] ss:$12 sps:$4 sm:$0xff]   ;;  %v2822_v51 = vld [vmem:[%s4456_s0 + $0x90] ss:$12 sps:$4 sm:$0xff]  }
  0x12   :  { %859 = vmatpush1.bf16.msra.mxu0 %v2766_v5  ;;  %2749 = vmatpush1.bf16.msra.mxu1 %v2766_v5  ;;  %v2823_v52 = vld [vmem:[%s4456_s0 + $0x2d0] ss:$12 sps:$4 sm:$0xff]   ;;  %v2826_v53 = vld [vmem:[%s4456_s0 + $0xac] ss:$12 sps:$4 sm:$0xff]   ;;  %v2830_v55 = vld [vmem:[%s4456_s0 + $0xa8] ss:$12 sps:$4 sm:$0xff]  }
  0x13   :  { %860 = vmatprep.subr.bf16.mxu0 %v2916_v0  ;;  %2734 = vmatprep.subr.bf16.mxu1 %v2916_v0  ;;  %v2828_v54 = vld [vmem:[%s4456_s0 + $0x2ec] ss:$12 sps:$4 sm:$0xff]   ;;  %v2831_v56 = vld [vmem:[%s4456_s0 + $0x2e8] ss:$12 sps:$4 sm:$0xff]   ;;  %v2834_v57 = vld [vmem:[%s4456_s0 + $0xc4] ss:$12 sps:$4 sm:$0xff]  }
  0x14   :  { %v2836_v58 = vld [vmem:[%s4456_s0 + $0x8] ss:$12 sps:$4 sm:$0xff]   ;;  %v2837_v59 = vld [vmem:[%s4456_s0 + $0xc0] ss:$12 sps:$4 sm:$0xff]   ;;  %v2841_v62 = vld [vmem:[%s4456_s0 + $0x38] ss:$12 sps:$4 sm:$0xff]  }
  0x15   :  { %v2838_v60 = vld [vmem:[%s4456_s0 + $0x20] ss:$12 sps:$4 sm:$0xff]   ;;  %v2839_v61 = vld [vmem:[%s4456_s0 + $0xdc] ss:$12 sps:$4 sm:$0xff]   ;;  %v2842_v63 = vld [vmem:[%s4456_s0 + $0xd8] ss:$12 sps:$4 sm:$0xff]  }
  0x16   :  { %861 = vmatpush1.bf16.msra.mxu0 %v2767_v7  ;;  %2750 = vmatpush1.bf16.msra.mxu1 %v2767_v7  ;;  %v2844_v1 = vld [vmem:[%s4456_s0 + $0xf4] ss:$12 sps:$4 sm:$0xff]   ;;  %v2847_v3 = vld [vmem:[%s4456_s0 + $0xf0] ss:$12 sps:$4 sm:$0xff]   ;;  %v2849_v5 = vld [vmem:[%s4456_s0 + $0x10c] ss:$12 sps:$4 sm:$0xff]  }
  0x17   :  { %862 = vmatprep.subr.bf16.mxu0 %v2916_v0  ;;  %2735 = vmatprep.subr.bf16.mxu1 %v2916_v0  ;;  %v2846_v2 = vld [vmem:[%s4456_s0 + $0x68] ss:$12 sps:$4 sm:$0xff]   ;;  %v2848_v4 = vld [vmem:[%s4456_s0 + $0x80] ss:$12 sps:$4 sm:$0xff]   ;;  %v2851_v6 = vld [vmem:[%s4456_s0 + $0x98] ss:$12 sps:$4 sm:$0xff]  }
  0x18   :  { %v2852_v7 = vld [vmem:[%s4456_s0 + $0x108] ss:$12 sps:$4 sm:$0xff]   ;;  %v2853_v8 = vld [vmem:[%s4456_s0 + $0xb0] ss:$12 sps:$4 sm:$0xff]  }
  0x1a   :  { %863 = vmatpush1.bf16.msra.mxu0 %v2768_v9  ;;  %2751 = vmatpush1.bf16.msra.mxu1 %v2768_v9  ;;  %v2854_v9 = vld [vmem:[%s4456_s0 + $0x124] ss:$12 sps:$4 sm:$0xff]  }
  0x1b   :  { %864 = vmatprep.subr.bf16.mxu0 %v2916_v0  ;;  %2736 = vmatprep.subr.bf16.mxu1 %v2916_v0 }
  0x1e   :  { %865 = vmatpush1.bf16.msra.mxu0 %v2769_v10  ;;  %2752 = vmatpush1.bf16.msra.mxu1 %v2769_v10  ;;  %v2856_v10 = vld [vmem:[%s4456_s0 + $0xc8] ss:$12 sps:$4 sm:$0xff]  }
  0x1f   :  { %866 = vmatprep.subr.bf16.mxu0 %v2916_v0  ;;  %2737 = vmatprep.subr.bf16.mxu1 %v2916_v0 }
  0x22   :  { %867 = vmatpush1.bf16.msra.mxu0 %v2770_v11  ;;  %2753 = vmatpush1.bf16.msra.mxu1 %v2770_v11  ;;  %v2857_v11 = vld [vmem:[%s4456_s0 + $0x120] ss:$12 sps:$4 sm:$0xff]  }
  0x23   :  { %868 = vmatprep.subr.bf16.mxu0 %v2916_v0  ;;  %2738 = vmatprep.subr.bf16.mxu1 %v2916_v0 }
  0x26   :  { %869 = vmatpush1.bf16.msra.mxu0 %v2771_v12  ;;  %2754 = vmatpush1.bf16.msra.mxu1 %v2771_v12  ;;  %v2858_v12 = vld [vmem:[%s4456_s0 + $0xe0] ss:$12 sps:$4 sm:$0xff]  }
  0x27   :  { %870 = vmatprep.subr.bf16.mxu0 %v2916_v0  ;;  %2739 = vmatprep.subr.bf16.mxu1 %v2916_v0 }
  0x2a   :  { %871 = vmatpush1.bf16.msra.mxu0 %v2772_v13  ;;  %2755 = vmatpush1.bf16.msra.mxu1 %v2772_v13  ;;  %v2859_v13 = vld [vmem:[%s4456_s0 + $0x13c] ss:$12 sps:$4 sm:$0xff]  }
  0x2b   :  { %872 = vmatprep.subr.bf16.mxu0 %v2916_v0  ;;  %2740 = vmatprep.subr.bf16.mxu1 %v2916_v0 }
  0x2e   :  { %873 = vmatpush1.bf16.msra.mxu0 %v2773_v14  ;;  %2756 = vmatpush1.bf16.msra.mxu1 %v2773_v14  ;;  %v2861_v14 = vld [vmem:[%s4456_s0 + $0xf8] ss:$12 sps:$4 sm:$0xff]  }
  0x2f   :  { %874 = vmatprep.subr.bf16.mxu0 %v2916_v0  ;;  %2741 = vmatprep.subr.bf16.mxu1 %v2916_v0 }
  0x32   :  { %875 = vmatpush1.bf16.msra.mxu0 %v2774_v15  ;;  %2757 = vmatpush1.bf16.msra.mxu1 %v2774_v15  ;;  %v2862_v15 = vld [vmem:[%s4456_s0 + $0x138] ss:$12 sps:$4 sm:$0xff]  }
  0x33   :  { %876 = vmatprep.subr.bf16.mxu0 %v2916_v0  ;;  %2742 = vmatprep.subr.bf16.mxu1 %v2916_v0 }
  0x36   :  { %877 = vmatpush1.bf16.msra.mxu0 %v2775_v16  ;;  %2758 = vmatpush1.bf16.msra.mxu1 %v2775_v16  ;;  %v2863_v16 = vld [vmem:[%s4456_s0 + $0x110] ss:$12 sps:$4 sm:$0xff]  }
  0x37   :  { %878 = vmatprep.subr.bf16.mxu0 %v2916_v0  ;;  %2743 = vmatprep.subr.bf16.mxu1 %v2916_v0 }
  0x3a   :  { %879 = vmatpush1.bf16.msra.mxu0 %v2776_v17  ;;  %2759 = vmatpush1.bf16.msra.mxu1 %v2776_v17  ;;  %v2864_v17 = vld [vmem:[%s4456_s0 + $0x154] ss:$12 sps:$4 sm:$0xff]  }
  0x3b   :  { %880 = vmatprep.subr.bf16.mxu0 %v2916_v0  ;;  %2744 = vmatprep.subr.bf16.mxu1 %v2916_v0  ;;  %v2843_v0 = vld [vmem:[%s4456_s0 + $0x50] ss:$12 sps:$4 sm:$0xff]  }
  0x3e   :  { %881 = vmatpush1.bf16.msra.mxu0 %v2777_v18  ;;  %2760 = vmatpush1.bf16.msra.mxu1 %v2777_v18  ;;  %v2866_v18 = vld [vmem:[%s4456_s0 + $0x128] ss:$12 sps:$4 sm:$0xff]  }
  0x3f   :  { %2649 = vmatprep.subr.bf16.mxu1 %v2802_v19 }
  0x41   :  { %883 = vmatmul.mubr.bf16.vlgmr.msra.gmra.mrb[0].mxu0 %v2778_v20  ;;  %1075 = vmatmul.mubr.bf16.vlgmr.msra.gmra.mrb[0].mxu1 %v2781_v21  ;;  %v2868_v20 = vld [vmem:[%s4456_s0 + $0x140] ss:$12 sps:$4 sm:$0xff]  }
  0x42   :  { %890 = vmatprep.mubr.bf16.mxu0 %v2784_v22  ;;  %1082 = vmatprep.mubr.bf16.mxu1 %v2786_v23  ;;  %v2869_v21 = vld [vmem:[%s4456_s0 + $0x16c] ss:$12 sps:$4 sm:$0xff]   ;;  %v2872_v23 = vld [vmem:[%s4456_s0 + $0x168] ss:$12 sps:$4 sm:$0xff]  }
  0x43   :  { %2650 = vmatpush3.bf16.msra.mxu1 %v2802_v19  ;;  %v2867_v19 = vld [vmem:[%s4456_s0 + $0x150] ss:$12 sps:$4 sm:$0xff]   ;;  %v2871_v22 = vld [vmem:[%s4456_s0 + $0x158] ss:$12 sps:$4 sm:$0xff]  }
  0x44   :  { %2651 = vmatprep.subr.bf16.mxu1 %v2809_v24 }
  0x47   :  { %2652 = vmatpush3.bf16.msra.mxu1 %v2809_v24  ;;  %v2873_v24 = vld [vmem:[%s4456_s0 + $0x170] ss:$12 sps:$4 sm:$0xff]  }
  0x48   :  { %2653 = vmatprep.subr.bf16.mxu1 %v2816_v26 }
  0x49   :  { %891 = vmatmul.mubr.bf16.gmra.mrb[4].mxu0 %v2788_v25  ;;  %1083 = vmatmul.mubr.bf16.gmra.mrb[4].mxu1 %v2789_v27  ;;  %v2874_v25 = vld [vmem:[%s4456_s0 + $0x184] ss:$12 sps:$4 sm:$0xff]   ;;  %v2877_v27 = vld [vmem:[%s4456_s0 + $0x180] ss:$12 sps:$4 sm:$0xff]  }
  0x4a   :  { %898 = vmatprep.mubr.bf16.mxu0 %v2790_v28  ;;  %1090 = vmatprep.mubr.bf16.mxu1 %v2792_v29  ;;  %v2878_v28 = vld [vmem:[%s4456_s0 + $0x1a0] ss:$12 sps:$4 sm:$0xff]   ;;  %v2879_v29 = vld [vmem:[%s4456_s0 + $0x19c] ss:$12 sps:$4 sm:$0xff]  }
  0x4b   :  { %2654 = vmatpush3.bf16.msra.mxu1 %v2816_v26  ;;  %v2876_v26 = vld [vmem:[%s4456_s0 + $0x188] ss:$12 sps:$4 sm:$0xff]  }
  0x4c   :  { %2655 = vmatprep.subr.bf16.mxu1 %v2817_v30 }
  0x4f   :  { %2656 = vmatpush3.bf16.msra.mxu1 %v2817_v30  ;;  %v2881_v30 = vld [vmem:[%s4456_s0 + $0x1b8] ss:$12 sps:$4 sm:$0xff]  }
  0x50   :  { %2657 = vmatprep.subr.bf16.mxu1 %v2824_v32 }
  0x51   :  { %899 = vmatmul.mubr.bf16.gmra.mrb[8].mxu0 %v2794_v31  ;;  %1091 = vmatmul.mubr.bf16.gmra.mrb[8].mxu1 %v2795_v33  ;;  %v2882_v31 = vld [vmem:[%s4456_s0 + $0x198] ss:$12 sps:$4 sm:$0xff]   ;;  %v2884_v33 = vld [vmem:[%s4456_s0 + $0x1b4] ss:$12 sps:$4 sm:$0xff]  }
  0x52   :  { %906 = vmatprep.mubr.bf16.mxu0 %v2796_v34  ;;  %1098 = vmatprep.mubr.bf16.mxu1 %v2798_v35  ;;  %v2886_v34 = vld [vmem:[%s4456_s0 + $0x1e8] ss:$12 sps:$4 sm:$0xff]   ;;  %v2887_v35 = vld [vmem:[%s4456_s0 + $0x1b0] ss:$12 sps:$4 sm:$0xff]  }
  0x53   :  { %2658 = vmatpush3.bf16.msra.mxu1 %v2824_v32  ;;  %v2883_v32 = vld [vmem:[%s4456_s0 + $0x1d0] ss:$12 sps:$4 sm:$0xff]  }
  0x54   :  { %2659 = vmatprep.subr.bf16.mxu1 %v2825_v36 }
  0x57   :  { %2660 = vmatpush3.bf16.msra.mxu1 %v2825_v36  ;;  %v2888_v36 = vld [vmem:[%s4456_s0 + $0x200] ss:$12 sps:$4 sm:$0xff]  }
  0x58   :  { %2661 = vmatprep.subr.bf16.mxu1 %v2832_v41 }
  0x59   :  { %907 = vmatmul.mubr.bf16.gmra.mrb[12].mxu0 %v2800_v37  ;;  %1099 = vmatmul.mubr.bf16.gmra.mrb[12].mxu1 %v2801_v38  ;;  %v2889_v37 = vld [vmem:[%s4456_s0 + $0x1cc] ss:$12 sps:$4 sm:$0xff]  }
  0x5a   :  { %914 = vmatprep.mubr.bf16.mxu0 %v2803_v39  ;;  %1106 = vmatprep.mubr.bf16.mxu1 %v2805_v40  ;;  %v2891_v38 = vld [vmem:[%s4456_s0 + $0x218] ss:$12 sps:$4 sm:$0xff]   ;;  %v2892_v39 = vld [vmem:[%s4456_s0 + $0x1c8] ss:$12 sps:$4 sm:$0xff]   ;;  %v2893_v40 = vld [vmem:[%s4456_s0 + $0x230] ss:$12 sps:$4 sm:$0xff]  }
  0x5b   :  { %2662 = vmatpush3.bf16.msra.mxu1 %v2832_v41  ;;  %v2894_v41 = vld [vmem:[%s4456_s0 + $0x1e4] ss:$12 sps:$4 sm:$0xff]  }
  0x5c   :  { %2663 = vmatprep.subr.bf16.mxu1 %v2833_v42 }
  0x5f   :  { %2664 = vmatpush3.bf16.msra.mxu1 %v2833_v42  ;;  %v2896_v42 = vld [vmem:[%s4456_s0 + $0x248] ss:$12 sps:$4 sm:$0xff]  }
  0x61   :  { %915 = vmatmul.mubr.bf16.gmra.mrb[16].mxu0 %v2807_v43  ;;  %1107 = vmatmul.mubr.bf16.gmra.mrb[16].mxu1 %v2808_v44  ;;  %v2897_v43 = vld [vmem:[%s4456_s0 + $0x1e0] ss:$12 sps:$4 sm:$0xff]  }
  0x62   :  { %922 = vmatprep.mubr.bf16.mxu0 %v2810_v45  ;;  %1114 = vmatprep.mubr.bf16.mxu1 %v2812_v46  ;;  %v2898_v44 = vld [vmem:[%s4456_s0 + $0x260] ss:$12 sps:$4 sm:$0xff]   ;;  %v2899_v45 = vld [vmem:[%s4456_s0 + $0x1fc] ss:$12 sps:$4 sm:$0xff]   ;;  %v2901_v46 = vld [vmem:[%s4456_s0 + $0x278] ss:$12 sps:$4 sm:$0xff]  }
  0x69   :  { %923 = vmatmul.mubr.bf16.gmra.mrb[20].mxu0 %v2814_v47  ;;  %1115 = vmatmul.mubr.bf16.gmra.mrb[20].mxu1 %v2815_v48  ;;  %v2902_v47 = vld [vmem:[%s4456_s0 + $0x1f8] ss:$12 sps:$4 sm:$0xff]   ;;  %v2903_v48 = vld [vmem:[%s4456_s0 + $0x290] ss:$12 sps:$4 sm:$0xff]  }
  0x6a   :  { %930 = vmatprep.mubr.bf16.mxu0 %v2818_v49  ;;  %1122 = vmatprep.mubr.bf16.mxu1 %v2820_v50  ;;  %v2904_v49 = vld [vmem:[%s4456_s0 + $0x214] ss:$12 sps:$4 sm:$0xff]  }
  0x6b   :  { %v2906_v50 = vld [vmem:[%s4456_s0 + $0x2a8] ss:$12 sps:$4 sm:$0xff]  }
  0x71   :  { %931 = vmatmul.mubr.bf16.gmra.mrb[24].mxu0 %v2822_v51  ;;  %1123 = vmatmul.mubr.bf16.gmra.mrb[24].mxu1 %v2823_v52  ;;  %v2907_v51 = vld [vmem:[%s4456_s0 + $0x210] ss:$12 sps:$4 sm:$0xff]   ;;  %v2908_v52 = vld [vmem:[%s4456_s0 + $0x2c0] ss:$12 sps:$4 sm:$0xff]  }
  0x72   :  { %938 = vmatprep.mubr.bf16.mxu0 %v2826_v53  ;;  %1130 = vmatprep.mubr.bf16.mxu1 %v2828_v54  ;;  %v2909_v53 = vld [vmem:[%s4456_s0 + $0x22c] ss:$12 sps:$4 sm:$0xff]  }
  0x73   :  { %v2911_v54 = vld [vmem:[%s4456_s0 + $0x2d8] ss:$12 sps:$4 sm:$0xff]  }
  0x79   :  { %939 = vmatmul.mubr.bf16.gmra.mrb[28].mxu0 %v2830_v55  ;;  %1131 = vmatmul.mubr.bf16.gmra.mrb[28].mxu1 %v2831_v56  ;;  %v2912_v55 = vld [vmem:[%s4456_s0 + $0x228] ss:$12 sps:$4 sm:$0xff]   ;;  %v2913_v56 = vld [vmem:[%s4456_s0 + $0x2f0] ss:$12 sps:$4 sm:$0xff]  }
  0x7a   :  { %946 = vmatprep.mubr.bf16.mxu0 %v2834_v57  ;;  %2665 = vmatprep.mubr.bf16.mxu1 %v2836_v58 }
  0x81   :  { %947 = vmatmul.mubr.bf16.gmra.mrb[32].mxu0 %v2837_v59  ;;  %2666 = vmatmul.mubr.bf16.vlgmr.msra.gmra.mrb[32].mxu1 %v2838_v60 }
  0x82   :  { %954 = vmatprep.mubr.bf16.mxu0 %v2839_v61  ;;  %2669 = vmatprep.mubr.bf16.mxu1 %v2841_v62 }
  0x89   :  { %955 = vmatmul.mubr.bf16.gmra.mrb[36].mxu0 %v2842_v63  ;;  %2670 = vmatmul.mubr.bf16.gmra.mrb[36].mxu1 %v2843_v0 }
  0x8a   :  { %962 = vmatprep.mubr.bf16.mxu0 %v2844_v1  ;;  %2673 = vmatprep.mubr.bf16.mxu1 %v2846_v2 }
  0x91   :  { %963 = vmatmul.mubr.bf16.gmra.mrb[40].mxu0 %v2847_v3  ;;  %2674 = vmatmul.mubr.bf16.gmra.mrb[40].mxu1 %v2848_v4 }
  0x92   :  { %970 = vmatprep.mubr.bf16.mxu0 %v2849_v5  ;;  %2677 = vmatprep.mubr.bf16.mxu1 %v2851_v6 }
  0x99   :  { %971 = vmatmul.mubr.bf16.gmra.mrb[44].mxu0 %v2852_v7  ;;  %2678 = vmatmul.mubr.bf16.gmra.mrb[44].mxu1 %v2853_v8 }
  0x9a   :  { %978 = vmatprep.mubr.bf16.mxu0 %v2854_v9  ;;  %2681 = vmatprep.mubr.bf16.mxu1 %v2856_v10 }
  0xa1   :  { %979 = vmatmul.mubr.bf16.gmra.mrb[48].mxu0 %v2857_v11  ;;  %2682 = vmatmul.mubr.bf16.gmra.mrb[48].mxu1 %v2858_v12 }
  0xa2   :  { %986 = vmatprep.mubr.bf16.mxu0 %v2859_v13  ;;  %2685 = vmatprep.mubr.bf16.mxu1 %v2861_v14 }
  0xa9   :  { %987 = vmatmul.mubr.bf16.gmra.mrb[52].mxu0 %v2862_v15  ;;  %2686 = vmatmul.mubr.bf16.gmra.mrb[52].mxu1 %v2863_v16 }
  0xaa   :  { %994 = vmatprep.mubr.bf16.mxu0 %v2864_v17  ;;  %2689 = vmatprep.mubr.bf16.mxu1 %v2866_v18 }
  0xb1   :  { %995 = vmatmul.mubr.bf16.gmra.mrb[56].mxu0 %v2867_v19  ;;  %2690 = vmatmul.mubr.bf16.gmra.mrb[56].mxu1 %v2868_v20 }
  0xb2   :  { %1002 = vmatprep.mubr.bf16.mxu0 %v2869_v21  ;;  %2693 = vmatprep.mubr.bf16.mxu1 %v2871_v22 }
  0xb9   :  { %1003 = vmatmul.mubr.bf16.gmra.mrb[60].mxu0 %v2872_v23  ;;  %2694 = vmatmul.mubr.bf16.gmra.mrb[60].mxu1 %v2873_v24 }
  0xba   :  { %1010 = vmatprep.mubr.bf16.mxu0 %v2874_v25  ;;  %2697 = vmatprep.mubr.bf16.mxu1 %v2876_v26 }
  0xc1   :  { %1011 = vmatmul.mubr.bf16.gmra.mrb[64].mxu0 %v2877_v27  ;;  %2698 = vmatmul.mubr.bf16.gmra.mrb[64].mxu1 %v2878_v28 }
  0xc2   :  { %1018 = vmatprep.mubr.bf16.mxu0 %v2879_v29  ;;  %2701 = vmatprep.mubr.bf16.mxu1 %v2881_v30 }
  0xc9   :  { %1019 = vmatmul.mubr.bf16.gmra.mrb[68].mxu0 %v2882_v31  ;;  %2702 = vmatmul.mubr.bf16.gmra.mrb[68].mxu1 %v2883_v32 }
  0xca   :  { %1026 = vmatprep.mubr.bf16.mxu0 %v2884_v33  ;;  %2705 = vmatprep.mubr.bf16.mxu1 %v2886_v34 }
  0xd1   :  { %1027 = vmatmul.mubr.bf16.gmra.mrb[72].mxu0 %v2887_v35  ;;  %2706 = vmatmul.mubr.bf16.gmra.mrb[72].mxu1 %v2888_v36 }
  0xd2   :  { %1034 = vmatprep.mubr.bf16.mxu0 %v2889_v37  ;;  %2709 = vmatprep.mubr.bf16.mxu1 %v2891_v38 }
  0xd9   :  { %1035 = vmatmul.mubr.bf16.gmra.mrb[76].mxu0 %v2892_v39  ;;  %2710 = vmatmul.mubr.bf16.gmra.mrb[76].mxu1 %v2893_v40 }
  0xda   :  { %1042 = vmatprep.mubr.bf16.mxu0 %v2894_v41  ;;  %2713 = vmatprep.mubr.bf16.mxu1 %v2896_v42 }
  0xe1   :  { %1043 = vmatmul.mubr.bf16.gmra.mrb[80].mxu0 %v2897_v43  ;;  %2714 = vmatmul.mubr.bf16.gmra.mrb[80].mxu1 %v2898_v44 }
  0xe2   :  { %1050 = vmatprep.mubr.bf16.mxu0 %v2899_v45  ;;  %2717 = vmatprep.mubr.bf16.mxu1 %v2901_v46 }
  0xe9   :  { %1051 = vmatmul.mubr.bf16.gmra.mrb[84].mxu0 %v2902_v47  ;;  %2718 = vmatmul.mubr.bf16.gmra.mrb[84].mxu1 %v2903_v48 }
  0xea   :  { %1058 = vmatprep.mubr.bf16.mxu0 %v2904_v49  ;;  %2721 = vmatprep.mubr.bf16.mxu1 %v2906_v50 }
  0xf1   :  { %1059 = vmatmul.mubr.bf16.gmra.mrb[88].mxu0 %v2907_v51  ;;  %2722 = vmatmul.mubr.bf16.gmra.mrb[88].mxu1 %v2908_v52 }
  0xf2   :  { %1066 = vmatprep.mubr.bf16.mxu0 %v2909_v53  ;;  %2725 = vmatprep.mubr.bf16.mxu1 %v2911_v54 }
  0xf9   :  { %1067 = vmatmul.mubr.bf16.gmra.mrb[92].mxu0 %v2912_v55  ;;  %2726 = vmatmul.mubr.bf16.gmra.mrb[92].mxu1 %v2913_v56 }
 0x114   :  { %v3334_v57 = vpop.f32.mrb[0].mxu0  ;;  %v3336_v58 = vpop.f32.mrb[0].mxu1 }
 0x115   :  { %v886_v59 = vpop.f32.mrb[1].mxu0  ;;  %v1078_v60 = vpop.f32.mrb[1].mxu1 }
 0x116   :  { %v3338_v61 = vpop.f32.mrb[2].mxu0  ;;  %v3340_v62 = vpop.f32.mrb[2].mxu1 }
 0x117   :  { %v889_v63 = vpop.f32.mrb[3].mxu0  ;;  %v1081_v0 = vpop.f32.mrb[3].mxu1 }
 0x11c   :  { %v892_v1 = vpop.f32.mrb[4].mxu0  ;;  %v3342_v2 = vpop.f32.mrb[4].mxu1 }
 0x11d   :  { %v894_v3 = vpop.f32.mrb[5].mxu0  ;;  %v1086_v4 = vpop.f32.mrb[5].mxu1 }
 0x11e   :  { %v895_v5 = vpop.f32.mrb[6].mxu0  ;;  %v3344_v6 = vpop.f32.mrb[6].mxu1 }
 0x11f   :  { %v897_v7 = vpop.f32.mrb[7].mxu0  ;;  %v1089_v8 = vpop.f32.mrb[7].mxu1 }
 0x124   :  { %v3346_v9 = vpop.f32.mrb[8].mxu0  ;;  %v3348_v10 = vpop.f32.mrb[8].mxu1 }
 0x125   :  { %v902_v11 = vpop.f32.mrb[9].mxu0  ;;  %v1094_v12 = vpop.f32.mrb[9].mxu1 }
 0x126   :  { %v3350_v13 = vpop.f32.mrb[10].mxu0  ;;  %v3352_v14 = vpop.f32.mrb[10].mxu1 }
 0x127   :  { %v905_v15 = vpop.f32.mrb[11].mxu0  ;;  %v1097_v16 = vpop.f32.mrb[11].mxu1 }
 0x12c   :  { %v908_v17 = vpop.f32.mrb[12].mxu0  ;;  %v3354_v18 = vpop.f32.mrb[12].mxu1 }
 0x12d   :  { %v910_v19 = vpop.f32.mrb[13].mxu0  ;;  %v1102_v20 = vpop.f32.mrb[13].mxu1 }
 0x12e   :  { %v3356_v21 = vpop.f32.mrb[14].mxu0  ;;  %v3358_v22 = vpop.f32.mrb[14].mxu1 }
 0x12f   :  { %v913_v23 = vpop.f32.mrb[15].mxu0  ;;  %v1105_v24 = vpop.f32.mrb[15].mxu1 }
 0x134   :  { %v3360_v25 = vpop.f32.mrb[16].mxu0  ;;  %v3362_v26 = vpop.f32.mrb[16].mxu1 }
 0x135   :  { %v918_v27 = vpop.f32.mrb[17].mxu0  ;;  %v1110_v28 = vpop.f32.mrb[17].mxu1 }
 0x136   :  { %v3364_v29 = vpop.f32.mrb[18].mxu0  ;;  %v3366_v30 = vpop.f32.mrb[18].mxu1 }
 0x137   :  { %v921_v31 = vpop.f32.mrb[19].mxu0  ;;  %v1113_v32 = vpop.f32.mrb[19].mxu1 }
 0x13c   :  { %v3368_v33 = vpop.f32.mrb[20].mxu0  ;;  %v3370_v34 = vpop.f32.mrb[20].mxu1 }
 0x13d   :  { %v926_v35 = vpop.f32.mrb[21].mxu0  ;;  %v1118_v36 = vpop.f32.mrb[21].mxu1 }
 0x13e   :  { %v3372_v37 = vpop.f32.mrb[22].mxu0  ;;  %v3374_v38 = vpop.f32.mrb[22].mxu1 }
 0x13f   :  { %v929_v39 = vpop.f32.mrb[23].mxu0  ;;  %v1121_v40 = vpop.f32.mrb[23].mxu1 }
 0x144   :  { %v3376_v41 = vpop.f32.mrb[24].mxu0  ;;  %v3378_v42 = vpop.f32.mrb[24].mxu1 }
 0x145   :  { %v934_v43 = vpop.f32.mrb[25].mxu0  ;;  %v1126_v44 = vpop.f32.mrb[25].mxu1 }
 0x146   :  { %v3380_v45 = vpop.f32.mrb[26].mxu0  ;;  %v3382_v46 = vpop.f32.mrb[26].mxu1 }
 0x147   :  { %v937_v47 = vpop.f32.mrb[27].mxu0  ;;  %v1129_v48 = vpop.f32.mrb[27].mxu1 }
 0x14c   :  { %v3384_v49 = vpop.f32.mrb[28].mxu0  ;;  %v3386_v50 = vpop.f32.mrb[28].mxu1 }
 0x14d   :  { %v942_v51 = vpop.f32.mrb[29].mxu0  ;;  %v1134_v52 = vpop.f32.mrb[29].mxu1 }
 0x14e   :  { %v3388_v53 = vpop.f32.mrb[30].mxu0  ;;  %v3390_v54 = vpop.f32.mrb[30].mxu1 }
 0x14f   :  { %v945_v55 = vpop.f32.mrb[31].mxu0  ;;  %v1137_v56 = vpop.f32.mrb[31].mxu1 }
 0x154   :  { %v3392_v59 = vpop.f32.mrb[32].mxu0  ;;  %v2667_v60 = vpop.f32.mrb[32].mxu1 }
 0x155   :  { %v3394_v63 = vadd.f32 %v2667_v60, %v892_v1  ;;  %v950_v0 = vpop.f32.mrb[33].mxu0  ;;  %v1173_v3 = vpop.f32.mrb[33].mxu1 }
 0x156   :  { %v3397_v4 = vadd.f32 %v1173_v3, %v3334_v57  ;;  %v3399_v7 = vpop.f32.mrb[34].mxu0  ;;  %v2668_v8 = vpop.f32.mrb[34].mxu1 }
 0x157   :  { %v3401_v11 = vadd.f32 %v2668_v8, %v895_v5  ;;  %v953_v12 = vpop.f32.mrb[35].mxu0  ;;  %v1176_v15 = vpop.f32.mrb[35].mxu1  ;;  %v1499_v20 = vmul.f32 %v3394_v63, %v3394_v63 }
 0x158   :  { %v3404_v16 = vadd.f32 %v1176_v15, %v3338_v61  ;;  %v1497_v19 = vmul.f32 %v3397_v4, %v3397_v4 }
 0x159   :  { %v1500_v32 = vmul.f32 %v3401_v11, %v3401_v11 }
 0x15a   :  { %v1428_v1 = vadd.f32 %v3404_v16, %v3397_v4  ;;  %v1498_v57 = vmul.f32 %v3404_v16, %v3404_v16 }
 0x15c   :  { %v1429_v5 = vadd.f32 %v1428_v1, %v3394_v63  ;;  %v1561_v23 = vadd.f32 %v1498_v57, %v1497_v19  ;;  %v3415_v24 = vpop.f32.mrb[36].mxu0  ;;  %v2671_v27 = vpop.f32.mrb[36].mxu1 }
 0x15d   :  { %v3417_v61 = vadd.f32 %v2671_v27, %v908_v17  ;;  %v958_v28 = vpop.f32.mrb[37].mxu0  ;;  %v1189_v31 = vpop.f32.mrb[37].mxu1 }
 0x15e   :  { %v1430_v35 = vadd.f32 %v1429_v5, %v3401_v11  ;;  %v1562_v36 = vadd.f32 %v1561_v23, %v1499_v20  ;;  %v3423_v39 = vadd.f32 %v1189_v31, %v3346_v9  ;;  %v3425_v40 = vpop.f32.mrb[38].mxu0  ;;  %v2672_v43 = vpop.f32.mrb[38].mxu1 }
 0x15f   :  { %v3428_v44 = vadd.f32 %v2672_v43, %v3356_v21  ;;  %v961_v47 = vpop.f32.mrb[39].mxu0  ;;  %v1192_v17 = vpop.f32.mrb[39].mxu1  ;;  %v1503_v21 = vmul.f32 %v3417_v61, %v3417_v61 }
 0x160   :  { %v1563_v48 = vadd.f32 %v1562_v36, %v1500_v32  ;;  %v1431_v51 = vadd.f32 %v1430_v35, %v3423_v39  ;;  %v1501_v52 = vmul.f32 %v3423_v39, %v3423_v39  ;;  %v3434_v55 = vadd.f32 %v1192_v17, %v3350_v13 }
 0x161   :  { %v1504_v1 = vmul.f32 %v3428_v44, %v3428_v44 }
 0x162   :  { %v1564_v56 = vadd.f32 %v1563_v48, %v1501_v52  ;;  %v1432_v9 = vadd.f32 %v1431_v51, %v3434_v55  ;;  %v1502_v60 = vmul.f32 %v3434_v55, %v3434_v55 }
 0x164   :  { %v1433_v0 = vadd.f32 %v1432_v9, %v3417_v61  ;;  %v1565_v3 = vadd.f32 %v1564_v56, %v1502_v60  ;;  %v3442_v8 = vpop.f32.mrb[40].mxu0  ;;  %v2675_v12 = vpop.f32.mrb[40].mxu1 }
 0x165   :  { %v3445_v15 = vadd.f32 %v2675_v12, %v3368_v33  ;;  %v966_v13 = vpop.f32.mrb[41].mxu0  ;;  %v1205_v19 = vpop.f32.mrb[41].mxu1 }
 0x166   :  { %v1566_v57 = vadd.f32 %v1565_v3, %v1503_v21  ;;  %v3450_v20 = vadd.f32 %v1205_v19, %v3360_v25  ;;  %v1434_v5 = vadd.f32 %v1433_v0, %v3428_v44  ;;  %v3453_v23 = vpop.f32.mrb[42].mxu0  ;;  %v2676_v27 = vpop.f32.mrb[42].mxu1 }
 0x167   :  { %v3456_v28 = vadd.f32 %v2676_v27, %v3372_v37  ;;  %v969_v31 = vpop.f32.mrb[43].mxu0  ;;  %v1208_v33 = vpop.f32.mrb[43].mxu1  ;;  %v1507_v37 = vmul.f32 %v3445_v15, %v3445_v15 }
 0x168   :  { %v1435_v32 = vadd.f32 %v1434_v5, %v3450_v20  ;;  %v1505_v35 = vmul.f32 %v3450_v20, %v3450_v20  ;;  %v1567_v36 = vadd.f32 %v1566_v57, %v1504_v1  ;;  %v3462_v43 = vadd.f32 %v1208_v33, %v3364_v29 }
 0x169   :  { %v1508_v21 = vmul.f32 %v3456_v28, %v3456_v28 }
 0x16a   :  { %v1568_v25 = vadd.f32 %v1567_v36, %v1505_v35  ;;  %v1436_v47 = vadd.f32 %v1435_v32, %v3462_v43  ;;  %v1506_v17 = vmul.f32 %v3462_v43, %v3462_v43 }
 0x16c   :  { %v1437_v48 = vadd.f32 %v1436_v47, %v3445_v15  ;;  %v1569_v51 = vadd.f32 %v1568_v25, %v1506_v17  ;;  %v972_v52 = vpop.f32.mrb[44].mxu0  ;;  %v2679_v56 = vpop.f32.mrb[44].mxu1 }
 0x16d   :  { %v3471_v9 = vadd.f32 %v2679_v56, %v3384_v49  ;;  %v974_v60 = vpop.f32.mrb[45].mxu0  ;;  %v1221_v29 = vpop.f32.mrb[45].mxu1 }
 0x16e   :  { %v1570_v0 = vadd.f32 %v1569_v51, %v1507_v37  ;;  %v3476_v3 = vadd.f32 %v1221_v29, %v3376_v41  ;;  %v1438_v12 = vadd.f32 %v1437_v48, %v3456_v28  ;;  %v975_v13 = vpop.f32.mrb[46].mxu0  ;;  %v2680_v19 = vpop.f32.mrb[46].mxu1 }
 0x16f   :  { %v3480_v1 = vadd.f32 %v2680_v19, %v3388_v53  ;;  %v977_v57 = vpop.f32.mrb[47].mxu0  ;;  %v1224_v5 = vpop.f32.mrb[47].mxu1  ;;  %v1511_v53 = vmul.f32 %v3471_v9, %v3471_v9 }
 0x170   :  { %v1439_v49 = vadd.f32 %v1438_v12, %v3476_v3  ;;  %v1509_v27 = vmul.f32 %v3476_v3, %v3476_v3  ;;  %v1571_v31 = vadd.f32 %v1570_v0, %v1508_v21  ;;  %v3486_v33 = vadd.f32 %v1224_v5, %v3380_v45 }
 0x171   :  { %v1512_v51 = vmul.f32 %v3480_v1, %v3480_v1 }
 0x172   :  { %v1572_v41 = vadd.f32 %v1571_v31, %v1509_v27  ;;  %v1440_v32 = vadd.f32 %v1439_v49, %v3486_v33  ;;  %v1510_v35 = vmul.f32 %v3486_v33, %v3486_v33 }
 0x174   :  { %v1441_v36 = vadd.f32 %v1440_v32, %v3471_v9  ;;  %v1573_v25 = vadd.f32 %v1572_v41, %v1510_v35  ;;  %v980_v47 = vpop.f32.mrb[48].mxu0  ;;  %v2683_v17 = vpop.f32.mrb[48].mxu1 }
 0x175   :  { %v3495_v37 = vadd.f32 %v2683_v17, %v3415_v24  ;;  %v982_v48 = vpop.f32.mrb[49].mxu0  ;;  %v1237_v45 = vpop.f32.mrb[49].mxu1 }
 0x176   :  { %v1574_v56 = vadd.f32 %v1573_v25, %v1511_v53  ;;  %v3500_v60 = vadd.f32 %v1237_v45, %v3392_v59  ;;  %v1442_v29 = vadd.f32 %v1441_v36, %v3480_v1  ;;  %v983_v21 = vpop.f32.mrb[50].mxu0  ;;  %v2684_v0 = vpop.f32.mrb[50].mxu1 }
 0x177   :  { %v3504_v12 = vadd.f32 %v2684_v0, %v3425_v40  ;;  %v985_v19 = vpop.f32.mrb[51].mxu0  ;;  %v1240_v57 = vpop.f32.mrb[51].mxu1  ;;  %v1515_v40 = vmul.f32 %v3495_v37, %v3495_v37 }
 0x178   :  { %v1443_v24 = vadd.f32 %v1442_v29, %v3500_v60  ;;  %v1513_v5 = vmul.f32 %v3500_v60, %v3500_v60  ;;  %v1575_v49 = vadd.f32 %v1574_v56, %v1512_v51  ;;  %v3510_v27 = vadd.f32 %v1240_v57, %v3399_v7 }
 0x179   :  { %v1516_v7 = vmul.f32 %v3504_v12, %v3504_v12 }
 0x17a   :  { %v1576_v59 = vadd.f32 %v1575_v49, %v1513_v5  ;;  %v1444_v31 = vadd.f32 %v1443_v24, %v3510_v27  ;;  %v1514_v41 = vmul.f32 %v3510_v27, %v3510_v27 }
 0x17c   :  { %v1445_v32 = vadd.f32 %v1444_v31, %v3495_v37  ;;  %v1577_v35 = vadd.f32 %v1576_v59, %v1514_v41  ;;  %v988_v53 = vpop.f32.mrb[52].mxu0  ;;  %v2687_v36 = vpop.f32.mrb[52].mxu1 }
 0x17d   :  { %v3518_v25 = vadd.f32 %v2687_v36, %v972_v52  ;;  %v990_v17 = vpop.f32.mrb[53].mxu0  ;;  %v1253_v48 = vpop.f32.mrb[53].mxu1 }
 0x17e   :  { %v1578_v45 = vadd.f32 %v1577_v35, %v1515_v40  ;;  %v3523_v51 = vadd.f32 %v1253_v48, %v3442_v8  ;;  %v1446_v56 = vadd.f32 %v1445_v32, %v3504_v12  ;;  %v991_v29 = vpop.f32.mrb[54].mxu0  ;;  %v2688_v0 = vpop.f32.mrb[54].mxu1 }
 0x17f   :  { %4490 = vst [vmem:[#allocation2_spill] sm:$0xff] %v3518_v25  ;;  %v3526_v19 = vadd.f32 %v2688_v0, %v975_v13  ;;  %v993_v57 = vpop.f32.mrb[55].mxu0  ;;  %v1256_v24 = vpop.f32.mrb[55].mxu1  ;;  %v1519_v13 = vmul.f32 %v3518_v25, %v3518_v25 }
 0x180   :  { %4491 = vst [vmem:[#allocation3_spill] sm:$0xff] %v3523_v51  ;;  %v1447_v52 = vadd.f32 %v1446_v56, %v3523_v51  ;;  %v1517_v5 = vmul.f32 %v3523_v51, %v3523_v51  ;;  %v1579_v49 = vadd.f32 %v1578_v45, %v1516_v7  ;;  %v3532_v59 = vadd.f32 %v1256_v24, %v3453_v23 }
 0x181   :  { %4492 = vst [vmem:[#allocation4_spill] sm:$0xff] %v3526_v19  ;;  %v1520_v23 = vmul.f32 %v3526_v19, %v3526_v19 }
 0x182   :  { %4493 = vst [vmem:[#allocation5_spill] sm:$0xff] %v3532_v59  ;;  %v1580_v31 = vadd.f32 %v1579_v49, %v1517_v5  ;;  %v1448_v8 = vadd.f32 %v1447_v52, %v3532_v59  ;;  %v1518_v41 = vmul.f32 %v3532_v59, %v3532_v59 }
 0x184   :  { %v1449_v40 = vadd.f32 %v1448_v8, %v3518_v25  ;;  %v1581_v32 = vadd.f32 %v1580_v31, %v1518_v41  ;;  %v996_v35 = vpop.f32.mrb[56].mxu0  ;;  %v2691_v36 = vpop.f32.mrb[56].mxu1 }
 0x185   :  { %v3540_v17 = vadd.f32 %v2691_v36, %v988_v53  ;;  %v998_v48 = vpop.f32.mrb[57].mxu0  ;;  %v1269_v7 = vpop.f32.mrb[57].mxu1 }
 0x186   :  { %v1582_v45 = vadd.f32 %v1581_v32, %v1519_v13  ;;  %v3544_v56 = vadd.f32 %v1269_v7, %v980_v47  ;;  %v1450_v0 = vadd.f32 %v1449_v40, %v3526_v19  ;;  %v999_v57 = vpop.f32.mrb[58].mxu0  ;;  %v2692_v24 = vpop.f32.mrb[58].mxu1 }
 0x187   :  { %4494 = vst [vmem:[#allocation6_spill] sm:$0xff] %v3540_v17  ;;  %v3547_v52 = vadd.f32 %v2692_v24, %v991_v29  ;;  %v1001_v5 = vpop.f32.mrb[59].mxu0  ;;  %v1272_v49 = vpop.f32.mrb[59].mxu1  ;;  %v1523_v48 = vmul.f32 %v3540_v17, %v3540_v17 }
 0x188   :  { %4495 = vst [vmem:[#allocation7_spill] sm:$0xff] %v3544_v56  ;;  %v1451_v31 = vadd.f32 %v1450_v0, %v3544_v56  ;;  %v1521_v53 = vmul.f32 %v3544_v56, %v3544_v56  ;;  %v1583_v8 = vadd.f32 %v1582_v45, %v1520_v23  ;;  %v3552_v41 = vadd.f32 %v1272_v49, %v983_v21 }
 0x189   :  { %4496 = vst [vmem:[#allocation8_spill] sm:$0xff] %v3547_v52 }
 0x18a   :  { %4497 = vst [vmem:[#allocation9_spill] sm:$0xff] %v3552_v41  ;;  %v1584_v36 = vadd.f32 %v1583_v8, %v1521_v53  ;;  %v1452_v47 = vadd.f32 %v1451_v31, %v3552_v41  ;;  %v1522_v13 = vmul.f32 %v3552_v41, %v3552_v41 }
 0x18c   :  { %v1585_v40 = vadd.f32 %v1584_v36, %v1522_v13  ;;  %v1004_v32 = vpop.f32.mrb[60].mxu0  ;;  %v2695_v29 = vpop.f32.mrb[60].mxu1  ;;  %v1453_v7 = vadd.f32 %v1452_v47, %v3540_v17  ;;  %v1524_v13 = vmul.f32 %v3547_v52, %v3547_v52 }
 0x18d   :  { %v3560_v0 = vadd.f32 %v2695_v29, %v1004_v32  ;;  %v1006_v24 = vpop.f32.mrb[61].mxu0  ;;  %v1285_v23 = vpop.f32.mrb[61].mxu1 }
 0x18e   :  { %v3562_v21 = vadd.f32 %v1285_v23, %v996_v35  ;;  %v1007_v45 = vpop.f32.mrb[62].mxu0  ;;  %v2696_v5 = vpop.f32.mrb[62].mxu1  ;;  %v1586_v49 = vadd.f32 %v1585_v40, %v1523_v48  ;;  %v1454_v47 = vadd.f32 %v1453_v7, %v3547_v52 }
 0x18f   :  { %4498 = vst [vmem:[#allocation10_spill] sm:$0xff] %v3560_v0  ;;  %v3564_v31 = vadd.f32 %v2696_v5, %v1007_v45  ;;  %v1009_v53 = vpop.f32.mrb[63].mxu0  ;;  %v1288_v8 = vpop.f32.mrb[63].mxu1 }
 0x190   :  { %4499 = vst [vmem:[#allocation11_spill] sm:$0xff] %v3562_v21  ;;  %v3566_v36 = vadd.f32 %v1288_v8, %v999_v57  ;;  %v1525_v32 = vmul.f32 %v3562_v21, %v3562_v21  ;;  %v1587_v29 = vadd.f32 %v1586_v49, %v1524_v13  ;;  %v1455_v23 = vadd.f32 %v1454_v47, %v3562_v21 }
 0x191   :  { %4500 = vst [vmem:[#allocation12_spill] sm:$0xff] %v3564_v31  ;;  %v1527_v47 = vmul.f32 %v3560_v0, %v3560_v0 }
 0x192   :  { %4501 = vst [vmem:[#allocation13_spill] sm:$0xff] %v3566_v36  ;;  %v1588_v53 = vadd.f32 %v1587_v29, %v1525_v32  ;;  %v1526_v8 = vmul.f32 %v3566_v36, %v3566_v36  ;;  %v1456_v49 = vadd.f32 %v1455_v23, %v3566_v36  ;;  %v1528_v23 = vmul.f32 %v3564_v31, %v3564_v31 }
 0x194   :  { %v1012_v35 = vpop.f32.mrb[64].mxu0  ;;  %v2699_v24 = vpop.f32.mrb[64].mxu1  ;;  %v1589_v13 = vadd.f32 %v1588_v53, %v1526_v8 }
 0x195   :  { %v1014_v40 = vpop.f32.mrb[65].mxu0  ;;  %v1301_v48 = vpop.f32.mrb[65].mxu1 }
 0x196   :  { %v3574_v45 = vadd.f32 %v1301_v48, %v1012_v35  ;;  %v1015_v5 = vpop.f32.mrb[66].mxu0  ;;  %v2700_v57 = vpop.f32.mrb[66].mxu1  ;;  %v1457_v35 = vadd.f32 %v1456_v49, %v3560_v0 }
 0x197   :  { %v1017_v17 = vpop.f32.mrb[67].mxu0  ;;  %v1304_v7 = vpop.f32.mrb[67].mxu1 }
 0x198   :  { %4502 = vst [vmem:[#allocation14_spill] sm:$0xff] %v3574_v45  ;;  %v3578_v52 = vadd.f32 %v1304_v7, %v1015_v5  ;;  %v1590_v17 = vadd.f32 %v1589_v13, %v1527_v47  ;;  %v1458_v53 = vadd.f32 %v1457_v35, %v3564_v31  ;;  %v1529_v8 = vmul.f32 %v3574_v45, %v3574_v45 }
 0x19a   :  { %4503 = vst [vmem:[#allocation15_spill] sm:$0xff] %v3578_v52  ;;  %v1591_v49 = vadd.f32 %v1590_v17, %v1528_v23  ;;  %v1530_v36 = vmul.f32 %v3578_v52, %v3578_v52 }
 0x19c   :  { %v1020_v41 = vpop.f32.mrb[68].mxu0  ;;  %v2703_v56 = vpop.f32.mrb[68].mxu1 }
 0x19d   :  { %v3584_v40 = vadd.f32 %v2699_v24, %v1020_v41  ;;  %v1022_v32 = vpop.f32.mrb[69].mxu0  ;;  %v1317_v29 = vpop.f32.mrb[69].mxu1 }
 0x19e   :  { %v1023_v48 = vpop.f32.mrb[70].mxu0  ;;  %v2704_v21 = vpop.f32.mrb[70].mxu1  ;;  %v1459_v32 = vadd.f32 %v1458_v53, %v3574_v45 }
 0x19f   :  { %4504 = vst [vmem:[#allocation16_spill] sm:$0xff] %v3584_v40  ;;  %v3586_v19 = vadd.f32 %v2700_v57, %v1023_v48  ;;  %v1025_v5 = vpop.f32.mrb[71].mxu0  ;;  %v1320_v7 = vpop.f32.mrb[71].mxu1  ;;  %v1531_v23 = vmul.f32 %v3584_v40, %v3584_v40 }
 0x1a0   :  { %v1592_v5 = vadd.f32 %v1591_v49, %v1529_v8  ;;  %v1460_v17 = vadd.f32 %v1459_v32, %v3578_v52 }
 0x1a1   :  { %4505 = vst [vmem:[#allocation17_spill] sm:$0xff] %v3586_v19  ;;  %v1532_v8 = vmul.f32 %v3586_v19, %v3586_v19 }
 0x1a2   :  { %v1461_v53 = vadd.f32 %v1460_v17, %v3584_v40 }
 0x1a4   :  { %v1028_v41 = vpop.f32.mrb[72].mxu0  ;;  %v2707_v24 = vpop.f32.mrb[72].mxu1  ;;  %v1462_v32 = vadd.f32 %v1461_v53, %v3586_v19 }
 0x1a5   :  { %v3594_v0 = vadd.f32 %v1317_v29, %v1028_v41  ;;  %v1030_v13 = vpop.f32.mrb[73].mxu0  ;;  %v1333_v57 = vpop.f32.mrb[73].mxu1  ;;  %v1593_v29 = vadd.f32 %v1592_v5, %v1530_v36 }
 0x1a6   :  { %v1031_v47 = vpop.f32.mrb[74].mxu0  ;;  %v3596_v48 = vpop.f32.mrb[74].mxu1 }
 0x1a7   :  { %4506 = vst [vmem:[#allocation18_spill] sm:$0xff] %v3594_v0  ;;  %v3600_v35 = vadd.f32 %v1320_v7, %v1031_v47  ;;  %v1033_v31 = vpop.f32.mrb[75].mxu0  ;;  %v1336_v25 = vpop.f32.mrb[75].mxu1  ;;  %v1594_v45 = vadd.f32 %v1593_v29, %v1531_v23  ;;  %v1533_v36 = vmul.f32 %v3594_v0, %v3594_v0  ;;  %v1463_v29 = vadd.f32 %v1462_v32, %v3594_v0 }
 0x1a9   :  { %4507 = vst [vmem:[#allocation19_spill] sm:$0xff] %v3600_v35  ;;  %v1595_v23 = vadd.f32 %v1594_v45, %v1532_v8  ;;  %v1464_v51 = vadd.f32 %v1463_v29, %v3600_v35 }
 0x1ab   :  { %v1596_v52 = vadd.f32 %v1595_v23, %v1533_v36 }
 0x1ac   :  { %v1036_v41 = vpop.f32.mrb[76].mxu0  ;;  %v3606_v13 = vpop.f32.mrb[76].mxu1 }
 0x1ad   :  { %v3610_v49 = vadd.f32 %v2703_v56, %v1036_v41  ;;  %v1038_v7 = vpop.f32.mrb[77].mxu0  ;;  %v1349_v31 = vpop.f32.mrb[77].mxu1  ;;  %v1534_v56 = vmul.f32 %v3600_v35, %v3600_v35 }
 0x1ae   :  { %v1039_v47 = vpop.f32.mrb[78].mxu0  ;;  %v3612_v59 = vpop.f32.mrb[78].mxu1 }
 0x1af   :  { %v3617_v5 = vadd.f32 %v2704_v21, %v1039_v47  ;;  %v1041_v17 = vpop.f32.mrb[79].mxu0  ;;  %v1352_v40 = vpop.f32.mrb[79].mxu1  ;;  %v1535_v53 = vmul.f32 %v3610_v49, %v3610_v49  ;;  %v1465_v23 = vadd.f32 %v1464_v51, %v3610_v49 }
 0x1b0   :  { %v1597_v17 = vadd.f32 %v1596_v52, %v1534_v56 }
 0x1b4   :  { %v1044_v41 = vpop.f32.mrb[80].mxu0  ;;  %v2715_v7 = vpop.f32.mrb[80].mxu1 }
 0x1b5   :  { %v3625_v19 = vadd.f32 %v1333_v57, %v1044_v41  ;;  %v3628_v21 = vadd.f32 %v2715_v7, %v3342_v2  ;;  %v1046_v47 = vpop.f32.mrb[81].mxu0  ;;  %v1365_v45 = vpop.f32.mrb[81].mxu1  ;;  %v1598_v41 = vadd.f32 %v1597_v17, %v1535_v53  ;;  %v1466_v7 = vadd.f32 %v1465_v23, %v3617_v5 }
 0x1b6   :  { %v3631_v8 = vadd.f32 %v1365_v45, %v3336_v58  ;;  %v1047_v32 = vpop.f32.mrb[82].mxu0  ;;  %v2716_v36 = vpop.f32.mrb[82].mxu1  ;;  %v1536_v58 = vmul.f32 %v3617_v5, %v3617_v5 }
 0x1b7   :  { %4508 = vst [vmem:[#allocation20_spill] sm:$0xff] %v3628_v21  ;;  %v3634_v0 = vadd.f32 %v1336_v25, %v1047_v32  ;;  %v1049_v29 = vpop.f32.mrb[83].mxu0  ;;  %v1368_v35 = vpop.f32.mrb[83].mxu1  ;;  %v3637_v57 = vadd.f32 %v2716_v36, %v3344_v6  ;;  %v1537_v52 = vmul.f32 %v3625_v19, %v3625_v19  ;;  %v1467_v47 = vadd.f32 %v1466_v7, %v3625_v19 }
 0x1b8   :  { %v3640_v2 = vadd.f32 %v1368_v35, %v3340_v62  ;;  %v1599_v56 = vadd.f32 %v1598_v41, %v1536_v58 }
 0x1b9   :  { %4509 = vst [vmem:[#allocation21_spill] sm:$0xff] %v3637_v57  ;;  %v1538_v23 = vmul.f32 %v3634_v0, %v3634_v0 }
 0x1ba   :  { %4510 = vst [vmem:[#allocation22_spill] sm:$0xff] %v3640_v2  ;;  %v1600_v17 = vadd.f32 %v1599_v56, %v1537_v52 }
 0x1bc   :  { %v1052_v51 = vpop.f32.mrb[84].mxu0  ;;  %v2719_v25 = vpop.f32.mrb[84].mxu1  ;;  %v1601_v52 = vadd.f32 %v1600_v17, %v1538_v23 }
 0x1bd   :  { %v3648_v45 = vadd.f32 %v2707_v24, %v1052_v51  ;;  %v3651_v6 = vadd.f32 %v2719_v25, %v3354_v18  ;;  %v1054_v62 = vpop.f32.mrb[85].mxu0  ;;  %v1381_v35 = vpop.f32.mrb[85].mxu1 }
 0x1be   :  { %v3654_v53 = vadd.f32 %v1381_v35, %v3348_v10  ;;  %v1055_v32 = vpop.f32.mrb[86].mxu0  ;;  %v2720_v36 = vpop.f32.mrb[86].mxu1  ;;  %v1468_v10 = vadd.f32 %v1467_v47, %v3634_v0 }
 0x1bf   :  { %4511 = vst [vmem:[#allocation23_spill] sm:$0xff] %v3651_v6  ;;  %v3659_v29 = vadd.f32 %v3596_v48, %v1055_v32  ;;  %v1057_v41 = vpop.f32.mrb[87].mxu0  ;;  %v1384_v24 = vpop.f32.mrb[87].mxu1  ;;  %v3662_v58 = vadd.f32 %v2720_v36, %v3358_v22  ;;  %v1539_v7 = vmul.f32 %v3648_v45, %v3648_v45 }
 0x1c0   :  { %4512 = vst [vmem:[#allocation24_spill] sm:$0xff] %v3654_v53  ;;  %v3665_v18 = vadd.f32 %v1384_v24, %v3352_v14  ;;  %v1469_v51 = vadd.f32 %v1468_v10, %v3648_v45 }
 0x1c1   :  { %v1602_v48 = vadd.f32 %v1601_v52, %v1539_v7  ;;  %v1540_v62 = vmul.f32 %v3659_v29, %v3659_v29 }
 0x1c2   :  { %4513 = vst [vmem:[#allocation25_spill] sm:$0xff] %v3665_v18  ;;  %v1470_v23 = vadd.f32 %v1469_v51, %v3659_v29 }
 0x1c3   :  { %v1603_v52 = vadd.f32 %v1602_v48, %v1540_v62 }
 0x1c4   :  { %v1060_v25 = vpop.f32.mrb[88].mxu0  ;;  %v2723_v56 = vpop.f32.mrb[88].mxu1 }
 0x1c5   :  { %v3673_v35 = vadd.f32 %v1349_v31, %v1060_v25  ;;  %v3676_v22 = vadd.f32 %v2723_v56, %v3370_v34  ;;  %v1062_v14 = vpop.f32.mrb[89].mxu0  ;;  %v1397_v32 = vpop.f32.mrb[89].mxu1 }
 0x1c6   :  { %v3679_v47 = vadd.f32 %v1397_v32, %v3362_v26  ;;  %v1063_v36 = vpop.f32.mrb[90].mxu0  ;;  %v2724_v17 = vpop.f32.mrb[90].mxu1 }
 0x1c7   :  { %v1541_v41 = vmul.f32 %v3673_v35, %v3673_v35  ;;  %v3684_v24 = vadd.f32 %v1352_v40, %v1063_v36  ;;  %v1065_v10 = vpop.f32.mrb[91].mxu0  ;;  %v1400_v31 = vpop.f32.mrb[91].mxu1  ;;  %v3687_v7 = vadd.f32 %v2724_v17, %v3374_v38  ;;  %v1471_v26 = vadd.f32 %v1470_v23, %v3673_v35 }
 0x1c8   :  { %v3690_v34 = vadd.f32 %v1400_v31, %v3366_v30 }
 0x1c9   :  { %v1604_v25 = vadd.f32 %v1603_v52, %v1541_v41  ;;  %v1542_v51 = vmul.f32 %v3684_v24, %v3684_v24  ;;  %v1472_v40 = vadd.f32 %v1471_v26, %v3684_v24 }
 0x1cb   :  { %v1605_v23 = vadd.f32 %v1604_v25, %v1542_v51  ;;  %v1545_v51 = vmul.f32 %v3631_v8, %v3631_v8 }
 0x1cc   :  { %v1068_v56 = vpop.f32.mrb[92].mxu0  ;;  %v2727_v14 = vpop.f32.mrb[92].mxu1 }
 0x1cd   :  { %v3697_v32 = vadd.f32 %v3606_v13, %v1068_v56  ;;  %v3700_v38 = vadd.f32 %v2727_v14, %v3386_v50  ;;  %v1070_v36 = vpop.f32.mrb[93].mxu0  ;;  %v1413_v30 = vpop.f32.mrb[93].mxu1 }
 0x1ce   :  { %v3703_v48 = vadd.f32 %v1413_v30, %v3378_v42  ;;  %v1071_v62 = vpop.f32.mrb[94].mxu0  ;;  %v2728_v17 = vpop.f32.mrb[94].mxu1 }
 0x1cf   :  { %v1473_v41 = vadd.f32 %v1472_v40, %v3697_v32  ;;  %v1543_v10 = vmul.f32 %v3697_v32, %v3697_v32  ;;  %v3709_v31 = vadd.f32 %v3612_v59, %v1071_v62  ;;  %v1073_v13 = vpop.f32.mrb[95].mxu0  ;;  %v1416_v52 = vpop.f32.mrb[95].mxu1  ;;  %v3712_v50 = vadd.f32 %v2728_v17, %v3390_v54 }
 0x1d0   :  { %v3715_v26 = vadd.f32 %v1416_v52, %v3382_v46  ;;  %v1546_v40 = vmul.f32 %v3640_v2, %v3640_v2  ;;  %v1547_v46 = vmul.f32 %v3628_v21, %v3628_v21  ;;  %v1548_v17 = vmul.f32 %v3637_v57, %v3637_v57 }
 0x1d1   :  { %v1606_v42 = vadd.f32 %v1605_v23, %v1543_v10  ;;  %v1474_v56 = vadd.f32 %v1473_v41, %v3709_v31  ;;  %v1544_v25 = vmul.f32 %v3709_v31, %v3709_v31  ;;  %v1549_v10 = vmul.f32 %v3654_v53, %v3654_v53 }
 0x1d3   :  { %v1475_v59 = vadd.f32 %v1474_v56, %v3631_v8  ;;  %v1607_v14 = vadd.f32 %v1606_v42, %v1544_v25  ;;  %v1550_v42 = vmul.f32 %v3665_v18, %v3665_v18 }
 0x1d5   :  { %v1476_v54 = vadd.f32 %v1475_v59, %v3640_v2  ;;  %v1608_v36 = vadd.f32 %v1607_v14, %v1545_v51  ;;  %v1551_v51 = vmul.f32 %v3651_v6, %v3651_v6 }
 0x1d7   :  { %v1477_v30 = vadd.f32 %v1476_v54, %v3628_v21  ;;  %v1609_v62 = vadd.f32 %v1608_v36, %v1546_v40  ;;  %v1552_v40 = vmul.f32 %v3662_v58, %v3662_v58 }
 0x1d9   :  { %v1478_v23 = vadd.f32 %v1477_v30, %v3637_v57  ;;  %v1610_v41 = vadd.f32 %v1609_v62, %v1547_v46  ;;  %v1553_v46 = vmul.f32 %v3679_v47, %v3679_v47 }
 0x1db   :  { %v1479_v13 = vadd.f32 %v1478_v23, %v3654_v53  ;;  %v1611_v52 = vadd.f32 %v1610_v41, %v1548_v17  ;;  %v1554_v17 = vmul.f32 %v3690_v34, %v3690_v34 }
 0x1dd   :  { %v1480_v56 = vadd.f32 %v1479_v13, %v3665_v18  ;;  %v1612_v25 = vadd.f32 %v1611_v52, %v1549_v10  ;;  %v1555_v10 = vmul.f32 %v3676_v22, %v3676_v22 }
 0x1df   :  { %v1613_v59 = vadd.f32 %v1612_v25, %v1550_v42  ;;  %v1481_v14 = vadd.f32 %v1480_v56, %v3651_v6  ;;  %v1556_v42 = vmul.f32 %v3687_v7, %v3687_v7 }
 0x1e1   :  { %v1482_v54 = vadd.f32 %v1481_v14, %v3662_v58  ;;  %v1614_v36 = vadd.f32 %v1613_v59, %v1551_v51  ;;  %v1557_v51 = vmul.f32 %v3703_v48, %v3703_v48 }
 0x1e3   :  { %v1483_v30 = vadd.f32 %v1482_v54, %v3679_v47  ;;  %v1615_v62 = vadd.f32 %v1614_v36, %v1552_v40  ;;  %v1558_v54 = vmul.f32 %v3715_v26, %v3715_v26 }
 0x1e5   :  { %v1484_v23 = vadd.f32 %v1483_v30, %v3690_v34  ;;  %v1616_v41 = vadd.f32 %v1615_v62, %v1553_v46  ;;  %v1559_v46 = vmul.f32 %v3700_v38, %v3700_v38 }
 0x1e7   :  { %v1485_v13 = vadd.f32 %v1484_v23, %v3676_v22  ;;  %v1617_v52 = vadd.f32 %v1616_v41, %v1554_v17  ;;  %v1560_v17 = vmul.f32 %v3712_v50, %v3712_v50 }
 0x1e9   :  { %v1486_v56 = vadd.f32 %v1485_v13, %v3687_v7  ;;  %v1618_v25 = vadd.f32 %v1617_v52, %v1555_v10 }
 0x1eb   :  { %v1487_v59 = vadd.f32 %v1486_v56, %v3703_v48  ;;  %v1619_v14 = vadd.f32 %v1618_v25, %v1556_v42 }
 0x1ed   :  { %v1488_v40 = vadd.f32 %v1487_v59, %v3715_v26  ;;  %v1620_v36 = vadd.f32 %v1619_v14, %v1557_v51 }
 0x1ef   :  { %v1489_v30 = vadd.f32 %v1488_v40, %v3700_v38  ;;  %v1621_v62 = vadd.f32 %v1620_v36, %v1558_v54 }
 0x1f1   :  { %v1490_v23 = vadd.f32 %v1489_v30, %v3712_v50  ;;  %v1622_v41 = vadd.f32 %v1621_v62, %v1559_v46  ;;  %v1643_v46 = vlaneseq }
 0x1f3   :  { %v1491_v10 = vrot.slane %v1490_v23, 4  ;;  %v1623_v13 = vadd.f32 %v1622_v41, %v1560_v17  ;;  %v3768_v62 = vshrl.u32 %v1643_v46, 7  ;;  %v1635_v17 = vld [vmem:[%s4457_s2] sm:$0x1]  ;;  %v4521_v46 = vld [vmem:[#allocation8_spill] sm:$0xff] }
 0x1f5   :  { %v1492_v52 = vadd.f32 %v1491_v10, %v1490_v23  ;;  %v1624_v42 = vrot.slane %v1623_v13, 4  ;;  %v4484_v23 = vsub.s32 0, %v3768_v62 }
 0x1f7   :  { %v1493_v56 = vrot.slane %v1492_v52, 2  ;;  %v1625_v25 = vadd.f32 %v1624_v42, %v1623_v13 }
 0x1f9   :  { %v1494_v59 = vadd.f32 %v1493_v56, %v1492_v52  ;;  %v1626_v51 = vrot.slane %v1625_v25, 2  ;;  %v4514_v56 = vld [vmem:[#allocation3_spill] sm:$0xff] }
 0x1fb   :  { %v1495_v14 = vrot.slane %v1494_v59, 1  ;;  %v1627_v6 = vadd.f32 %v1626_v51, %v1625_v25  ;;  %v4515_v25 = vld [vmem:[#allocation5_spill] sm:$0xff]  ;;  %v4517_v51 = vld [vmem:[#allocation4_spill] sm:$0xff] }
 0x1fd   :  { %v1496_v18 = vadd.f32 %v1495_v14, %v1494_v59  ;;  %v1628_v53 = vrot.slane %v1627_v6, 1  ;;  %v4516_v59 = vld [vmem:[#allocation2_spill] sm:$0xff]  ;;  %v4518_v14 = vld [vmem:[#allocation7_spill] sm:$0xff] }
 0x1ff   :  { %v1629_v40 = vadd.f32 %v1628_v53, %v1627_v6  ;;  %v1630_v54 = vmul.f32 0.001953125, %v1496_v18  ;;  %v3777_v6 = vld [vmem:[%s4458_s3] sm:$0x1] }
 0x201   :  { %v1631_v36 = vmul.f32 0.001953125, %v1629_v40  ;;  %v1632_v57 = vmul.f32 %v1630_v54, %v1630_v54  ;;  %v4519_v40 = vld [vmem:[#allocation9_spill] sm:$0xff] }
 0x203   :  { %v1633_v21 = vsub.f32 %v1631_v36, %v1632_v57  ;;  %v4520_v36 = vld [vmem:[#allocation6_spill] sm:$0xff] }
 0x205   :  { %v1634_v2 = vmax.f32 %v1633_v21, 0.0 }
 0x207   :  { %v1636_v30 = vadd.f32 1e-05, %v1634_v2 }
 0x209   :  { %2914 = vrsqrt.f32 %v1636_v30 }
 0x213   :  { %v2915_v41 = vpop.eup %2914 }
 0x214   :  { %v1638_v10 = vmul.f32 %v2915_v41, %v1635_v17  ;;  %v4522_v41 = vld [vmem:[#allocation11_spill] sm:$0xff] }
 0x216   :  { %v3779_v57 = vmul.f32 %v1638_v10, %v1630_v54  ;;  %v3783_v21 = vrot.slane %v1638_v10, %v4484_v23  ;;  %v4531_v23 = vld [vmem:[#allocation17_spill] sm:$0xff] }
 0x218   :  { %v1641_v2 = vsub.f32 %v3777_v6, %v3779_v57  ;;  %v3789_v53 = vmul.f32 %v3783_v21, %v3397_v4  ;;  %v3793_v18 = vmul.f32 %v3783_v21, %v3404_v16  ;;  %v3797_v13 = vmul.f32 %v3783_v21, %v3394_v63  ;;  %v4523_v6 = vld [vmem:[#allocation13_spill] sm:$0xff] }
 0x219   :  { %v3801_v52 = vmul.f32 %v3783_v21, %v3401_v11  ;;  %v3805_v42 = vmul.f32 %v3783_v21, %v3423_v39  ;;  %v3809_v4 = vmul.f32 %v3783_v21, %v3434_v55  ;;  %v3813_v16 = vmul.f32 %v3783_v21, %v3417_v61 }
 0x21a   :  { %v3817_v63 = vmul.f32 %v3783_v21, %v3428_v44  ;;  %v3821_v11 = vmul.f32 %v3783_v21, %v3450_v20  ;;  %v3825_v39 = vmul.f32 %v3783_v21, %v3462_v43  ;;  %v3829_v55 = vmul.f32 %v3783_v21, %v3445_v15 }
 0x21b   :  { %v3833_v61 = vmul.f32 %v3783_v21, %v3456_v28  ;;  %v3837_v44 = vmul.f32 %v3783_v21, %v3476_v3  ;;  %v3841_v20 = vmul.f32 %v3783_v21, %v3486_v33  ;;  %v3845_v43 = vmul.f32 %v3783_v21, %v3471_v9 }
 0x21c   :  { %v3849_v15 = vmul.f32 %v3783_v21, %v3480_v1  ;;  %v3853_v28 = vmul.f32 %v3783_v21, %v3500_v60  ;;  %v3857_v3 = vmul.f32 %v3783_v21, %v3510_v27  ;;  %v3861_v33 = vmul.f32 %v3783_v21, %v3495_v37 }
 0x21d   :  { %v3865_v9 = vmul.f32 %v3783_v21, %v3504_v12  ;;  %v3869_v1 = vmul.f32 %v3783_v21, %v4514_v56  ;;  %v3873_v60 = vmul.f32 %v3783_v21, %v4515_v25  ;;  %v3877_v27 = vmul.f32 %v3783_v21, %v4516_v59  ;;  %v4524_v56 = vld [vmem:[#allocation10_spill] sm:$0xff]  ;;  %v4526_v59 = vld [vmem:[#allocation12_spill] sm:$0xff] }
 0x21e   :  { %v3881_v37 = vmul.f32 %v3783_v21, %v4517_v51  ;;  %v3885_v12 = vmul.f32 %v3783_v21, %v4518_v14  ;;  %v3889_v54 = vmul.f32 %v3783_v21, %v4519_v40  ;;  %v3893_v30 = vmul.f32 %v3783_v21, %v4520_v36  ;;  %v4528_v14 = vld [vmem:[#allocation14_spill] sm:$0xff]  ;;  %v4529_v36 = vld [vmem:[#allocation15_spill] sm:$0xff] }
 0x21f   :  { %v3897_v17 = vmul.f32 %v3783_v21, %v4521_v46  ;;  %v3901_v10 = vmul.f32 %v3783_v21, %v4522_v41  ;;  %v3905_v57 = vmul.f32 %v3783_v21, %v4523_v6  ;;  %v3909_v25 = vmul.f32 %v3783_v21, %v4524_v56  ;;  %v4530_v41 = vld [vmem:[#allocation16_spill] sm:$0xff] }
 0x220   :  { %v3913_v51 = vmul.f32 %v3783_v21, %v4526_v59  ;;  %v3917_v40 = vmul.f32 %v3783_v21, %v4528_v14  ;;  %v3921_v46 = vmul.f32 %v3783_v21, %v4529_v36  ;;  %v3925_v6 = vmul.f32 %v3783_v21, %v4530_v41 }
 0x221   :  { %4525 = vst [vmem:[#allocation3_spill] sm:$0xff] %v3909_v25  ;;  %v3929_v56 = vmul.f32 %v3783_v21, %v4531_v23  ;;  %v4532_v25 = vld [vmem:[#allocation18_spill] sm:$0xff]  ;;  %v3941_v36 = vmul.f32 %v3783_v21, %v3610_v49  ;;  %v3945_v41 = vmul.f32 %v3783_v21, %v3617_v5  ;;  %v3949_v23 = vmul.f32 %v3783_v21, %v3625_v19 }
 0x222   :  { %4527 = vst [vmem:[#allocation5_spill] sm:$0xff] %v3913_v51  ;;  %v3933_v59 = vmul.f32 %v3783_v21, %v4532_v25  ;;  %v4533_v51 = vld [vmem:[#allocation19_spill] sm:$0xff]  ;;  %v3953_v25 = vmul.f32 %v3783_v21, %v3634_v0  ;;  %v3961_v49 = vmul.f32 %v3783_v21, %v3659_v29  ;;  %v3965_v5 = vmul.f32 %v3783_v21, %v3673_v35 }
 0x223   :  { %v3937_v14 = vmul.f32 %v3783_v21, %v4533_v51  ;;  %v3957_v51 = vmul.f32 %v3783_v21, %v3648_v45  ;;  %v3969_v19 = vmul.f32 %v3783_v21, %v3684_v24  ;;  %v3973_v0 = vmul.f32 %v3783_v21, %v3697_v32 }
 0x224   :  { %v3977_v45 = vmul.f32 %v3783_v21, %v3709_v31  ;;  %v3981_v29 = vmul.f32 %v3783_v21, %v3631_v8  ;;  %v3985_v35 = vmul.f32 %v3783_v21, %v3662_v58  ;;  %v3989_v24 = vmul.f32 %v3783_v21, %v3679_v47 }
 0x225   :  { %v3993_v32 = vmul.f32 %v3783_v21, %v3690_v34  ;;  %v3997_v31 = vmul.f32 %v3783_v21, %v3676_v22  ;;  %v4001_v8 = vmul.f32 %v3783_v21, %v3687_v7  ;;  %v4005_v58 = vmul.f32 %v3783_v21, %v3703_v48 }
 0x226   :  { %4534 = vst [vmem:[#allocation2_spill] sm:$0xff] %v3985_v35  ;;  %4535 = vst [vmem:[#allocation4_spill] sm:$0xff] %v3989_v24  ;;  %v4009_v47 = vmul.f32 %v3783_v21, %v3715_v26  ;;  %v4013_v34 = vmul.f32 %v3783_v21, %v3700_v38  ;;  %v4021_v7 = vmul.f32 %v3783_v21, %v3712_v50  ;;  %v4544_v48 = vsub.s32 0, %v3768_v62  ;;  %v4545_v26 = vld [vmem:[#allocation21_spill] sm:$0xff]  ;;  %v4548_v35 = vld [vmem:[#allocation23_spill] sm:$0xff] }
 0x227   :  { %4536 = vst [vmem:[#allocation7_spill] sm:$0xff] %v3993_v32  ;;  %4537 = vst [vmem:[#allocation9_spill] sm:$0xff] %v3997_v31  ;;  %v4542_v32 = vld [vmem:[#allocation22_spill] sm:$0xff]  ;;  %v4543_v31 = vld [vmem:[#allocation20_spill] sm:$0xff] }
 0x228   :  { %4538 = vst [vmem:[#allocation6_spill] sm:$0xff] %v4001_v8  ;;  %4539 = vst [vmem:[#allocation8_spill] sm:$0xff] %v4005_v58  ;;  %v1697_v22 = vmul.f32 %v3783_v21, %v4542_v32  ;;  %v1698_v24 = vmul.f32 %v3783_v21, %v4543_v31  ;;  %v4025_v58 = vrot.slane %v1641_v2, %v4544_v48  ;;  %v4546_v8 = vld [vmem:[#allocation24_spill] sm:$0xff] }
 0x229   :  { %4540 = vst [vmem:[#allocation11_spill] sm:$0xff] %v4009_v47  ;;  %4541 = vst [vmem:[#allocation13_spill] sm:$0xff] %v4013_v34  ;;  %v1699_v47 = vmul.f32 %v3783_v21, %v4545_v26  ;;  %v1700_v38 = vmul.f32 %v3783_v21, %v4546_v8  ;;  %v4547_v34 = vld [vmem:[#allocation25_spill] sm:$0xff]  ;;  %v1702_v31 = vmul.f32 %v3783_v21, %v4548_v35 }
 0x22a   :  { %v1701_v32 = vmul.f32 %v3783_v21, %v4547_v34  ;;  %v4037_v50 = vadd.f32 %v4025_v58, %v3789_v53  ;;  %v4041_v62 = vadd.f32 %v4025_v58, %v3793_v18  ;;  %v4045_v2 = vadd.f32 %v4025_v58, %v3797_v13  ;;  %v4555_v35 = vld [vmem:[#allocation5_spill] sm:$0xff] }
 0x22b   :  { %v4049_v8 = vadd.f32 %v4025_v58, %v3801_v52  ;;  %v4053_v34 = vadd.f32 %v4025_v58, %v3805_v42  ;;  %v4057_v21 = vadd.f32 %v4025_v58, %v3809_v4  ;;  %v4061_v53 = vadd.f32 %v4025_v58, %v3813_v16 }
 0x22c   :  { %4549 = vst [vmem:[#allocation10_spill] sm:$0xff] %v4037_v50  ;;  %4550 = vst [vmem:[#allocation12_spill] sm:$0xff] %v4041_v62  ;;  %v4065_v18 = vadd.f32 %v4025_v58, %v3817_v63  ;;  %v4069_v13 = vadd.f32 %v4025_v58, %v3821_v11  ;;  %v4073_v52 = vadd.f32 %v4025_v58, %v3825_v39 }
 0x22d   :  { %4551 = vst [vmem:[#allocation14_spill] sm:$0xff] %v4045_v2  ;;  %4552 = vst [vmem:[#allocation15_spill] sm:$0xff] %v4049_v8  ;;  %v4077_v42 = vadd.f32 %v4025_v58, %v3829_v55  ;;  %v4081_v4 = vadd.f32 %v4025_v58, %v3833_v61  ;;  %v4085_v16 = vadd.f32 %v4025_v58, %v3837_v44 }
 0x22e   :  { %4553 = vst [vmem:[#allocation16_spill] sm:$0xff] %v4053_v34  ;;  %v4089_v63 = vadd.f32 %v4025_v58, %v3841_v20  ;;  %v4093_v11 = vadd.f32 %v4025_v58, %v3845_v43  ;;  %v4097_v39 = vadd.f32 %v4025_v58, %v3849_v15  ;;  %v4101_v55 = vadd.f32 %v4025_v58, %v3853_v28 }
 0x22f   :  { %v4105_v61 = vadd.f32 %v4025_v58, %v3857_v3  ;;  %v4109_v44 = vadd.f32 %v4025_v58, %v3861_v33  ;;  %v4113_v20 = vadd.f32 %v4025_v58, %v3865_v9  ;;  %v4117_v43 = vadd.f32 %v4025_v58, %v3869_v1 }
 0x230   :  { %v4121_v15 = vadd.f32 %v4025_v58, %v3873_v60  ;;  %v4125_v28 = vadd.f32 %v4025_v58, %v3877_v27  ;;  %v4129_v3 = vadd.f32 %v4025_v58, %v3881_v37  ;;  %v4133_v33 = vadd.f32 %v4025_v58, %v3885_v12  ;;  %v4554_v12 = vld [vmem:[#allocation3_spill] sm:$0xff] }
 0x231   :  { %v4137_v9 = vadd.f32 %v4025_v58, %v3889_v54  ;;  %v4141_v1 = vadd.f32 %v4025_v58, %v3893_v30  ;;  %v4145_v60 = vadd.f32 %v4025_v58, %v3897_v17  ;;  %v4149_v27 = vadd.f32 %v4025_v58, %v3901_v10 }
 0x232   :  { %v4153_v37 = vadd.f32 %v4025_v58, %v3905_v57  ;;  %v4157_v54 = vadd.f32 %v4025_v58, %v4554_v12  ;;  %v4161_v30 = vadd.f32 %v4025_v58, %v4555_v35  ;;  %v4165_v17 = vadd.f32 %v4025_v58, %v3917_v40 }
 0x233   :  { %v4169_v10 = vadd.f32 %v4025_v58, %v3921_v46  ;;  %v4173_v57 = vadd.f32 %v4025_v58, %v3925_v6  ;;  %v4177_v48 = vadd.f32 %v4025_v58, %v3929_v56  ;;  %v4181_v26 = vadd.f32 %v4025_v58, %v3933_v59 }
 0x234   :  { %v4185_v40 = vadd.f32 %v4025_v58, %v3937_v14  ;;  %v4189_v46 = vadd.f32 %v4025_v58, %v3941_v36  ;;  %v4193_v6 = vadd.f32 %v4025_v58, %v3945_v41  ;;  %v4197_v56 = vadd.f32 %v4025_v58, %v3949_v23 }
 0x235   :  { %v4201_v59 = vadd.f32 %v4025_v58, %v3953_v25  ;;  %v4205_v14 = vadd.f32 %v4025_v58, %v3957_v51  ;;  %v4209_v36 = vadd.f32 %v4025_v58, %v3961_v49  ;;  %v4213_v41 = vadd.f32 %v4025_v58, %v3965_v5 }
 0x236   :  { %v4217_v23 = vadd.f32 %v4025_v58, %v3969_v19  ;;  %v4221_v25 = vadd.f32 %v4025_v58, %v3973_v0  ;;  %v4225_v51 = vadd.f32 %v4025_v58, %v3977_v45  ;;  %v4229_v49 = vadd.f32 %v4025_v58, %v3981_v29  ;;  %v4560_v29 = vld [vmem:[#allocation2_spill] sm:$0xff] }
 0x237   :  { %v4232_v12 = vadd.f32 %v4025_v58, %v1697_v22  ;;  %v4235_v5 = vadd.f32 %v4025_v58, %v1698_v24  ;;  %v4238_v19 = vadd.f32 %v4025_v58, %v1699_v47  ;;  %v4241_v0 = vadd.f32 %v4025_v58, %v1700_v38  ;;  %v4562_v22 = vld [vmem:[#allocation4_spill] sm:$0xff]  ;;  %v4565_v38 = vld [vmem:[#allocation9_spill] sm:$0xff] }
 0x238   :  { %4556 = vst [vmem:[#allocation17_spill] sm:$0xff] %v4229_v49  ;;  %v4244_v35 = vadd.f32 %v4025_v58, %v1701_v32  ;;  %v4247_v45 = vadd.f32 %v4025_v58, %v1702_v31  ;;  %v4251_v49 = vadd.f32 %v4025_v58, %v4560_v29  ;;  %v4255_v24 = vadd.f32 %v4025_v58, %v4562_v22  ;;  %v4567_v32 = vld [vmem:[#allocation6_spill] sm:$0xff] }
 0x239   :  { %4557 = vst [vmem:[#allocation18_spill] sm:$0xff] %v4235_v5  ;;  %4558 = vst [vmem:[#allocation19_spill] sm:$0xff] %v4241_v0  ;;  %v4564_v5 = vld [vmem:[#allocation7_spill] sm:$0xff]  ;;  %v4263_v0 = vadd.f32 %v4025_v58, %v4565_v38  ;;  %v4267_v31 = vadd.f32 %v4025_v58, %v4567_v32  ;;  %v4283_v38 = vadd.f32 %v4025_v58, %v4021_v7  ;;  %v1792_v7 = vmax.f32 %v4077_v42, 0.0 }
 0x23a   :  { %4559 = vst [vmem:[#allocation22_spill] sm:$0xff] %v4247_v45  ;;  %4561 = vst [vmem:[#allocation20_spill] sm:$0xff] %v4251_v49  ;;  %v4259_v47 = vadd.f32 %v4025_v58, %v4564_v5  ;;  %v4569_v45 = vld [vmem:[#allocation8_spill] sm:$0xff]  ;;  %v4571_v49 = vld [vmem:[#allocation11_spill] sm:$0xff]  ;;  %v1793_v32 = vmax.f32 %v4081_v4, 0.0  ;;  %v1802_v42 = vmax.f32 %v4117_v43, 0.0 }
 0x23b   :  { %4563 = vst [vmem:[#allocation21_spill] sm:$0xff] %v4255_v24  ;;  %4566 = vst [vmem:[#allocation24_spill] sm:$0xff] %v4263_v0  ;;  %v4271_v29 = vadd.f32 %v4025_v58, %v4569_v45  ;;  %v4275_v22 = vadd.f32 %v4025_v58, %v4571_v49  ;;  %v4573_v24 = vld [vmem:[#allocation13_spill] sm:$0xff]  ;;  %v1787_v49 = vmax.f32 %v4057_v21, 0.0  ;;  %v1795_v45 = vmax.f32 %v4089_v63, 0.0 }
 0x23c   :  { %4568 = vst [vmem:[#allocation25_spill] sm:$0xff] %v4267_v31  ;;  %v4279_v5 = vadd.f32 %v4025_v58, %v4573_v24  ;;  %4575 = vst [vmem:[#allocation2_spill] sm:$0xff] %v4283_v38  ;;  %v1789_v24 = vmax.f32 %v4065_v18, 0.0  ;;  %v1791_v58 = vmax.f32 %v4073_v52, 0.0  ;;  %v1794_v31 = vmax.f32 %v4085_v16, 0.0 }
 0x23d   :  { %4570 = vst [vmem:[#allocation23_spill] sm:$0xff] %v4271_v29  ;;  %4572 = vst [vmem:[#allocation3_spill] sm:$0xff] %v4275_v22  ;;  %v1788_v22 = vmax.f32 %v4061_v53, 0.0  ;;  %v1796_v29 = vmax.f32 %v4093_v11, 0.0  ;;  %v1797_v21 = vmax.f32 %v4097_v39, 0.0  ;;  %v1798_v53 = vmax.f32 %v4101_v55, 0.0 }
 0x23e   :  { %4574 = vst [vmem:[#allocation5_spill] sm:$0xff] %v4279_v5  ;;  %v1790_v5 = vmax.f32 %v4069_v13, 0.0  ;;  %v1799_v18 = vmax.f32 %v4105_v61, 0.0  ;;  %v1800_v13 = vmax.f32 %v4109_v44, 0.0  ;;  %v1801_v52 = vmax.f32 %v4113_v20, 0.0 }
 0x23f   :  { %v1803_v4 = vmax.f32 %v4121_v15, 0.0  ;;  %v1804_v16 = vmax.f32 %v4125_v28, 0.0  ;;  %v1805_v63 = vmax.f32 %v4129_v3, 0.0  ;;  %v1806_v11 = vmax.f32 %v4133_v33, 0.0  ;;  %v4576_v0 = vld [vmem:[#allocation17_spill] sm:$0xff] }
 0x240   :  { %v1807_v39 = vmax.f32 %v4137_v9, 0.0  ;;  %v1808_v55 = vmax.f32 %v4141_v1, 0.0  ;;  %v1809_v61 = vmax.f32 %v4145_v60, 0.0  ;;  %v1810_v44 = vmax.f32 %v4149_v27, 0.0  ;;  %v4577_v34 = vld [vmem:[#allocation18_spill] sm:$0xff]  ;;  %v4578_v8 = vld [vmem:[#allocation19_spill] sm:$0xff] }
 0x241   :  { %v1811_v20 = vmax.f32 %v4153_v37, 0.0  ;;  %v1812_v43 = vmax.f32 %v4157_v54, 0.0  ;;  %v1813_v15 = vmax.f32 %v4161_v30, 0.0  ;;  %v1814_v28 = vmax.f32 %v4165_v17, 0.0  ;;  %v4579_v2 = vld [vmem:[#allocation22_spill] sm:$0xff]  ;;  %v4580_v62 = vld [vmem:[#allocation20_spill] sm:$0xff] }
 0x242   :  { %v1815_v3 = vmax.f32 %v4169_v10, 0.0  ;;  %v1816_v33 = vmax.f32 %v4173_v57, 0.0  ;;  %v1817_v9 = vmax.f32 %v4177_v48, 0.0  ;;  %v1818_v1 = vmax.f32 %v4181_v26, 0.0  ;;  %v4581_v50 = vld [vmem:[#allocation21_spill] sm:$0xff]  ;;  %v4582_v38 = vld [vmem:[#allocation24_spill] sm:$0xff] }
 0x243   :  { %v1819_v60 = vmax.f32 %v4185_v40, 0.0  ;;  %v1820_v27 = vmax.f32 %v4189_v46, 0.0  ;;  %v1821_v37 = vmax.f32 %v4193_v6, 0.0  ;;  %v1822_v54 = vmax.f32 %v4197_v56, 0.0 }
 0x244   :  { %v1823_v30 = vmax.f32 %v4201_v59, 0.0  ;;  %v1824_v17 = vmax.f32 %v4205_v14, 0.0  ;;  %v1825_v10 = vmax.f32 %v4209_v36, 0.0  ;;  %v1826_v57 = vmax.f32 %v4213_v41, 0.0 }
 0x245   :  { %v1827_v48 = vmax.f32 %v4217_v23, 0.0  ;;  %v1828_v26 = vmax.f32 %v4221_v25, 0.0  ;;  %v1829_v40 = vmax.f32 %v4225_v51, 0.0  ;;  %v1830_v46 = vmax.f32 %v4576_v0, 0.0 }
 0x246   :  { %v1831_v6 = vmax.f32 %v4232_v12, 0.0  ;;  %v1832_v56 = vmax.f32 %v4577_v34, 0.0  ;;  %v1833_v59 = vmax.f32 %v4238_v19, 0.0  ;;  %v1834_v14 = vmax.f32 %v4578_v8, 0.0  ;;  %v4583_v12 = vld [vmem:[#allocation25_spill] sm:$0xff]  ;;  %v4584_v19 = vld [vmem:[#allocation23_spill] sm:$0xff] }
 0x247   :  { %v1835_v36 = vmax.f32 %v4244_v35, 0.0  ;;  %v1836_v41 = vmax.f32 %v4579_v2, 0.0  ;;  %v1837_v23 = vmax.f32 %v4580_v62, 0.0  ;;  %v1838_v25 = vmax.f32 %v4581_v50, 0.0  ;;  %v4585_v35 = vld [vmem:[#allocation3_spill] sm:$0xff]  ;;  %v4586_v62 = vld [vmem:[#allocation5_spill] sm:$0xff] }
 0x248   :  { %v1839_v51 = vmax.f32 %v4259_v47, 0.0  ;;  %v1840_v0 = vmax.f32 %v4582_v38, 0.0  ;;  %v1841_v34 = vmax.f32 %v4583_v12, 0.0  ;;  %v1842_v8 = vmax.f32 %v4584_v19, 0.0  ;;  %v4587_v47 = vld [vmem:[#allocation2_spill] sm:$0xff] }
 0x249   :  { %v1843_v2 = vmax.f32 %v4585_v35, 0.0  ;;  %v1844_v50 = vmax.f32 %v4586_v62, 0.0  ;;  %v1845_v38 = vmax.f32 %v4587_v47, 0.0  ;;  %v4588_v12 = vld [vmem:[#allocation10_spill] sm:$0xff]  ;;  %v4590_v35 = vld [vmem:[#allocation12_spill] sm:$0xff] }
 0x24a   :  { %v4589_v19 = vmax.f32 %v4588_v12, 0.0  ;;  %v4591_v62 = vmax.f32 %v4590_v35, 0.0  ;;  %v4592_v12 = vld [vmem:[#allocation14_spill] sm:$0xff] }
 0x24b   :  { %v4593_v35 = vmax.f32 %v4592_v12, 0.0 }
 0x24c   :  { %v2421_v47 = vpack.c.bf16 %v4591_v62, %v4589_v19  ;;  %v4594_v19 = vld [vmem:[#allocation15_spill] sm:$0xff] }
 0x24d   :  { %v4595_v62 = vmax.f32 %v4594_v19, 0.0  ;;  %v4596_v19 = vld [vmem:[#allocation16_spill] sm:$0xff] }
 0x24e   :  { %2422 = vst [vmem:[%s4459_s4] sm:$0xff] %v2421_v47  }
 0x24f   :  { %v2426_v12 = vpack.c.bf16 %v4595_v62, %v4593_v35  ;;  %v4597_v35 = vmax.f32 %v4596_v19, 0.0  ;;  %v2436_v19 = vpack.c.bf16 %v1789_v24, %v1788_v22  ;;  %v2451_v22 = vpack.c.bf16 %v1795_v45, %v1794_v31 }
 0x250   :  { %v2456_v24 = vpack.c.bf16 %v1797_v21, %v1796_v29  ;;  %v2471_v31 = vpack.c.bf16 %v1803_v4, %v1802_v42  ;;  %v2476_v29 = vpack.c.bf16 %v1805_v63, %v1804_v16  ;;  %v2481_v45 = vpack.c.bf16 %v1807_v39, %v1806_v11 }
 0x251   :  { %v2431_v62 = vpack.c.bf16 %v1787_v49, %v4597_v35  ;;  %v2441_v35 = vpack.c.bf16 %v1791_v58, %v1790_v5  ;;  %v2446_v49 = vpack.c.bf16 %v1793_v32, %v1792_v7  ;;  %2578 = vst [vmem:[%s4459_s4 + $0x8] sm:$0xff] %v2426_v12   ;;  %2580 = vst [vmem:[%s4459_s4 + $0x18] sm:$0xff] %v2436_v19  }
 0x252   :  { %v2461_v5 = vpack.c.bf16 %v1799_v18, %v1798_v53  ;;  %v2466_v32 = vpack.c.bf16 %v1801_v52, %v1800_v13  ;;  %2583 = vst [vmem:[%s4459_s4 + $0x30] sm:$0xff] %v2451_v22   ;;  %2584 = vst [vmem:[%s4459_s4 + $0x38] sm:$0xff] %v2456_v24   ;;  %v2486_v58 = vpack.c.bf16 %v1809_v61, %v1808_v55 }
 0x253   :  { %2579 = vst [vmem:[%s4459_s4 + $0x10] sm:$0xff] %v2431_v62   ;;  %2581 = vst [vmem:[%s4459_s4 + $0x20] sm:$0xff] %v2441_v35   ;;  %v2491_v7 = vpack.c.bf16 %v1811_v20, %v1810_v44  ;;  %v2496_v21 = vpack.c.bf16 %v1813_v15, %v1812_v43  ;;  %v2501_v53 = vpack.c.bf16 %v1815_v3, %v1814_v28 }
 0x254   :  { %2582 = vst [vmem:[%s4459_s4 + $0x28] sm:$0xff] %v2446_v49   ;;  %2585 = vst [vmem:[%s4459_s4 + $0x40] sm:$0xff] %v2461_v5   ;;  %v2506_v18 = vpack.c.bf16 %v1817_v9, %v1816_v33  ;;  %v2511_v13 = vpack.c.bf16 %v1819_v60, %v1818_v1  ;;  %v2516_v52 = vpack.c.bf16 %v1821_v37, %v1820_v27 }
 0x255   :  { %2586 = vst [vmem:[%s4459_s4 + $0x48] sm:$0xff] %v2466_v32   ;;  %2587 = vst [vmem:[%s4459_s4 + $0x50] sm:$0xff] %v2471_v31   ;;  %v2521_v42 = vpack.c.bf16 %v1823_v30, %v1822_v54  ;;  %v2526_v4 = vpack.c.bf16 %v1825_v10, %v1824_v17  ;;  %v2531_v16 = vpack.c.bf16 %v1827_v48, %v1826_v57 }
 0x256   :  { %2588 = vst [vmem:[%s4459_s4 + $0x58] sm:$0xff] %v2476_v29   ;;  %2589 = vst [vmem:[%s4459_s4 + $0x60] sm:$0xff] %v2481_v45   ;;  %v2536_v63 = vpack.c.bf16 %v1829_v40, %v1828_v26  ;;  %v2541_v11 = vpack.c.bf16 %v1831_v6, %v1830_v46  ;;  %v2546_v39 = vpack.c.bf16 %v1833_v59, %v1832_v56 }
 0x257   :  { %2590 = vst [vmem:[%s4459_s4 + $0x68] sm:$0xff] %v2486_v58   ;;  %2591 = vst [vmem:[%s4459_s4 + $0x70] sm:$0xff] %v2491_v7   ;;  %v2551_v55 = vpack.c.bf16 %v1835_v36, %v1834_v14  ;;  %v2556_v61 = vpack.c.bf16 %v1837_v23, %v1836_v41  ;;  %v2561_v44 = vpack.c.bf16 %v1839_v51, %v1838_v25 }
 0x258   :  { %2592 = vst [vmem:[%s4459_s4 + $0x78] sm:$0xff] %v2496_v21   ;;  %2593 = vst [vmem:[%s4459_s4 + $0x80] sm:$0xff] %v2501_v53   ;;  %v2566_v20 = vpack.c.bf16 %v1841_v34, %v1840_v0  ;;  %v2571_v43 = vpack.c.bf16 %v1843_v2, %v1842_v8  ;;  %v2576_v15 = vpack.c.bf16 %v1845_v38, %v1844_v50 }
 0x259   :  { %2594 = vst [vmem:[%s4459_s4 + $0x88] sm:$0xff] %v2506_v18   ;;  %2595 = vst [vmem:[%s4459_s4 + $0x90] sm:$0xff] %v2511_v13  }
 0x25a   :  { %2596 = vst [vmem:[%s4459_s4 + $0x98] sm:$0xff] %v2516_v52   ;;  %2597 = vst [vmem:[%s4459_s4 + $0xa0] sm:$0xff] %v2521_v42  }
 0x25b   :  { %2598 = vst [vmem:[%s4459_s4 + $0xa8] sm:$0xff] %v2526_v4   ;;  %2599 = vst [vmem:[%s4459_s4 + $0xb0] sm:$0xff] %v2531_v16  }
 0x25c   :  { %2600 = vst [vmem:[%s4459_s4 + $0xb8] sm:$0xff] %v2536_v63   ;;  %2601 = vst [vmem:[%s4459_s4 + $0xc0] sm:$0xff] %v2541_v11  }
 0x25d   :  { %2602 = vst [vmem:[%s4459_s4 + $0xc8] sm:$0xff] %v2546_v39   ;;  %2603 = vst [vmem:[%s4459_s4 + $0xd0] sm:$0xff] %v2551_v55  }
 0x25e   :  { %2604 = vst [vmem:[%s4459_s4 + $0xd8] sm:$0xff] %v2556_v61   ;;  %2605 = vst [vmem:[%s4459_s4 + $0xe0] sm:$0xff] %v2561_v44  }
 0x25f   :  { %2606 = vst [vmem:[%s4459_s4 + $0xe8] sm:$0xff] %v2566_v20   ;;  %2607 = vst [vmem:[%s4459_s4 + $0xf0] sm:$0xff] %v2571_v43  }
 0x260   :  { %2608 = vst [vmem:[%s4459_s4 + $0xf8] sm:$0xff] %v2576_v15  }

// kernel: resnet_block_forward.3
= control target key start
LH: loop header
LB: loop body
LE: loop exit
PB: predicated region body
PF: predicated region fallthrough
CT: control target
= control target key end

     0   :  { %v2448_v1 = vmov 0   ;;  %s4108_s0 = inlined_call_operand.vmem [shape: bf16[512,384], index: 0, kind: input, shape index: {}]   ;;  %s4109_s1 = inlined_call_operand.vmem [shape: bf16[384,128], index: 1, kind: input, shape index: {}]   ;;  %s4110_s2 = inlined_call_operand.vmem [shape: f32[1,128], index: 2, kind: input, shape index: {}]   ;;  %s4111_s3 = inlined_call_operand.vmem [shape: f32[1,128], index: 3, kind: input, shape index: {}]   ;;  %s4112_s4 = inlined_call_operand.vmem [shape: f32[512,128], index: 4, kind: input, shape index: {}]   ;;  %s4113_s5 = inlined_call_operand.hbm [shape: f32[512,128], index: 5, kind: output, shape index: {}]  }
   0x1   :  { %v2270_v0 = vld [vmem:[%s4109_s1] sm:$0xff]   ;;  %854 = vmatprep.subr.bf16.mxu0 %v2448_v1  ;;  %2234 = vmatprep.subr.bf16.mxu1 %v2448_v1  ;;  %v2271_v2 = vld [vmem:[%s4109_s1 + $0x8] sm:$0xff]   ;;  %v2272_v3 = vld [vmem:[%s4109_s1 + $0x10] sm:$0xff]  }
   0x2   :  { %855 = vmatpush1.bf16.msra.mxu0 %v2270_v0  ;;  %2250 = vmatpush1.bf16.msra.mxu1 %v2270_v0  ;;  %v2273_v4 = vld [vmem:[%s4109_s1 + $0x18] sm:$0xff]   ;;  %v2274_v5 = vld [vmem:[%s4109_s1 + $0x20] sm:$0xff]   ;;  %v2275_v7 = vld [vmem:[%s4109_s1 + $0x28] sm:$0xff]  }
   0x3   :  { %856 = vmatprep.subr.bf16.mxu0 %v2448_v1  ;;  %2235 = vmatprep.subr.bf16.mxu1 %v2448_v1  ;;  %v2288_v6 = vld [vmem:[%s4108_s0 + $0x4] ss:$12 sps:$4 sm:$0xff]   ;;  %v2277_v10 = vld [vmem:[%s4109_s1 + $0x38] sm:$0xff]   ;;  %v2279_v12 = vld [vmem:[%s4109_s1 + $0x48] sm:$0xff]  }
   0x4   :  { %v2291_v8 = vld [vmem:[%s4108_s0 + $0x244] ss:$12 sps:$4 sm:$0xff]   ;;  %886 = vmatprep.mubr.bf16.mxu0 %v2288_v6  ;;  %v2281_v14 = vld [vmem:[%s4109_s1 + $0x58] sm:$0xff]   ;;  %v2283_v16 = vld [vmem:[%s4109_s1 + $0x68] sm:$0xff]  }
   0x5   :  { %1078 = vmatprep.mubr.bf16.mxu1 %v2291_v8  ;;  %v2276_v9 = vld [vmem:[%s4109_s1 + $0x30] sm:$0xff]   ;;  %v2278_v11 = vld [vmem:[%s4109_s1 + $0x40] sm:$0xff]   ;;  %v2285_v18 = vld [vmem:[%s4109_s1 + $0x78] sm:$0xff]  }
   0x6   :  { %857 = vmatpush1.bf16.msra.mxu0 %v2271_v2  ;;  %2251 = vmatpush1.bf16.msra.mxu1 %v2271_v2  ;;  %v2280_v13 = vld [vmem:[%s4109_s1 + $0x50] sm:$0xff]   ;;  %v2282_v15 = vld [vmem:[%s4109_s1 + $0x60] sm:$0xff]   ;;  %v2292_v22 = vld [vmem:[%s4108_s0 + $0x1c] ss:$12 sps:$4 sm:$0xff]  }
   0x7   :  { %858 = vmatprep.subr.bf16.mxu0 %v2448_v1  ;;  %2236 = vmatprep.subr.bf16.mxu1 %v2448_v1  ;;  %v2284_v17 = vld [vmem:[%s4109_s1 + $0x70] sm:$0xff]   ;;  %v2310_v19 = vld [vmem:[%s4109_s1 + $0x80] sm:$0xff]   ;;  %v2294_v23 = vld [vmem:[%s4108_s0 + $0x25c] ss:$12 sps:$4 sm:$0xff]  }
   0x8   :  { %v2286_v20 = vld [vmem:[%s4108_s0] ss:$12 sps:$4 sm:$0xff]   ;;  %v2296_v25 = vld [vmem:[%s4108_s0 + $0x18] ss:$12 sps:$4 sm:$0xff]   ;;  %v2324_v26 = vld [vmem:[%s4109_s1 + $0x90] sm:$0xff]  }
   0x9   :  { %v2289_v21 = vld [vmem:[%s4108_s0 + $0x240] ss:$12 sps:$4 sm:$0xff]   ;;  %v2297_v27 = vld [vmem:[%s4108_s0 + $0x258] ss:$12 sps:$4 sm:$0xff]   ;;  %v2302_v31 = vld [vmem:[%s4108_s0 + $0x30] ss:$12 sps:$4 sm:$0xff]  }
   0xa   :  { %859 = vmatpush1.bf16.msra.mxu0 %v2272_v3  ;;  %2252 = vmatpush1.bf16.msra.mxu1 %v2272_v3  ;;  %v2317_v24 = vld [vmem:[%s4109_s1 + $0x88] sm:$0xff]   ;;  %v2298_v28 = vld [vmem:[%s4108_s0 + $0x34] ss:$12 sps:$4 sm:$0xff]   ;;  %v2325_v30 = vld [vmem:[%s4109_s1 + $0x98] sm:$0xff]  }
   0xb   :  { %860 = vmatprep.subr.bf16.mxu0 %v2448_v1  ;;  %2237 = vmatprep.subr.bf16.mxu1 %v2448_v1  ;;  %v2300_v29 = vld [vmem:[%s4108_s0 + $0x274] ss:$12 sps:$4 sm:$0xff]   ;;  %v2303_v33 = vld [vmem:[%s4108_s0 + $0x270] ss:$12 sps:$4 sm:$0xff]   ;;  %v2304_v34 = vld [vmem:[%s4108_s0 + $0x4c] ss:$12 sps:$4 sm:$0xff]  }
   0xc   :  { %v2332_v32 = vld [vmem:[%s4109_s1 + $0xa0] sm:$0xff]   ;;  %v2306_v35 = vld [vmem:[%s4108_s0 + $0x28c] ss:$12 sps:$4 sm:$0xff]   ;;  %v2308_v37 = vld [vmem:[%s4108_s0 + $0x48] ss:$12 sps:$4 sm:$0xff]  }
   0xd   :  { %v2333_v36 = vld [vmem:[%s4109_s1 + $0xa8] sm:$0xff]   ;;  %v2311_v39 = vld [vmem:[%s4108_s0 + $0x64] ss:$12 sps:$4 sm:$0xff]   ;;  %v2341_v42 = vld [vmem:[%s4109_s1 + $0xb8] sm:$0xff]  }
   0xe   :  { %861 = vmatpush1.bf16.msra.mxu0 %v2273_v4  ;;  %2253 = vmatpush1.bf16.msra.mxu1 %v2273_v4  ;;  %v2309_v38 = vld [vmem:[%s4108_s0 + $0x288] ss:$12 sps:$4 sm:$0xff]   ;;  %v2313_v40 = vld [vmem:[%s4108_s0 + $0x2a4] ss:$12 sps:$4 sm:$0xff]   ;;  %v2315_v43 = vld [vmem:[%s4108_s0 + $0x60] ss:$12 sps:$4 sm:$0xff]  }
   0xf   :  { %862 = vmatprep.subr.bf16.mxu0 %v2448_v1  ;;  %2238 = vmatprep.subr.bf16.mxu1 %v2448_v1  ;;  %v2340_v41 = vld [vmem:[%s4109_s1 + $0xb0] sm:$0xff]   ;;  %v2316_v44 = vld [vmem:[%s4108_s0 + $0x2a0] ss:$12 sps:$4 sm:$0xff]   ;;  %v2318_v45 = vld [vmem:[%s4108_s0 + $0x7c] ss:$12 sps:$4 sm:$0xff]  }
  0x10   :  { %v2320_v46 = vld [vmem:[%s4108_s0 + $0x2bc] ss:$12 sps:$4 sm:$0xff]  }
  0x12   :  { %863 = vmatpush1.bf16.msra.mxu0 %v2274_v5  ;;  %2254 = vmatpush1.bf16.msra.mxu1 %v2274_v5 }
  0x13   :  { %864 = vmatprep.subr.bf16.mxu0 %v2448_v1  ;;  %2239 = vmatprep.subr.bf16.mxu1 %v2448_v1 }
  0x16   :  { %865 = vmatpush1.bf16.msra.mxu0 %v2275_v7  ;;  %2255 = vmatpush1.bf16.msra.mxu1 %v2275_v7 }
  0x17   :  { %866 = vmatprep.subr.bf16.mxu0 %v2448_v1  ;;  %2240 = vmatprep.subr.bf16.mxu1 %v2448_v1 }
  0x1a   :  { %867 = vmatpush1.bf16.msra.mxu0 %v2276_v9  ;;  %2256 = vmatpush1.bf16.msra.mxu1 %v2276_v9 }
  0x1b   :  { %868 = vmatprep.subr.bf16.mxu0 %v2448_v1  ;;  %2241 = vmatprep.subr.bf16.mxu1 %v2448_v1 }
  0x1e   :  { %869 = vmatpush1.bf16.msra.mxu0 %v2277_v10  ;;  %2257 = vmatpush1.bf16.msra.mxu1 %v2277_v10 }
  0x1f   :  { %870 = vmatprep.subr.bf16.mxu0 %v2448_v1  ;;  %2242 = vmatprep.subr.bf16.mxu1 %v2448_v1 }
  0x22   :  { %871 = vmatpush1.bf16.msra.mxu0 %v2278_v11  ;;  %2258 = vmatpush1.bf16.msra.mxu1 %v2278_v11 }
  0x23   :  { %872 = vmatprep.subr.bf16.mxu0 %v2448_v1  ;;  %2243 = vmatprep.subr.bf16.mxu1 %v2448_v1 }
  0x26   :  { %873 = vmatpush1.bf16.msra.mxu0 %v2279_v12  ;;  %2259 = vmatpush1.bf16.msra.mxu1 %v2279_v12 }
  0x27   :  { %874 = vmatprep.subr.bf16.mxu0 %v2448_v1  ;;  %2244 = vmatprep.subr.bf16.mxu1 %v2448_v1 }
  0x2a   :  { %875 = vmatpush1.bf16.msra.mxu0 %v2280_v13  ;;  %2260 = vmatpush1.bf16.msra.mxu1 %v2280_v13 }
  0x2b   :  { %876 = vmatprep.subr.bf16.mxu0 %v2448_v1  ;;  %2245 = vmatprep.subr.bf16.mxu1 %v2448_v1 }
  0x2e   :  { %877 = vmatpush1.bf16.msra.mxu0 %v2281_v14  ;;  %2261 = vmatpush1.bf16.msra.mxu1 %v2281_v14 }
  0x2f   :  { %878 = vmatprep.subr.bf16.mxu0 %v2448_v1  ;;  %2246 = vmatprep.subr.bf16.mxu1 %v2448_v1 }
  0x32   :  { %879 = vmatpush1.bf16.msra.mxu0 %v2282_v15  ;;  %2262 = vmatpush1.bf16.msra.mxu1 %v2282_v15 }
  0x33   :  { %880 = vmatprep.subr.bf16.mxu0 %v2448_v1  ;;  %2247 = vmatprep.subr.bf16.mxu1 %v2448_v1 }
  0x36   :  { %881 = vmatpush1.bf16.msra.mxu0 %v2283_v16  ;;  %2263 = vmatpush1.bf16.msra.mxu1 %v2283_v16 }
  0x37   :  { %882 = vmatprep.subr.bf16.mxu0 %v2448_v1  ;;  %2248 = vmatprep.subr.bf16.mxu1 %v2448_v1 }
  0x3a   :  { %883 = vmatpush1.bf16.msra.mxu0 %v2284_v17  ;;  %2264 = vmatpush1.bf16.msra.mxu1 %v2284_v17 }
  0x3b   :  { %884 = vmatprep.subr.bf16.mxu0 %v2448_v1  ;;  %2249 = vmatprep.subr.bf16.mxu1 %v2448_v1 }
  0x3e   :  { %885 = vmatpush1.bf16.msra.mxu0 %v2285_v18  ;;  %2265 = vmatpush1.bf16.msra.mxu1 %v2285_v18 }
  0x3f   :  { %2154 = vmatprep.subr.bf16.mxu1 %v2310_v19 }
  0x41   :  { %887 = vmatmul.mubr.bf16.vlgmr.msra.gmra.mrb[0].mxu0 %v2286_v20  ;;  %1079 = vmatmul.mubr.bf16.vlgmr.msra.gmra.mrb[0].mxu1 %v2289_v21 }
  0x42   :  { %894 = vmatprep.mubr.bf16.mxu0 %v2292_v22  ;;  %1086 = vmatprep.mubr.bf16.mxu1 %v2294_v23 }
  0x43   :  { %2155 = vmatpush3.bf16.msra.mxu1 %v2310_v19 }
  0x44   :  { %2156 = vmatprep.subr.bf16.mxu1 %v2317_v24 }
  0x47   :  { %2157 = vmatpush3.bf16.msra.mxu1 %v2317_v24 }
  0x48   :  { %2158 = vmatprep.subr.bf16.mxu1 %v2324_v26 }
  0x49   :  { %895 = vmatmul.mubr.bf16.gmra.mrb[4].mxu0 %v2296_v25  ;;  %1087 = vmatmul.mubr.bf16.gmra.mrb[4].mxu1 %v2297_v27 }
  0x4a   :  { %902 = vmatprep.mubr.bf16.mxu0 %v2298_v28  ;;  %1094 = vmatprep.mubr.bf16.mxu1 %v2300_v29 }
  0x4b   :  { %2159 = vmatpush3.bf16.msra.mxu1 %v2324_v26 }
  0x4c   :  { %2160 = vmatprep.subr.bf16.mxu1 %v2325_v30 }
  0x4f   :  { %2161 = vmatpush3.bf16.msra.mxu1 %v2325_v30 }
  0x50   :  { %2162 = vmatprep.subr.bf16.mxu1 %v2332_v32 }
  0x51   :  { %903 = vmatmul.mubr.bf16.gmra.mrb[8].mxu0 %v2302_v31  ;;  %1095 = vmatmul.mubr.bf16.gmra.mrb[8].mxu1 %v2303_v33 }
  0x52   :  { %910 = vmatprep.mubr.bf16.mxu0 %v2304_v34  ;;  %1102 = vmatprep.mubr.bf16.mxu1 %v2306_v35 }
  0x53   :  { %2163 = vmatpush3.bf16.msra.mxu1 %v2332_v32 }
  0x54   :  { %2164 = vmatprep.subr.bf16.mxu1 %v2333_v36 }
  0x57   :  { %2165 = vmatpush3.bf16.msra.mxu1 %v2333_v36 }
  0x58   :  { %2166 = vmatprep.subr.bf16.mxu1 %v2340_v41 }
  0x59   :  { %911 = vmatmul.mubr.bf16.gmra.mrb[12].mxu0 %v2308_v37  ;;  %1103 = vmatmul.mubr.bf16.gmra.mrb[12].mxu1 %v2309_v38 }
  0x5a   :  { %918 = vmatprep.mubr.bf16.mxu0 %v2311_v39  ;;  %1110 = vmatprep.mubr.bf16.mxu1 %v2313_v40 }
  0x5b   :  { %2167 = vmatpush3.bf16.msra.mxu1 %v2340_v41 }
  0x5c   :  { %2168 = vmatprep.subr.bf16.mxu1 %v2341_v42 }
  0x5d   :  { %10 = vsyncpa [#allocation3], 0  ;;  %v2322_v47 = vld [vmem:[%s4108_s0 + $0x78] ss:$12 sps:$4 sm:$0xff]   ;;  %v2326_v49 = vld [vmem:[%s4108_s0 + $0x94] ss:$12 sps:$4 sm:$0xff]  }
  0x5e   :  { %v2323_v48 = vld [vmem:[%s4108_s0 + $0x2b8] ss:$12 sps:$4 sm:$0xff]   ;;  %v2328_v50 = vld [vmem:[%s4108_s0 + $0x2d4] ss:$12 sps:$4 sm:$0xff]   ;;  %v2330_v51 = vld [vmem:[%s4108_s0 + $0x90] ss:$12 sps:$4 sm:$0xff]  }
  0x5f   :  { %2169 = vmatpush3.bf16.msra.mxu1 %v2341_v42  ;;  %v2331_v52 = vld [vmem:[%s4108_s0 + $0x2d0] ss:$12 sps:$4 sm:$0xff]   ;;  %v2334_v53 = vld [vmem:[%s4108_s0 + $0xac] ss:$12 sps:$4 sm:$0xff]   ;;  %v2338_v55 = vld [vmem:[%s4108_s0 + $0xa8] ss:$12 sps:$4 sm:$0xff]  }
  0x60   :  { %v2336_v54 = vld [vmem:[%s4108_s0 + $0x2ec] ss:$12 sps:$4 sm:$0xff]   ;;  %v2339_v56 = vld [vmem:[%s4108_s0 + $0x2e8] ss:$12 sps:$4 sm:$0xff]   ;;  %v2342_v57 = vld [vmem:[%s4108_s0 + $0xc4] ss:$12 sps:$4 sm:$0xff]  }
  0x61   :  { %919 = vmatmul.mubr.bf16.gmra.mrb[16].mxu0 %v2315_v43  ;;  %1111 = vmatmul.mubr.bf16.gmra.mrb[16].mxu1 %v2316_v44  ;;  %v2344_v58 = vld [vmem:[%s4108_s0 + $0x8] ss:$12 sps:$4 sm:$0xff]   ;;  %v2345_v59 = vld [vmem:[%s4108_s0 + $0xc0] ss:$12 sps:$4 sm:$0xff]   ;;  %v2349_v62 = vld [vmem:[%s4108_s0 + $0x38] ss:$12 sps:$4 sm:$0xff]  }
  0x62   :  { %926 = vmatprep.mubr.bf16.mxu0 %v2318_v45  ;;  %1118 = vmatprep.mubr.bf16.mxu1 %v2320_v46  ;;  %v2346_v60 = vld [vmem:[%s4108_s0 + $0x20] ss:$12 sps:$4 sm:$0xff]   ;;  %v2347_v61 = vld [vmem:[%s4108_s0 + $0xdc] ss:$12 sps:$4 sm:$0xff]   ;;  %v2350_v63 = vld [vmem:[%s4108_s0 + $0xd8] ss:$12 sps:$4 sm:$0xff]  }
  0x63   :  { %v2351_v0 = vld [vmem:[%s4108_s0 + $0x50] ss:$12 sps:$4 sm:$0xff]   ;;  %v2352_v1 = vld [vmem:[%s4108_s0 + $0xf4] ss:$12 sps:$4 sm:$0xff]   ;;  %v2357_v5 = vld [vmem:[%s4108_s0 + $0x10c] ss:$12 sps:$4 sm:$0xff]  }
  0x64   :  { %v2354_v2 = vld [vmem:[%s4108_s0 + $0x68] ss:$12 sps:$4 sm:$0xff]   ;;  %v2355_v3 = vld [vmem:[%s4108_s0 + $0xf0] ss:$12 sps:$4 sm:$0xff]   ;;  %v2356_v4 = vld [vmem:[%s4108_s0 + $0x80] ss:$12 sps:$4 sm:$0xff]  }
  0x65   :  { %v2359_v6 = vld [vmem:[%s4108_s0 + $0x98] ss:$12 sps:$4 sm:$0xff]   ;;  %v2360_v7 = vld [vmem:[%s4108_s0 + $0x108] ss:$12 sps:$4 sm:$0xff]   ;;  %v2361_v8 = vld [vmem:[%s4108_s0 + $0xb0] ss:$12 sps:$4 sm:$0xff]  }
  0x66   :  { %v2362_v9 = vld [vmem:[%s4108_s0 + $0x124] ss:$12 sps:$4 sm:$0xff]   ;;  %v2364_v10 = vld [vmem:[%s4108_s0 + $0xc8] ss:$12 sps:$4 sm:$0xff]   ;;  %v2365_v11 = vld [vmem:[%s4108_s0 + $0x120] ss:$12 sps:$4 sm:$0xff]  }
  0x67   :  { %v2366_v12 = vld [vmem:[%s4108_s0 + $0xe0] ss:$12 sps:$4 sm:$0xff]   ;;  %v2367_v13 = vld [vmem:[%s4108_s0 + $0x13c] ss:$12 sps:$4 sm:$0xff]   ;;  %v2369_v14 = vld [vmem:[%s4108_s0 + $0xf8] ss:$12 sps:$4 sm:$0xff]  }
  0x68   :  { %v2370_v15 = vld [vmem:[%s4108_s0 + $0x138] ss:$12 sps:$4 sm:$0xff]   ;;  %v2371_v16 = vld [vmem:[%s4108_s0 + $0x110] ss:$12 sps:$4 sm:$0xff]   ;;  %v2372_v17 = vld [vmem:[%s4108_s0 + $0x154] ss:$12 sps:$4 sm:$0xff]  }
  0x69   :  { %927 = vmatmul.mubr.bf16.gmra.mrb[20].mxu0 %v2322_v47  ;;  %1119 = vmatmul.mubr.bf16.gmra.mrb[20].mxu1 %v2323_v48  ;;  %v2374_v18 = vld [vmem:[%s4108_s0 + $0x128] ss:$12 sps:$4 sm:$0xff]   ;;  %v2375_v19 = vld [vmem:[%s4108_s0 + $0x150] ss:$12 sps:$4 sm:$0xff]   ;;  %v2376_v20 = vld [vmem:[%s4108_s0 + $0x140] ss:$12 sps:$4 sm:$0xff]  }
  0x6a   :  { %934 = vmatprep.mubr.bf16.mxu0 %v2326_v49  ;;  %1126 = vmatprep.mubr.bf16.mxu1 %v2328_v50  ;;  %v2377_v21 = vld [vmem:[%s4108_s0 + $0x16c] ss:$12 sps:$4 sm:$0xff]   ;;  %v2380_v23 = vld [vmem:[%s4108_s0 + $0x168] ss:$12 sps:$4 sm:$0xff]   ;;  %v2381_v24 = vld [vmem:[%s4108_s0 + $0x170] ss:$12 sps:$4 sm:$0xff]  }
  0x6b   :  { %v2379_v22 = vld [vmem:[%s4108_s0 + $0x158] ss:$12 sps:$4 sm:$0xff]   ;;  %v2384_v26 = vld [vmem:[%s4108_s0 + $0x188] ss:$12 sps:$4 sm:$0xff]   ;;  %v2385_v27 = vld [vmem:[%s4108_s0 + $0x180] ss:$12 sps:$4 sm:$0xff]  }
  0x6c   :  { %v2382_v25 = vld [vmem:[%s4108_s0 + $0x184] ss:$12 sps:$4 sm:$0xff]   ;;  %v2386_v28 = vld [vmem:[%s4108_s0 + $0x1a0] ss:$12 sps:$4 sm:$0xff]   ;;  %v2387_v29 = vld [vmem:[%s4108_s0 + $0x19c] ss:$12 sps:$4 sm:$0xff]  }
  0x6d   :  { %v2389_v30 = vld [vmem:[%s4108_s0 + $0x1b8] ss:$12 sps:$4 sm:$0xff]   ;;  %v2391_v32 = vld [vmem:[%s4108_s0 + $0x1d0] ss:$12 sps:$4 sm:$0xff]   ;;  %v2392_v33 = vld [vmem:[%s4108_s0 + $0x1b4] ss:$12 sps:$4 sm:$0xff]  }
  0x6e   :  { %v2390_v31 = vld [vmem:[%s4108_s0 + $0x198] ss:$12 sps:$4 sm:$0xff]   ;;  %v2394_v34 = vld [vmem:[%s4108_s0 + $0x1e8] ss:$12 sps:$4 sm:$0xff]   ;;  %v2395_v35 = vld [vmem:[%s4108_s0 + $0x1b0] ss:$12 sps:$4 sm:$0xff]  }
  0x6f   :  { %v2396_v36 = vld [vmem:[%s4108_s0 + $0x200] ss:$12 sps:$4 sm:$0xff]   ;;  %v2399_v38 = vld [vmem:[%s4108_s0 + $0x218] ss:$12 sps:$4 sm:$0xff]   ;;  %v2400_v39 = vld [vmem:[%s4108_s0 + $0x1c8] ss:$12 sps:$4 sm:$0xff]  }
  0x70   :  { %v2397_v37 = vld [vmem:[%s4108_s0 + $0x1cc] ss:$12 sps:$4 sm:$0xff]   ;;  %v2401_v40 = vld [vmem:[%s4108_s0 + $0x230] ss:$12 sps:$4 sm:$0xff]   ;;  %v2404_v42 = vld [vmem:[%s4108_s0 + $0x248] ss:$12 sps:$4 sm:$0xff]  }
  0x71   :  { %935 = vmatmul.mubr.bf16.gmra.mrb[24].mxu0 %v2330_v51  ;;  %1127 = vmatmul.mubr.bf16.gmra.mrb[24].mxu1 %v2331_v52  ;;  %v2402_v41 = vld [vmem:[%s4108_s0 + $0x1e4] ss:$12 sps:$4 sm:$0xff]   ;;  %v2405_v43 = vld [vmem:[%s4108_s0 + $0x1e0] ss:$12 sps:$4 sm:$0xff]   ;;  %v2407_v45 = vld [vmem:[%s4108_s0 + $0x1fc] ss:$12 sps:$4 sm:$0xff]  }
  0x72   :  { %942 = vmatprep.mubr.bf16.mxu0 %v2334_v53  ;;  %1134 = vmatprep.mubr.bf16.mxu1 %v2336_v54  ;;  %v2406_v44 = vld [vmem:[%s4108_s0 + $0x260] ss:$12 sps:$4 sm:$0xff]   ;;  %v2409_v46 = vld [vmem:[%s4108_s0 + $0x278] ss:$12 sps:$4 sm:$0xff]   ;;  %v2411_v48 = vld [vmem:[%s4108_s0 + $0x290] ss:$12 sps:$4 sm:$0xff]  }
  0x73   :  { %v2410_v47 = vld [vmem:[%s4108_s0 + $0x1f8] ss:$12 sps:$4 sm:$0xff]   ;;  %v2412_v49 = vld [vmem:[%s4108_s0 + $0x214] ss:$12 sps:$4 sm:$0xff]   ;;  %v2415_v51 = vld [vmem:[%s4108_s0 + $0x210] ss:$12 sps:$4 sm:$0xff]  }
  0x74   :  { %v2414_v50 = vld [vmem:[%s4108_s0 + $0x2a8] ss:$12 sps:$4 sm:$0xff]   ;;  %v2416_v52 = vld [vmem:[%s4108_s0 + $0x2c0] ss:$12 sps:$4 sm:$0xff]   ;;  %v2419_v54 = vld [vmem:[%s4108_s0 + $0x2d8] ss:$12 sps:$4 sm:$0xff]  }
  0x75   :  { %v2417_v53 = vld [vmem:[%s4108_s0 + $0x22c] ss:$12 sps:$4 sm:$0xff]   ;;  %s2449_s10 = smov [#allocation2]  }
  0x76   :  { %s1983_s11 = sshll.u32 %s2449_s10, 4  ;;  %s4087_s11 = int_to_ptr.vmem [resolvable:$true] %s1983_s11 }
  0x77   :  { %p2429_p1 = scmp.lt.s32.totalorder %s4087_s11, %s4087_s11 }
  0x79   :  { %943 = vmatmul.mubr.bf16.gmra.mrb[28].mxu0 %v2338_v55  ;;  %1135 = vmatmul.mubr.bf16.gmra.mrb[28].mxu1 %v2339_v56  ;;  %v2420_v55 = vld [vmem:[%s4108_s0 + $0x228] ss:$12 sps:$4 sm:$0xff]   ;;  %v2421_v56 = vld [vmem:[%s4108_s0 + $0x2f0] ss:$12 sps:$4 sm:$0xff]  }
  0x7a   :  { %950 = vmatprep.mubr.bf16.mxu0 %v2342_v57  ;;  %2170 = vmatprep.mubr.bf16.mxu1 %v2344_v58 }
  0x81   :  { %951 = vmatmul.mubr.bf16.gmra.mrb[32].mxu0 %v2345_v59  ;;  %2171 = vmatmul.mubr.bf16.vlgmr.msra.gmra.mrb[32].mxu1 %v2346_v60 }
  0x82   :  { %958 = vmatprep.mubr.bf16.mxu0 %v2347_v61  ;;  %2174 = vmatprep.mubr.bf16.mxu1 %v2349_v62 }
  0x89   :  { %959 = vmatmul.mubr.bf16.gmra.mrb[36].mxu0 %v2350_v63  ;;  %2175 = vmatmul.mubr.bf16.gmra.mrb[36].mxu1 %v2351_v0 }
  0x8a   :  { %966 = vmatprep.mubr.bf16.mxu0 %v2352_v1  ;;  %2178 = vmatprep.mubr.bf16.mxu1 %v2354_v2 }
  0x91   :  { %967 = vmatmul.mubr.bf16.gmra.mrb[40].mxu0 %v2355_v3  ;;  %2179 = vmatmul.mubr.bf16.gmra.mrb[40].mxu1 %v2356_v4 }
  0x92   :  { %974 = vmatprep.mubr.bf16.mxu0 %v2357_v5  ;;  %2182 = vmatprep.mubr.bf16.mxu1 %v2359_v6 }
  0x99   :  { %975 = vmatmul.mubr.bf16.gmra.mrb[44].mxu0 %v2360_v7  ;;  %2183 = vmatmul.mubr.bf16.gmra.mrb[44].mxu1 %v2361_v8 }
  0x9a   :  { %982 = vmatprep.mubr.bf16.mxu0 %v2362_v9  ;;  %2186 = vmatprep.mubr.bf16.mxu1 %v2364_v10 }
  0xa1   :  { %983 = vmatmul.mubr.bf16.gmra.mrb[48].mxu0 %v2365_v11  ;;  %2187 = vmatmul.mubr.bf16.gmra.mrb[48].mxu1 %v2366_v12 }
  0xa2   :  { %990 = vmatprep.mubr.bf16.mxu0 %v2367_v13  ;;  %2190 = vmatprep.mubr.bf16.mxu1 %v2369_v14 }
  0xa9   :  { %991 = vmatmul.mubr.bf16.gmra.mrb[52].mxu0 %v2370_v15  ;;  %2191 = vmatmul.mubr.bf16.gmra.mrb[52].mxu1 %v2371_v16 }
  0xaa   :  { %998 = vmatprep.mubr.bf16.mxu0 %v2372_v17  ;;  %2194 = vmatprep.mubr.bf16.mxu1 %v2374_v18 }
  0xb1   :  { %999 = vmatmul.mubr.bf16.gmra.mrb[56].mxu0 %v2375_v19  ;;  %2195 = vmatmul.mubr.bf16.gmra.mrb[56].mxu1 %v2376_v20 }
  0xb2   :  { %1006 = vmatprep.mubr.bf16.mxu0 %v2377_v21  ;;  %2198 = vmatprep.mubr.bf16.mxu1 %v2379_v22 }
  0xb9   :  { %1007 = vmatmul.mubr.bf16.gmra.mrb[60].mxu0 %v2380_v23  ;;  %2199 = vmatmul.mubr.bf16.gmra.mrb[60].mxu1 %v2381_v24 }
  0xba   :  { %1014 = vmatprep.mubr.bf16.mxu0 %v2382_v25  ;;  %2202 = vmatprep.mubr.bf16.mxu1 %v2384_v26 }
  0xc1   :  { %1015 = vmatmul.mubr.bf16.gmra.mrb[64].mxu0 %v2385_v27  ;;  %2203 = vmatmul.mubr.bf16.gmra.mrb[64].mxu1 %v2386_v28 }
  0xc2   :  { %1022 = vmatprep.mubr.bf16.mxu0 %v2387_v29  ;;  %2206 = vmatprep.mubr.bf16.mxu1 %v2389_v30 }
  0xc9   :  { %1023 = vmatmul.mubr.bf16.gmra.mrb[68].mxu0 %v2390_v31  ;;  %2207 = vmatmul.mubr.bf16.gmra.mrb[68].mxu1 %v2391_v32 }
  0xca   :  { %1030 = vmatprep.mubr.bf16.mxu0 %v2392_v33  ;;  %2210 = vmatprep.mubr.bf16.mxu1 %v2394_v34 }
  0xd1   :  { %1031 = vmatmul.mubr.bf16.gmra.mrb[72].mxu0 %v2395_v35  ;;  %2211 = vmatmul.mubr.bf16.gmra.mrb[72].mxu1 %v2396_v36 }
  0xd2   :  { %1038 = vmatprep.mubr.bf16.mxu0 %v2397_v37  ;;  %2214 = vmatprep.mubr.bf16.mxu1 %v2399_v38 }
  0xd9   :  { %1039 = vmatmul.mubr.bf16.gmra.mrb[76].mxu0 %v2400_v39  ;;  %2215 = vmatmul.mubr.bf16.gmra.mrb[76].mxu1 %v2401_v40 }
  0xda   :  { %1046 = vmatprep.mubr.bf16.mxu0 %v2402_v41  ;;  %2218 = vmatprep.mubr.bf16.mxu1 %v2404_v42 }
  0xe1   :  { %1047 = vmatmul.mubr.bf16.gmra.mrb[80].mxu0 %v2405_v43  ;;  %2219 = vmatmul.mubr.bf16.gmra.mrb[80].mxu1 %v2406_v44 }
  0xe2   :  { %1054 = vmatprep.mubr.bf16.mxu0 %v2407_v45  ;;  %2222 = vmatprep.mubr.bf16.mxu1 %v2409_v46 }
  0xe9   :  { %1055 = vmatmul.mubr.bf16.gmra.mrb[84].mxu0 %v2410_v47  ;;  %2223 = vmatmul.mubr.bf16.gmra.mrb[84].mxu1 %v2411_v48 }
  0xea   :  { %1062 = vmatprep.mubr.bf16.mxu0 %v2412_v49  ;;  %2226 = vmatprep.mubr.bf16.mxu1 %v2414_v50 }
  0xf1   :  { %1063 = vmatmul.mubr.bf16.gmra.mrb[88].mxu0 %v2415_v51  ;;  %2227 = vmatmul.mubr.bf16.gmra.mrb[88].mxu1 %v2416_v52 }
  0xf2   :  { %1070 = vmatprep.mubr.bf16.mxu0 %v2417_v53  ;;  %2230 = vmatprep.mubr.bf16.mxu1 %v2419_v54 }
  0xf9   :  { %1071 = vmatmul.mubr.bf16.gmra.mrb[92].mxu0 %v2420_v55  ;;  %2231 = vmatmul.mubr.bf16.gmra.mrb[92].mxu1 %v2421_v56 }
 0x114   :  { %v2874_v57 = vpop.f32.mrb[0].mxu0  ;;  %v2876_v58 = vpop.f32.mrb[0].mxu1 }
 0x115   :  { %v890_v59 = vpop.f32.mrb[1].mxu0  ;;  %v1082_v60 = vpop.f32.mrb[1].mxu1 }
 0x116   :  { %v2878_v61 = vpop.f32.mrb[2].mxu0  ;;  %v2880_v62 = vpop.f32.mrb[2].mxu1 }
 0x117   :  { %v893_v63 = vpop.f32.mrb[3].mxu0  ;;  %v1085_v0 = vpop.f32.mrb[3].mxu1 }
 0x11c   :  { %v896_v1 = vpop.f32.mrb[4].mxu0  ;;  %v2882_v2 = vpop.f32.mrb[4].mxu1 }
 0x11d   :  { %v898_v3 = vpop.f32.mrb[5].mxu0  ;;  %v1090_v4 = vpop.f32.mrb[5].mxu1 }
 0x11e   :  { %v899_v5 = vpop.f32.mrb[6].mxu0  ;;  %v2884_v6 = vpop.f32.mrb[6].mxu1 }
 0x11f   :  { %v901_v7 = vpop.f32.mrb[7].mxu0  ;;  %v1093_v8 = vpop.f32.mrb[7].mxu1 }
 0x124   :  { %v2886_v9 = vpop.f32.mrb[8].mxu0  ;;  %v2888_v10 = vpop.f32.mrb[8].mxu1 }
 0x125   :  { %v906_v11 = vpop.f32.mrb[9].mxu0  ;;  %v1098_v12 = vpop.f32.mrb[9].mxu1 }
 0x126   :  { %v2890_v13 = vpop.f32.mrb[10].mxu0  ;;  %v2892_v14 = vpop.f32.mrb[10].mxu1 }
 0x127   :  { %v909_v15 = vpop.f32.mrb[11].mxu0  ;;  %v1101_v16 = vpop.f32.mrb[11].mxu1 }
 0x12c   :  { %v912_v17 = vpop.f32.mrb[12].mxu0  ;;  %v2894_v18 = vpop.f32.mrb[12].mxu1 }
 0x12d   :  { %v914_v19 = vpop.f32.mrb[13].mxu0  ;;  %v1106_v20 = vpop.f32.mrb[13].mxu1 }
 0x12e   :  { %v2896_v21 = vpop.f32.mrb[14].mxu0  ;;  %v2898_v22 = vpop.f32.mrb[14].mxu1 }
 0x12f   :  { %v917_v23 = vpop.f32.mrb[15].mxu0  ;;  %v1109_v24 = vpop.f32.mrb[15].mxu1 }
 0x134   :  { %v2900_v25 = vpop.f32.mrb[16].mxu0  ;;  %v2902_v26 = vpop.f32.mrb[16].mxu1 }
 0x135   :  { %v922_v27 = vpop.f32.mrb[17].mxu0  ;;  %v1114_v28 = vpop.f32.mrb[17].mxu1 }
 0x136   :  { %v2904_v29 = vpop.f32.mrb[18].mxu0  ;;  %v2906_v30 = vpop.f32.mrb[18].mxu1 }
 0x137   :  { %v925_v31 = vpop.f32.mrb[19].mxu0  ;;  %v1117_v32 = vpop.f32.mrb[19].mxu1 }
 0x13c   :  { %v2908_v33 = vpop.f32.mrb[20].mxu0  ;;  %v2910_v34 = vpop.f32.mrb[20].mxu1 }
 0x13d   :  { %v930_v35 = vpop.f32.mrb[21].mxu0  ;;  %v1122_v36 = vpop.f32.mrb[21].mxu1 }
 0x13e   :  { %v2912_v37 = vpop.f32.mrb[22].mxu0  ;;  %v2914_v38 = vpop.f32.mrb[22].mxu1 }
 0x13f   :  { %v933_v39 = vpop.f32.mrb[23].mxu0  ;;  %v1125_v40 = vpop.f32.mrb[23].mxu1 }
 0x144   :  { %v2916_v41 = vpop.f32.mrb[24].mxu0  ;;  %v2918_v42 = vpop.f32.mrb[24].mxu1 }
 0x145   :  { %v938_v43 = vpop.f32.mrb[25].mxu0  ;;  %v1130_v44 = vpop.f32.mrb[25].mxu1 }
 0x146   :  { %v2920_v45 = vpop.f32.mrb[26].mxu0  ;;  %v2922_v46 = vpop.f32.mrb[26].mxu1 }
 0x147   :  { %v941_v47 = vpop.f32.mrb[27].mxu0  ;;  %v1133_v48 = vpop.f32.mrb[27].mxu1 }
 0x14c   :  { %v2924_v49 = vpop.f32.mrb[28].mxu0  ;;  %v2926_v50 = vpop.f32.mrb[28].mxu1 }
 0x14d   :  { %v946_v51 = vpop.f32.mrb[29].mxu0  ;;  %v1138_v52 = vpop.f32.mrb[29].mxu1 }
 0x14e   :  { %v2928_v53 = vpop.f32.mrb[30].mxu0  ;;  %v2930_v54 = vpop.f32.mrb[30].mxu1 }
 0x14f   :  { %v949_v55 = vpop.f32.mrb[31].mxu0  ;;  %v1141_v56 = vpop.f32.mrb[31].mxu1 }
 0x154   :  { %v2932_v59 = vpop.f32.mrb[32].mxu0  ;;  %v2172_v60 = vpop.f32.mrb[32].mxu1 }
 0x155   :  { %v2934_v63 = vadd.f32 %v2172_v60, %v896_v1  ;;  %v954_v0 = vpop.f32.mrb[33].mxu0  ;;  %v1177_v3 = vpop.f32.mrb[33].mxu1 }
 0x156   :  { %v2937_v4 = vadd.f32 %v1177_v3, %v2874_v57  ;;  %v2939_v7 = vpop.f32.mrb[34].mxu0  ;;  %v2173_v8 = vpop.f32.mrb[34].mxu1 }
 0x157   :  { %v2941_v11 = vadd.f32 %v2173_v8, %v899_v5  ;;  %v957_v12 = vpop.f32.mrb[35].mxu0  ;;  %v1180_v15 = vpop.f32.mrb[35].mxu1  ;;  %v1503_v20 = vmul.f32 %v2934_v63, %v2934_v63 }
 0x158   :  { %v2944_v16 = vadd.f32 %v1180_v15, %v2878_v61  ;;  %v1501_v19 = vmul.f32 %v2937_v4, %v2937_v4 }
 0x159   :  { %v1504_v32 = vmul.f32 %v2941_v11, %v2941_v11 }
 0x15a   :  { %v1432_v1 = vadd.f32 %v2944_v16, %v2937_v4  ;;  %v1502_v57 = vmul.f32 %v2944_v16, %v2944_v16 }
 0x15c   :  { %v1433_v5 = vadd.f32 %v1432_v1, %v2934_v63  ;;  %v1565_v23 = vadd.f32 %v1502_v57, %v1501_v19  ;;  %v2955_v24 = vpop.f32.mrb[36].mxu0  ;;  %v2176_v27 = vpop.f32.mrb[36].mxu1 }
 0x15d   :  { %v2957_v61 = vadd.f32 %v2176_v27, %v912_v17  ;;  %v962_v28 = vpop.f32.mrb[37].mxu0  ;;  %v1193_v31 = vpop.f32.mrb[37].mxu1 }
 0x15e   :  { %v1434_v35 = vadd.f32 %v1433_v5, %v2941_v11  ;;  %v1566_v36 = vadd.f32 %v1565_v23, %v1503_v20  ;;  %v2963_v39 = vadd.f32 %v1193_v31, %v2886_v9  ;;  %v2965_v40 = vpop.f32.mrb[38].mxu0  ;;  %v2177_v43 = vpop.f32.mrb[38].mxu1 }
 0x15f   :  { %v2968_v44 = vadd.f32 %v2177_v43, %v2896_v21  ;;  %v965_v47 = vpop.f32.mrb[39].mxu0  ;;  %v1196_v17 = vpop.f32.mrb[39].mxu1  ;;  %v1507_v21 = vmul.f32 %v2957_v61, %v2957_v61 }
 0x160   :  { %v1567_v48 = vadd.f32 %v1566_v36, %v1504_v32  ;;  %v1435_v51 = vadd.f32 %v1434_v35, %v2963_v39  ;;  %v1505_v52 = vmul.f32 %v2963_v39, %v2963_v39  ;;  %v2974_v55 = vadd.f32 %v1196_v17, %v2890_v13 }
 0x161   :  { %v1508_v1 = vmul.f32 %v2968_v44, %v2968_v44 }
 0x162   :  { %v1568_v56 = vadd.f32 %v1567_v48, %v1505_v52  ;;  %v1436_v9 = vadd.f32 %v1435_v51, %v2974_v55  ;;  %v1506_v60 = vmul.f32 %v2974_v55, %v2974_v55 }
 0x164   :  { %v1437_v0 = vadd.f32 %v1436_v9, %v2957_v61  ;;  %v1569_v3 = vadd.f32 %v1568_v56, %v1506_v60  ;;  %v2982_v8 = vpop.f32.mrb[40].mxu0  ;;  %v2180_v12 = vpop.f32.mrb[40].mxu1 }
 0x165   :  { %v2985_v15 = vadd.f32 %v2180_v12, %v2908_v33  ;;  %v970_v13 = vpop.f32.mrb[41].mxu0  ;;  %v1209_v19 = vpop.f32.mrb[41].mxu1 }
 0x166   :  { %v1570_v57 = vadd.f32 %v1569_v3, %v1507_v21  ;;  %v2990_v20 = vadd.f32 %v1209_v19, %v2900_v25  ;;  %v1438_v5 = vadd.f32 %v1437_v0, %v2968_v44  ;;  %v2993_v23 = vpop.f32.mrb[42].mxu0  ;;  %v2181_v27 = vpop.f32.mrb[42].mxu1 }
 0x167   :  { %v2996_v28 = vadd.f32 %v2181_v27, %v2912_v37  ;;  %v973_v31 = vpop.f32.mrb[43].mxu0  ;;  %v1212_v33 = vpop.f32.mrb[43].mxu1  ;;  %v1511_v37 = vmul.f32 %v2985_v15, %v2985_v15 }
 0x168   :  { %v1439_v32 = vadd.f32 %v1438_v5, %v2990_v20  ;;  %v1509_v35 = vmul.f32 %v2990_v20, %v2990_v20  ;;  %v1571_v36 = vadd.f32 %v1570_v57, %v1508_v1  ;;  %v3002_v43 = vadd.f32 %v1212_v33, %v2904_v29 }
 0x169   :  { %v1512_v21 = vmul.f32 %v2996_v28, %v2996_v28 }
 0x16a   :  { %v1572_v25 = vadd.f32 %v1571_v36, %v1509_v35  ;;  %v1440_v47 = vadd.f32 %v1439_v32, %v3002_v43  ;;  %v1510_v17 = vmul.f32 %v3002_v43, %v3002_v43 }
 0x16c   :  { %v1441_v48 = vadd.f32 %v1440_v47, %v2985_v15  ;;  %v1573_v51 = vadd.f32 %v1572_v25, %v1510_v17  ;;  %v976_v52 = vpop.f32.mrb[44].mxu0  ;;  %v2184_v56 = vpop.f32.mrb[44].mxu1 }
 0x16d   :  { %v3011_v9 = vadd.f32 %v2184_v56, %v2924_v49  ;;  %v978_v60 = vpop.f32.mrb[45].mxu0  ;;  %v1225_v29 = vpop.f32.mrb[45].mxu1 }
 0x16e   :  { %v1574_v0 = vadd.f32 %v1573_v51, %v1511_v37  ;;  %v3016_v3 = vadd.f32 %v1225_v29, %v2916_v41  ;;  %v1442_v12 = vadd.f32 %v1441_v48, %v2996_v28  ;;  %v979_v13 = vpop.f32.mrb[46].mxu0  ;;  %v2185_v19 = vpop.f32.mrb[46].mxu1 }
 0x16f   :  { %v3020_v1 = vadd.f32 %v2185_v19, %v2928_v53  ;;  %v981_v57 = vpop.f32.mrb[47].mxu0  ;;  %v1228_v5 = vpop.f32.mrb[47].mxu1  ;;  %v1515_v53 = vmul.f32 %v3011_v9, %v3011_v9 }
 0x170   :  { %v1443_v49 = vadd.f32 %v1442_v12, %v3016_v3  ;;  %v1513_v27 = vmul.f32 %v3016_v3, %v3016_v3  ;;  %v1575_v31 = vadd.f32 %v1574_v0, %v1512_v21  ;;  %v3026_v33 = vadd.f32 %v1228_v5, %v2920_v45 }
 0x171   :  { %v1516_v51 = vmul.f32 %v3020_v1, %v3020_v1 }
 0x172   :  { %v1576_v41 = vadd.f32 %v1575_v31, %v1513_v27  ;;  %v1444_v32 = vadd.f32 %v1443_v49, %v3026_v33  ;;  %v1514_v35 = vmul.f32 %v3026_v33, %v3026_v33 }
 0x174   :  { %v1445_v36 = vadd.f32 %v1444_v32, %v3011_v9  ;;  %v1577_v25 = vadd.f32 %v1576_v41, %v1514_v35  ;;  %v984_v47 = vpop.f32.mrb[48].mxu0  ;;  %v2188_v17 = vpop.f32.mrb[48].mxu1 }
 0x175   :  { %v3035_v37 = vadd.f32 %v2188_v17, %v2955_v24  ;;  %v986_v48 = vpop.f32.mrb[49].mxu0  ;;  %v1241_v45 = vpop.f32.mrb[49].mxu1 }
 0x176   :  { %v1578_v56 = vadd.f32 %v1577_v25, %v1515_v53  ;;  %v3040_v60 = vadd.f32 %v1241_v45, %v2932_v59  ;;  %v1446_v29 = vadd.f32 %v1445_v36, %v3020_v1  ;;  %v987_v21 = vpop.f32.mrb[50].mxu0  ;;  %v2189_v0 = vpop.f32.mrb[50].mxu1 }
 0x177   :  { %v3044_v12 = vadd.f32 %v2189_v0, %v2965_v40  ;;  %v989_v19 = vpop.f32.mrb[51].mxu0  ;;  %v1244_v57 = vpop.f32.mrb[51].mxu1  ;;  %v1519_v40 = vmul.f32 %v3035_v37, %v3035_v37 }
 0x178   :  { %v1447_v24 = vadd.f32 %v1446_v29, %v3040_v60  ;;  %v1517_v5 = vmul.f32 %v3040_v60, %v3040_v60  ;;  %v1579_v49 = vadd.f32 %v1578_v56, %v1516_v51  ;;  %v3050_v27 = vadd.f32 %v1244_v57, %v2939_v7 }
 0x179   :  { %v1520_v7 = vmul.f32 %v3044_v12, %v3044_v12 }
 0x17a   :  { %v1580_v59 = vadd.f32 %v1579_v49, %v1517_v5  ;;  %v1448_v31 = vadd.f32 %v1447_v24, %v3050_v27  ;;  %v1518_v41 = vmul.f32 %v3050_v27, %v3050_v27 }
 0x17c   :  { %v1449_v32 = vadd.f32 %v1448_v31, %v3035_v37  ;;  %v1581_v35 = vadd.f32 %v1580_v59, %v1518_v41  ;;  %v992_v53 = vpop.f32.mrb[52].mxu0  ;;  %v2192_v36 = vpop.f32.mrb[52].mxu1 }
 0x17d   :  { %v3058_v25 = vadd.f32 %v2192_v36, %v976_v52  ;;  %v994_v17 = vpop.f32.mrb[53].mxu0  ;;  %v1257_v48 = vpop.f32.mrb[53].mxu1 }
 0x17e   :  { %v1582_v45 = vadd.f32 %v1581_v35, %v1519_v40  ;;  %v3063_v51 = vadd.f32 %v1257_v48, %v2982_v8  ;;  %v1450_v56 = vadd.f32 %v1449_v32, %v3044_v12  ;;  %v995_v29 = vpop.f32.mrb[54].mxu0  ;;  %v2193_v0 = vpop.f32.mrb[54].mxu1 }
 0x17f   :  { %4138 = vst [vmem:[#allocation5_spill] sm:$0xff] %v3058_v25  ;;  %v3066_v19 = vadd.f32 %v2193_v0, %v979_v13  ;;  %v997_v57 = vpop.f32.mrb[55].mxu0  ;;  %v1260_v24 = vpop.f32.mrb[55].mxu1  ;;  %v1523_v13 = vmul.f32 %v3058_v25, %v3058_v25 }
 0x180   :  { %4139 = vst [vmem:[#allocation6_spill] sm:$0xff] %v3063_v51  ;;  %v1451_v52 = vadd.f32 %v1450_v56, %v3063_v51  ;;  %v1521_v5 = vmul.f32 %v3063_v51, %v3063_v51  ;;  %v1583_v49 = vadd.f32 %v1582_v45, %v1520_v7  ;;  %v3072_v59 = vadd.f32 %v1260_v24, %v2993_v23 }
 0x181   :  { %4140 = vst [vmem:[#allocation7_spill] sm:$0xff] %v3066_v19  ;;  %v1524_v23 = vmul.f32 %v3066_v19, %v3066_v19 }
 0x182   :  { %4141 = vst [vmem:[#allocation8_spill] sm:$0xff] %v3072_v59  ;;  %v1584_v31 = vadd.f32 %v1583_v49, %v1521_v5  ;;  %v1452_v8 = vadd.f32 %v1451_v52, %v3072_v59  ;;  %v1522_v41 = vmul.f32 %v3072_v59, %v3072_v59 }
 0x184   :  { %v1453_v40 = vadd.f32 %v1452_v8, %v3058_v25  ;;  %v1585_v32 = vadd.f32 %v1584_v31, %v1522_v41  ;;  %v1000_v35 = vpop.f32.mrb[56].mxu0  ;;  %v2196_v36 = vpop.f32.mrb[56].mxu1 }
 0x185   :  { %v3080_v17 = vadd.f32 %v2196_v36, %v992_v53  ;;  %v1002_v48 = vpop.f32.mrb[57].mxu0  ;;  %v1273_v7 = vpop.f32.mrb[57].mxu1 }
 0x186   :  { %v1586_v45 = vadd.f32 %v1585_v32, %v1523_v13  ;;  %v3084_v56 = vadd.f32 %v1273_v7, %v984_v47  ;;  %v1454_v0 = vadd.f32 %v1453_v40, %v3066_v19  ;;  %v1003_v57 = vpop.f32.mrb[58].mxu0  ;;  %v2197_v24 = vpop.f32.mrb[58].mxu1 }
 0x187   :  { %4142 = vst [vmem:[#allocation9_spill] sm:$0xff] %v3080_v17  ;;  %v3087_v52 = vadd.f32 %v2197_v24, %v995_v29  ;;  %v1005_v5 = vpop.f32.mrb[59].mxu0  ;;  %v1276_v49 = vpop.f32.mrb[59].mxu1  ;;  %v1527_v48 = vmul.f32 %v3080_v17, %v3080_v17 }
 0x188   :  { %4143 = vst [vmem:[#allocation10_spill] sm:$0xff] %v3084_v56  ;;  %v1455_v31 = vadd.f32 %v1454_v0, %v3084_v56  ;;  %v1525_v53 = vmul.f32 %v3084_v56, %v3084_v56  ;;  %v1587_v8 = vadd.f32 %v1586_v45, %v1524_v23  ;;  %v3092_v41 = vadd.f32 %v1276_v49, %v987_v21 }
 0x189   :  { %4144 = vst [vmem:[#allocation11_spill] sm:$0xff] %v3087_v52 }
 0x18a   :  { %4145 = vst [vmem:[#allocation12_spill] sm:$0xff] %v3092_v41  ;;  %v1588_v36 = vadd.f32 %v1587_v8, %v1525_v53  ;;  %v1456_v47 = vadd.f32 %v1455_v31, %v3092_v41  ;;  %v1526_v13 = vmul.f32 %v3092_v41, %v3092_v41 }
 0x18c   :  { %v1589_v40 = vadd.f32 %v1588_v36, %v1526_v13  ;;  %v1008_v32 = vpop.f32.mrb[60].mxu0  ;;  %v2200_v29 = vpop.f32.mrb[60].mxu1  ;;  %v1457_v7 = vadd.f32 %v1456_v47, %v3080_v17  ;;  %v1528_v13 = vmul.f32 %v3087_v52, %v3087_v52 }
 0x18d   :  { %v3100_v0 = vadd.f32 %v2200_v29, %v1008_v32  ;;  %v1010_v24 = vpop.f32.mrb[61].mxu0  ;;  %v1289_v23 = vpop.f32.mrb[61].mxu1 }
 0x18e   :  { %v3102_v21 = vadd.f32 %v1289_v23, %v1000_v35  ;;  %v1011_v45 = vpop.f32.mrb[62].mxu0  ;;  %v2201_v5 = vpop.f32.mrb[62].mxu1  ;;  %v1590_v49 = vadd.f32 %v1589_v40, %v1527_v48  ;;  %v1458_v47 = vadd.f32 %v1457_v7, %v3087_v52 }
 0x18f   :  { %4146 = vst [vmem:[#allocation13_spill] sm:$0xff] %v3100_v0  ;;  %v3104_v31 = vadd.f32 %v2201_v5, %v1011_v45  ;;  %v1013_v53 = vpop.f32.mrb[63].mxu0  ;;  %v1292_v8 = vpop.f32.mrb[63].mxu1 }
 0x190   :  { %4147 = vst [vmem:[#allocation14_spill] sm:$0xff] %v3102_v21  ;;  %v3106_v36 = vadd.f32 %v1292_v8, %v1003_v57  ;;  %v1529_v32 = vmul.f32 %v3102_v21, %v3102_v21  ;;  %v1591_v29 = vadd.f32 %v1590_v49, %v1528_v13  ;;  %v1459_v23 = vadd.f32 %v1458_v47, %v3102_v21 }
 0x191   :  { %4148 = vst [vmem:[#allocation15_spill] sm:$0xff] %v3104_v31  ;;  %v1531_v47 = vmul.f32 %v3100_v0, %v3100_v0 }
 0x192   :  { %4149 = vst [vmem:[#allocation16_spill] sm:$0xff] %v3106_v36  ;;  %v1592_v53 = vadd.f32 %v1591_v29, %v1529_v32  ;;  %v1530_v8 = vmul.f32 %v3106_v36, %v3106_v36  ;;  %v1460_v49 = vadd.f32 %v1459_v23, %v3106_v36  ;;  %v1532_v23 = vmul.f32 %v3104_v31, %v3104_v31 }
 0x194   :  { %v1016_v35 = vpop.f32.mrb[64].mxu0  ;;  %v2204_v24 = vpop.f32.mrb[64].mxu1  ;;  %v1593_v13 = vadd.f32 %v1592_v53, %v1530_v8 }
 0x195   :  { %v1018_v40 = vpop.f32.mrb[65].mxu0  ;;  %v1305_v48 = vpop.f32.mrb[65].mxu1 }
 0x196   :  { %v3114_v45 = vadd.f32 %v1305_v48, %v1016_v35  ;;  %v1019_v5 = vpop.f32.mrb[66].mxu0  ;;  %v2205_v57 = vpop.f32.mrb[66].mxu1  ;;  %v1461_v35 = vadd.f32 %v1460_v49, %v3100_v0 }
 0x197   :  { %v1021_v17 = vpop.f32.mrb[67].mxu0  ;;  %v1308_v7 = vpop.f32.mrb[67].mxu1 }
 0x198   :  { %4150 = vst [vmem:[#allocation17_spill] sm:$0xff] %v3114_v45  ;;  %v3118_v52 = vadd.f32 %v1308_v7, %v1019_v5  ;;  %v1594_v17 = vadd.f32 %v1593_v13, %v1531_v47  ;;  %v1462_v53 = vadd.f32 %v1461_v35, %v3104_v31  ;;  %v1533_v8 = vmul.f32 %v3114_v45, %v3114_v45 }
 0x19a   :  { %4151 = vst [vmem:[#allocation18_spill] sm:$0xff] %v3118_v52  ;;  %v1595_v49 = vadd.f32 %v1594_v17, %v1532_v23  ;;  %v1534_v36 = vmul.f32 %v3118_v52, %v3118_v52 }
 0x19c   :  { %v1024_v41 = vpop.f32.mrb[68].mxu0  ;;  %v2208_v56 = vpop.f32.mrb[68].mxu1 }
 0x19d   :  { %v3124_v40 = vadd.f32 %v2204_v24, %v1024_v41  ;;  %v1026_v32 = vpop.f32.mrb[69].mxu0  ;;  %v1321_v29 = vpop.f32.mrb[69].mxu1 }
 0x19e   :  { %v1027_v48 = vpop.f32.mrb[70].mxu0  ;;  %v2209_v21 = vpop.f32.mrb[70].mxu1  ;;  %v1463_v32 = vadd.f32 %v1462_v53, %v3114_v45 }
 0x19f   :  { %4152 = vst [vmem:[#allocation19_spill] sm:$0xff] %v3124_v40  ;;  %v3126_v19 = vadd.f32 %v2205_v57, %v1027_v48  ;;  %v1029_v5 = vpop.f32.mrb[71].mxu0  ;;  %v1324_v7 = vpop.f32.mrb[71].mxu1  ;;  %v1535_v23 = vmul.f32 %v3124_v40, %v3124_v40 }
 0x1a0   :  { %v1596_v5 = vadd.f32 %v1595_v49, %v1533_v8  ;;  %v1464_v17 = vadd.f32 %v1463_v32, %v3118_v52 }
 0x1a1   :  { %4153 = vst [vmem:[#allocation20_spill] sm:$0xff] %v3126_v19  ;;  %v1536_v8 = vmul.f32 %v3126_v19, %v3126_v19 }
 0x1a2   :  { %v1465_v53 = vadd.f32 %v1464_v17, %v3124_v40 }
 0x1a4   :  { %v1032_v41 = vpop.f32.mrb[72].mxu0  ;;  %v2212_v24 = vpop.f32.mrb[72].mxu1  ;;  %v1466_v32 = vadd.f32 %v1465_v53, %v3126_v19 }
 0x1a5   :  { %v3134_v0 = vadd.f32 %v1321_v29, %v1032_v41  ;;  %v1034_v13 = vpop.f32.mrb[73].mxu0  ;;  %v1337_v57 = vpop.f32.mrb[73].mxu1  ;;  %v1597_v29 = vadd.f32 %v1596_v5, %v1534_v36 }
 0x1a6   :  { %v1035_v47 = vpop.f32.mrb[74].mxu0  ;;  %v3136_v48 = vpop.f32.mrb[74].mxu1 }
 0x1a7   :  { %4154 = vst [vmem:[#allocation21_spill] sm:$0xff] %v3134_v0  ;;  %v3140_v35 = vadd.f32 %v1324_v7, %v1035_v47  ;;  %v1037_v31 = vpop.f32.mrb[75].mxu0  ;;  %v1340_v25 = vpop.f32.mrb[75].mxu1  ;;  %v1598_v45 = vadd.f32 %v1597_v29, %v1535_v23  ;;  %v1537_v36 = vmul.f32 %v3134_v0, %v3134_v0  ;;  %v1467_v29 = vadd.f32 %v1466_v32, %v3134_v0 }
 0x1a9   :  { %4155 = vst [vmem:[#allocation22_spill] sm:$0xff] %v3140_v35  ;;  %v1599_v23 = vadd.f32 %v1598_v45, %v1536_v8  ;;  %v1468_v51 = vadd.f32 %v1467_v29, %v3140_v35 }
 0x1ab   :  { %v1600_v52 = vadd.f32 %v1599_v23, %v1537_v36 }
 0x1ac   :  { %v1040_v41 = vpop.f32.mrb[76].mxu0  ;;  %v3146_v13 = vpop.f32.mrb[76].mxu1 }
 0x1ad   :  { %v3150_v49 = vadd.f32 %v2208_v56, %v1040_v41  ;;  %v1042_v7 = vpop.f32.mrb[77].mxu0  ;;  %v1353_v31 = vpop.f32.mrb[77].mxu1  ;;  %v1538_v56 = vmul.f32 %v3140_v35, %v3140_v35 }
 0x1ae   :  { %v1043_v47 = vpop.f32.mrb[78].mxu0  ;;  %v3152_v59 = vpop.f32.mrb[78].mxu1 }
 0x1af   :  { %v3157_v5 = vadd.f32 %v2209_v21, %v1043_v47  ;;  %v1045_v17 = vpop.f32.mrb[79].mxu0  ;;  %v1356_v40 = vpop.f32.mrb[79].mxu1  ;;  %v1539_v53 = vmul.f32 %v3150_v49, %v3150_v49  ;;  %v1469_v23 = vadd.f32 %v1468_v51, %v3150_v49 }
 0x1b0   :  { %v1601_v17 = vadd.f32 %v1600_v52, %v1538_v56 }
 0x1b4   :  { %v1048_v41 = vpop.f32.mrb[80].mxu0  ;;  %v2220_v7 = vpop.f32.mrb[80].mxu1 }
 0x1b5   :  { %v3165_v19 = vadd.f32 %v1337_v57, %v1048_v41  ;;  %v3168_v21 = vadd.f32 %v2220_v7, %v2882_v2  ;;  %v1050_v47 = vpop.f32.mrb[81].mxu0  ;;  %v1369_v45 = vpop.f32.mrb[81].mxu1  ;;  %v1602_v41 = vadd.f32 %v1601_v17, %v1539_v53  ;;  %v1470_v7 = vadd.f32 %v1469_v23, %v3157_v5 }
 0x1b6   :  { %v3171_v8 = vadd.f32 %v1369_v45, %v2876_v58  ;;  %v1051_v32 = vpop.f32.mrb[82].mxu0  ;;  %v2221_v36 = vpop.f32.mrb[82].mxu1  ;;  %v1540_v58 = vmul.f32 %v3157_v5, %v3157_v5 }
 0x1b7   :  { %v3174_v0 = vadd.f32 %v1340_v25, %v1051_v32  ;;  %v1053_v29 = vpop.f32.mrb[83].mxu0  ;;  %v1372_v35 = vpop.f32.mrb[83].mxu1  ;;  %v3177_v57 = vadd.f32 %v2221_v36, %v2884_v6  ;;  %v1541_v52 = vmul.f32 %v3165_v19, %v3165_v19  ;;  %v1471_v47 = vadd.f32 %v1470_v7, %v3165_v19 }
 0x1b8   :  { %v3180_v2 = vadd.f32 %v1372_v35, %v2880_v62  ;;  %v1603_v56 = vadd.f32 %v1602_v41, %v1540_v58 }
 0x1b9   :  { %v1542_v23 = vmul.f32 %v3174_v0, %v3174_v0 }
 0x1ba   :  { %v1604_v17 = vadd.f32 %v1603_v56, %v1541_v52 }
 0x1bc   :  { %v1056_v51 = vpop.f32.mrb[84].mxu0  ;;  %v2224_v25 = vpop.f32.mrb[84].mxu1  ;;  %v1605_v52 = vadd.f32 %v1604_v17, %v1542_v23 }
 0x1bd   :  { %v3188_v45 = vadd.f32 %v2212_v24, %v1056_v51  ;;  %v3191_v6 = vadd.f32 %v2224_v25, %v2894_v18  ;;  %v1058_v62 = vpop.f32.mrb[85].mxu0  ;;  %v1385_v35 = vpop.f32.mrb[85].mxu1 }
 0x1be   :  { %v3194_v53 = vadd.f32 %v1385_v35, %v2888_v10  ;;  %v1059_v32 = vpop.f32.mrb[86].mxu0  ;;  %v2225_v36 = vpop.f32.mrb[86].mxu1  ;;  %v1472_v10 = vadd.f32 %v1471_v47, %v3174_v0 }
 0x1bf   :  { %v3199_v29 = vadd.f32 %v3136_v48, %v1059_v32  ;;  %v1061_v41 = vpop.f32.mrb[87].mxu0  ;;  %v1388_v24 = vpop.f32.mrb[87].mxu1  ;;  %v3202_v58 = vadd.f32 %v2225_v36, %v2898_v22  ;;  %v1543_v7 = vmul.f32 %v3188_v45, %v3188_v45 }
 0x1c0   :  { %v3205_v18 = vadd.f32 %v1388_v24, %v2892_v14  ;;  %v1473_v51 = vadd.f32 %v1472_v10, %v3188_v45 }
 0x1c1   :  { %v1606_v48 = vadd.f32 %v1605_v52, %v1543_v7  ;;  %v1544_v62 = vmul.f32 %v3199_v29, %v3199_v29 }
 0x1c2   :  { %v1474_v23 = vadd.f32 %v1473_v51, %v3199_v29 }
 0x1c3   :  { %v1607_v52 = vadd.f32 %v1606_v48, %v1544_v62 }
 0x1c4   :  { %v1064_v25 = vpop.f32.mrb[88].mxu0  ;;  %v2228_v56 = vpop.f32.mrb[88].mxu1 }
 0x1c5   :  { %v3213_v35 = vadd.f32 %v1353_v31, %v1064_v25  ;;  %v3216_v22 = vadd.f32 %v2228_v56, %v2910_v34  ;;  %v1066_v14 = vpop.f32.mrb[89].mxu0  ;;  %v1401_v32 = vpop.f32.mrb[89].mxu1 }
 0x1c6   :  { %v3219_v47 = vadd.f32 %v1401_v32, %v2902_v26  ;;  %v1067_v36 = vpop.f32.mrb[90].mxu0  ;;  %v2229_v17 = vpop.f32.mrb[90].mxu1 }
 0x1c7   :  { %4156 = vst [vmem:[#allocation23_spill] sm:$0xff] %v3216_v22  ;;  %v1545_v41 = vmul.f32 %v3213_v35, %v3213_v35  ;;  %v3224_v24 = vadd.f32 %v1356_v40, %v1067_v36  ;;  %v1069_v10 = vpop.f32.mrb[91].mxu0  ;;  %v1404_v31 = vpop.f32.mrb[91].mxu1  ;;  %v3227_v7 = vadd.f32 %v2229_v17, %v2914_v38  ;;  %v1475_v26 = vadd.f32 %v1474_v23, %v3213_v35 }
 0x1c8   :  { %4157 = vst [vmem:[#allocation24_spill] sm:$0xff] %v3219_v47  ;;  %v3230_v34 = vadd.f32 %v1404_v31, %v2906_v30 }
 0x1c9   :  { %4158 = vst [vmem:[#allocation25_spill] sm:$0xff] %v3227_v7  ;;  %v1608_v25 = vadd.f32 %v1607_v52, %v1545_v41  ;;  %v1546_v51 = vmul.f32 %v3224_v24, %v3224_v24  ;;  %v1476_v40 = vadd.f32 %v1475_v26, %v3224_v24 }
 0x1ca   :  { %4159 = vst [vmem:[#allocation26_spill] sm:$0xff] %v3230_v34 }
 0x1cb   :  { %v1609_v23 = vadd.f32 %v1608_v25, %v1546_v51  ;;  %v1549_v51 = vmul.f32 %v3171_v8, %v3171_v8 }
 0x1cc   :  { %v1072_v56 = vpop.f32.mrb[92].mxu0  ;;  %v2232_v14 = vpop.f32.mrb[92].mxu1 }
 0x1cd   :  { %v3237_v32 = vadd.f32 %v3146_v13, %v1072_v56  ;;  %v3240_v38 = vadd.f32 %v2232_v14, %v2926_v50  ;;  %v1074_v36 = vpop.f32.mrb[93].mxu0  ;;  %v1417_v30 = vpop.f32.mrb[93].mxu1 }
 0x1ce   :  { %v3243_v48 = vadd.f32 %v1417_v30, %v2918_v42  ;;  %v1075_v62 = vpop.f32.mrb[94].mxu0  ;;  %v2233_v17 = vpop.f32.mrb[94].mxu1 }
 0x1cf   :  { %4160 = vst [vmem:[#allocation27_spill] sm:$0xff] %v3240_v38  ;;  %v1477_v41 = vadd.f32 %v1476_v40, %v3237_v32  ;;  %v1547_v10 = vmul.f32 %v3237_v32, %v3237_v32  ;;  %v3249_v31 = vadd.f32 %v3152_v59, %v1075_v62  ;;  %v1077_v13 = vpop.f32.mrb[95].mxu0  ;;  %v1420_v52 = vpop.f32.mrb[95].mxu1  ;;  %v3252_v50 = vadd.f32 %v2233_v17, %v2930_v54 }
 0x1d0   :  { %4161 = vst [vmem:[#allocation28_spill] sm:$0xff] %v3243_v48  ;;  %v3255_v26 = vadd.f32 %v1420_v52, %v2922_v46  ;;  %v1550_v40 = vmul.f32 %v3180_v2, %v3180_v2  ;;  %v1551_v46 = vmul.f32 %v3168_v21, %v3168_v21  ;;  %v1552_v17 = vmul.f32 %v3177_v57, %v3177_v57 }
 0x1d1   :  { %v1610_v42 = vadd.f32 %v1609_v23, %v1547_v10  ;;  %v1478_v56 = vadd.f32 %v1477_v41, %v3249_v31  ;;  %v1548_v25 = vmul.f32 %v3249_v31, %v3249_v31  ;;  %v1553_v10 = vmul.f32 %v3194_v53, %v3194_v53 }
 0x1d3   :  { %v1479_v59 = vadd.f32 %v1478_v56, %v3171_v8  ;;  %v1611_v14 = vadd.f32 %v1610_v42, %v1548_v25  ;;  %v1554_v42 = vmul.f32 %v3205_v18, %v3205_v18 }
 0x1d5   :  { %v1480_v54 = vadd.f32 %v1479_v59, %v3180_v2  ;;  %v1612_v36 = vadd.f32 %v1611_v14, %v1549_v51  ;;  %v1555_v51 = vmul.f32 %v3191_v6, %v3191_v6 }
 0x1d7   :  { %v1481_v30 = vadd.f32 %v1480_v54, %v3168_v21  ;;  %v1613_v62 = vadd.f32 %v1612_v36, %v1550_v40  ;;  %v1556_v40 = vmul.f32 %v3202_v58, %v3202_v58 }
 0x1d9   :  { %v1482_v23 = vadd.f32 %v1481_v30, %v3177_v57  ;;  %v1614_v41 = vadd.f32 %v1613_v62, %v1551_v46  ;;  %v1557_v46 = vmul.f32 %v3219_v47, %v3219_v47 }
 0x1db   :  { %v1483_v13 = vadd.f32 %v1482_v23, %v3194_v53  ;;  %v1615_v52 = vadd.f32 %v1614_v41, %v1552_v17  ;;  %v1558_v17 = vmul.f32 %v3230_v34, %v3230_v34 }
 0x1dd   :  { %v1484_v56 = vadd.f32 %v1483_v13, %v3205_v18  ;;  %v1616_v25 = vadd.f32 %v1615_v52, %v1553_v10  ;;  %v1559_v10 = vmul.f32 %v3216_v22, %v3216_v22 }
 0x1df   :  { %v1617_v59 = vadd.f32 %v1616_v25, %v1554_v42  ;;  %v1485_v14 = vadd.f32 %v1484_v56, %v3191_v6  ;;  %v1560_v42 = vmul.f32 %v3227_v7, %v3227_v7 }
 0x1e1   :  { %v1486_v54 = vadd.f32 %v1485_v14, %v3202_v58  ;;  %v1618_v36 = vadd.f32 %v1617_v59, %v1555_v51  ;;  %v1561_v51 = vmul.f32 %v3243_v48, %v3243_v48 }
 0x1e3   :  { %v1487_v30 = vadd.f32 %v1486_v54, %v3219_v47  ;;  %v1619_v62 = vadd.f32 %v1618_v36, %v1556_v40  ;;  %v1562_v54 = vmul.f32 %v3255_v26, %v3255_v26 }
 0x1e5   :  { %v1488_v23 = vadd.f32 %v1487_v30, %v3230_v34  ;;  %v1620_v41 = vadd.f32 %v1619_v62, %v1557_v46  ;;  %v1563_v46 = vmul.f32 %v3240_v38, %v3240_v38 }
 0x1e7   :  { %v1489_v13 = vadd.f32 %v1488_v23, %v3216_v22  ;;  %v1621_v52 = vadd.f32 %v1620_v41, %v1558_v17  ;;  %v1564_v17 = vmul.f32 %v3252_v50, %v3252_v50 }
 0x1e9   :  { %v1490_v56 = vadd.f32 %v1489_v13, %v3227_v7  ;;  %v1622_v25 = vadd.f32 %v1621_v52, %v1559_v10 }
 0x1eb   :  { %v1491_v59 = vadd.f32 %v1490_v56, %v3243_v48  ;;  %v1623_v14 = vadd.f32 %v1622_v25, %v1560_v42 }
 0x1ed   :  { %v1492_v40 = vadd.f32 %v1491_v59, %v3255_v26  ;;  %v1624_v36 = vadd.f32 %v1623_v14, %v1561_v51 }
 0x1ef   :  { %v1493_v30 = vadd.f32 %v1492_v40, %v3240_v38  ;;  %v1625_v62 = vadd.f32 %v1624_v36, %v1562_v54 }
 0x1f1   :  { %v1494_v23 = vadd.f32 %v1493_v30, %v3252_v50  ;;  %v1626_v41 = vadd.f32 %v1625_v62, %v1563_v46  ;;  %v1647_v46 = vlaneseq }
 0x1f3   :  { %v1495_v10 = vrot.slane %v1494_v23, 4  ;;  %v1627_v13 = vadd.f32 %v1626_v41, %v1564_v17  ;;  %v1648_v62 = vshrl.u32 %v1647_v46, 7  ;;  %v1639_v17 = vld [vmem:[%s4110_s2] sm:$0x1]  ;;  %v4167_v46 = vld [vmem:[#allocation12_spill] sm:$0xff] }
 0x1f5   :  { %v1496_v52 = vadd.f32 %v1495_v10, %v1494_v23  ;;  %v1628_v42 = vrot.slane %v1627_v13, 4  ;;  %v1649_v23 = vsub.s32 0, %v1648_v62 }
 0x1f7   :  { %v1497_v56 = vrot.slane %v1496_v52, 2  ;;  %v1629_v25 = vadd.f32 %v1628_v42, %v1627_v13 }
 0x1f9   :  { %v1498_v59 = vadd.f32 %v1497_v56, %v1496_v52  ;;  %v1630_v51 = vrot.slane %v1629_v25, 2 }
 0x1fb   :  { %v1499_v14 = vrot.slane %v1498_v59, 1  ;;  %v1631_v48 = vadd.f32 %v1630_v51, %v1629_v25 }
 0x1fd   :  { %v1500_v7 = vadd.f32 %v1499_v14, %v1498_v59  ;;  %v1632_v22 = vrot.slane %v1631_v48, 1  ;;  %v4162_v14 = vld [vmem:[#allocation6_spill] sm:$0xff] }
 0x1ff   :  { %v1633_v40 = vadd.f32 %v1632_v22, %v1631_v48  ;;  %v1634_v54 = vmul.f32 0.001953125, %v1500_v7  ;;  %v1643_v22 = vld [vmem:[%s4111_s3] sm:$0x1] }
 0x201   :  { %v1635_v36 = vmul.f32 0.001953125, %v1633_v40  ;;  %v1636_v38 = vmul.f32 %v1634_v54, %v1634_v54  ;;  %v4163_v40 = vld [vmem:[#allocation8_spill] sm:$0xff] }
 0x203   :  { %v1637_v34 = vsub.f32 %v1635_v36, %v1636_v38  ;;  %v4165_v36 = vld [vmem:[#allocation7_spill] sm:$0xff] }
 0x205   :  { %v1638_v47 = vmax.f32 %v1637_v34, 0.0 }
 0x207   :  { %v1640_v30 = vadd.f32 1e-05, %v1638_v47 }
 0x209   :  { %2422 = vrsqrt.f32 %v1640_v30  ;;  %v4166_v30 = vld [vmem:[#allocation10_spill] sm:$0xff] }
 0x213   :  { %v2423_v41 = vpop.eup %2422 }
 0x214   :  { %v1642_v10 = vmul.f32 %v2423_v41, %v1639_v17  ;;  %v4168_v17 = vld [vmem:[#allocation9_spill] sm:$0xff]  ;;  %v4169_v41 = vld [vmem:[#allocation11_spill] sm:$0xff] }
 0x216   :  { %v1644_v7 = vmul.f32 %v1642_v10, %v1634_v54  ;;  %v3314_v48 = vrot.slane %v1642_v10, %v1649_v23  ;;  %v4164_v54 = vld [vmem:[#allocation5_spill] sm:$0xff] }
 0x218   :  { %v1645_v38 = vsub.f32 %v1643_v22, %v1644_v7  ;;  %v1713_v47 = vmul.f32 %v3314_v48, %v3255_v26  ;;  %v3320_v34 = vmul.f32 %v3314_v48, %v2937_v4  ;;  %v3324_v13 = vmul.f32 %v3314_v48, %v2944_v16  ;;  %v4170_v22 = vld [vmem:[#allocation14_spill] sm:$0xff] }
 0x219   :  { %v3328_v52 = vmul.f32 %v3314_v48, %v2934_v63  ;;  %v3332_v42 = vmul.f32 %v3314_v48, %v2941_v11  ;;  %v3336_v56 = vmul.f32 %v3314_v48, %v2963_v39  ;;  %v3340_v4 = vmul.f32 %v3314_v48, %v2974_v55  ;;  %v1847_v39 = vld [vmem:[%s4112_s4 + $0x1e8] sm:$0xff] }
 0x21a   :  { %v3342_v26 = vrot.slane %v1645_v38, %v1649_v23  ;;  %v3346_v16 = vmul.f32 %v3314_v48, %v2957_v61  ;;  %v3350_v63 = vmul.f32 %v3314_v48, %v2968_v44  ;;  %v3354_v11 = vmul.f32 %v3314_v48, %v2990_v20  ;;  %v4171_v38 = vld [vmem:[#allocation16_spill] sm:$0xff] }
 0x21b   :  { %v3361_v55 = vmul.f32 %v3314_v48, %v3002_v43  ;;  %v3365_v61 = vmul.f32 %v3314_v48, %v2985_v15  ;;  %v3369_v44 = vmul.f32 %v3314_v48, %v2996_v28  ;;  %v3373_v20 = vmul.f32 %v3314_v48, %v3016_v3 }
 0x21c   :  { %v1783_v25 = vadd.f32 %v3342_v26, %v1713_v47  ;;  %v3378_v59 = vmul.f32 %v3314_v48, %v3026_v33  ;;  %v3382_v43 = vmul.f32 %v3314_v48, %v3011_v9  ;;  %v3386_v15 = vmul.f32 %v3314_v48, %v3020_v1 }
 0x21d   :  { %v3390_v28 = vmul.f32 %v3314_v48, %v3040_v60  ;;  %v3394_v3 = vmul.f32 %v3314_v48, %v3050_v27  ;;  %v3398_v33 = vmul.f32 %v3314_v48, %v3035_v37  ;;  %v3402_v9 = vmul.f32 %v3314_v48, %v3044_v12 }
 0x21e   :  { %v1911_v51 = vadd.f32 %v1847_v39, %v1783_v25  ;;  %v3406_v1 = vmul.f32 %v3314_v48, %v4162_v14  ;;  %v3410_v60 = vmul.f32 %v3314_v48, %v4163_v40  ;;  %v3414_v27 = vmul.f32 %v3314_v48, %v4164_v54  ;;  %v4172_v39 = vld [vmem:[#allocation13_spill] sm:$0xff]  ;;  %v4173_v14 = vld [vmem:[#allocation15_spill] sm:$0xff] }
 0x21f   :  { %v3418_v37 = vmul.f32 %v3314_v48, %v4165_v36  ;;  %v3422_v12 = vmul.f32 %v3314_v48, %v4166_v30  ;;  %v3426_v62 = vmul.f32 %v3314_v48, %v4167_v46  ;;  %v3430_v23 = vmul.f32 %v3314_v48, %v4168_v17  ;;  %v4175_v36 = vld [vmem:[#allocation18_spill] sm:$0xff]  ;;  %v4176_v46 = vld [vmem:[#allocation19_spill] sm:$0xff] }
 0x220   :  { %1975 = vst [vmem:[#allocation2 + $0x1e8] sm:$0xff] %v1911_v51  ;;  %v3434_v10 = vmul.f32 %v3314_v48, %v4169_v41  ;;  %v3438_v7 = vmul.f32 %v3314_v48, %v4170_v22  ;;  %v3442_v47 = vmul.f32 %v3314_v48, %v4171_v38  ;;  %v3446_v25 = vmul.f32 %v3314_v48, %v4172_v39  ;;  %v4174_v51 = vld [vmem:[#allocation17_spill] sm:$0xff]  ;;  %v4177_v41 = vld [vmem:[#allocation20_spill] sm:$0xff] }
 0x221   :  { %v3450_v40 = vmul.f32 %v3314_v48, %v4173_v14  ;;  %v3454_v54 = vmul.f32 %v3314_v48, %v4174_v51  ;;  %v3458_v30 = vmul.f32 %v3314_v48, %v4175_v36  ;;  %v3462_v17 = vmul.f32 %v3314_v48, %v4176_v46  ;;  %v4178_v38 = vld [vmem:[#allocation21_spill] sm:$0xff]  ;;  %v4179_v14 = vld [vmem:[#allocation22_spill] sm:$0xff] }
 0x222   :  { %v3466_v22 = vmul.f32 %v3314_v48, %v4177_v41  ;;  %v3470_v39 = vmul.f32 %v3314_v48, %v4178_v38  ;;  %v3474_v51 = vmul.f32 %v3314_v48, %v4179_v14  ;;  %v3478_v36 = vmul.f32 %v3314_v48, %v3150_v49 }
 0x223   :  { %v3482_v46 = vmul.f32 %v3314_v48, %v3157_v5  ;;  %v3486_v41 = vmul.f32 %v3314_v48, %v3165_v19  ;;  %v3490_v38 = vmul.f32 %v3314_v48, %v3174_v0  ;;  %v3494_v14 = vmul.f32 %v3314_v48, %v3188_v45 }
 0x224   :  { %v3498_v49 = vmul.f32 %v3314_v48, %v3199_v29  ;;  %v3502_v5 = vmul.f32 %v3314_v48, %v3213_v35  ;;  %v3506_v19 = vmul.f32 %v3314_v48, %v3224_v24  ;;  %v3510_v0 = vmul.f32 %v3314_v48, %v3237_v32 }
 0x225   :  { %v3514_v45 = vmul.f32 %v3314_v48, %v3249_v31  ;;  %v3518_v29 = vmul.f32 %v3314_v48, %v3171_v8  ;;  %v3522_v35 = vmul.f32 %v3314_v48, %v3180_v2  ;;  %v3526_v24 = vmul.f32 %v3314_v48, %v3168_v21 }
 0x226   :  { %v3530_v32 = vmul.f32 %v3314_v48, %v3177_v57  ;;  %v3534_v31 = vmul.f32 %v3314_v48, %v3194_v53  ;;  %v3538_v8 = vmul.f32 %v3314_v48, %v3205_v18  ;;  %v3542_v2 = vmul.f32 %v3314_v48, %v3191_v6 }
 0x227   :  { %4180 = vst [vmem:[#allocation6_spill] sm:$0xff] %v3526_v24  ;;  %v3546_v21 = vmul.f32 %v3314_v48, %v3202_v58  ;;  %v4186_v24 = vld [vmem:[#allocation24_spill] sm:$0xff] }
 0x228   :  { %4181 = vst [vmem:[#allocation8_spill] sm:$0xff] %v3530_v32  ;;  %4182 = vst [vmem:[#allocation5_spill] sm:$0xff] %v3534_v31  ;;  %v3550_v57 = vmul.f32 %v3314_v48, %v4186_v24  ;;  %v4187_v32 = vld [vmem:[#allocation26_spill] sm:$0xff]  ;;  %v4188_v31 = vld [vmem:[#allocation23_spill] sm:$0xff] }
 0x229   :  { %4183 = vst [vmem:[#allocation7_spill] sm:$0xff] %v3538_v8  ;;  %4184 = vst [vmem:[#allocation10_spill] sm:$0xff] %v3542_v2  ;;  %v3554_v53 = vmul.f32 %v3314_v48, %v4187_v32  ;;  %v3558_v18 = vmul.f32 %v3314_v48, %v4188_v31  ;;  %v4189_v8 = vld [vmem:[#allocation25_spill] sm:$0xff]  ;;  %v4190_v2 = vld [vmem:[#allocation28_spill] sm:$0xff]  ;;  %v3574_v32 = vmul.f32 %v3314_v48, %v3252_v50 }
 0x22a   :  { %4185 = vst [vmem:[#allocation12_spill] sm:$0xff] %v3546_v21  ;;  %v3562_v6 = vmul.f32 %v3314_v48, %v4189_v8  ;;  %v3566_v58 = vmul.f32 %v3314_v48, %v4190_v2  ;;  %v4191_v21 = vld [vmem:[#allocation27_spill] sm:$0xff]  ;;  %v3578_v31 = vadd.f32 %v3342_v26, %v3320_v34  ;;  %v3582_v8 = vadd.f32 %v3342_v26, %v3324_v13 }
 0x22b   :  { %v3570_v24 = vmul.f32 %v3314_v48, %v4191_v21  ;;  %v3586_v2 = vadd.f32 %v3342_v26, %v3328_v52  ;;  %v3590_v21 = vadd.f32 %v3342_v26, %v3332_v42  ;;  %v3594_v50 = vadd.f32 %v3342_v26, %v3336_v56 }
 0x22c   :  { %v3598_v48 = vadd.f32 %v3342_v26, %v3340_v4  ;;  %v3602_v34 = vadd.f32 %v3342_v26, %v3346_v16  ;;  %v3606_v13 = vadd.f32 %v3342_v26, %v3350_v63  ;;  %v3610_v52 = vadd.f32 %v3342_v26, %v3354_v11 }
 0x22d   :  { %v3614_v42 = vadd.f32 %v3342_v26, %v3361_v55  ;;  %v3618_v56 = vadd.f32 %v3342_v26, %v3365_v61  ;;  %v3622_v4 = vadd.f32 %v3342_v26, %v3369_v44  ;;  %v3626_v16 = vadd.f32 %v3342_v26, %v3373_v20 }
 0x22e   :  { %v3630_v63 = vadd.f32 %v3342_v26, %v3378_v59  ;;  %v3634_v11 = vadd.f32 %v3342_v26, %v3382_v43  ;;  %v3638_v55 = vadd.f32 %v3342_v26, %v3386_v15  ;;  %v3642_v61 = vadd.f32 %v3342_v26, %v3390_v28 }
 0x22f   :  { %v3646_v44 = vadd.f32 %v3342_v26, %v3394_v3  ;;  %v3650_v20 = vadd.f32 %v3342_v26, %v3398_v33  ;;  %v3654_v59 = vadd.f32 %v3342_v26, %v3402_v9  ;;  %v3658_v43 = vadd.f32 %v3342_v26, %v3406_v1 }
 0x230   :  { %v3662_v15 = vadd.f32 %v3342_v26, %v3410_v60  ;;  %v3666_v28 = vadd.f32 %v3342_v26, %v3414_v27  ;;  %v3670_v3 = vadd.f32 %v3342_v26, %v3418_v37  ;;  %v3674_v33 = vadd.f32 %v3342_v26, %v3422_v12 }
 0x231   :  { %v3678_v9 = vadd.f32 %v3342_v26, %v3426_v62  ;;  %v3682_v1 = vadd.f32 %v3342_v26, %v3430_v23  ;;  %v3686_v60 = vadd.f32 %v3342_v26, %v3434_v10  ;;  %v3690_v27 = vadd.f32 %v3342_v26, %v3438_v7 }
 0x232   :  { %v3694_v37 = vadd.f32 %v3342_v26, %v3442_v47  ;;  %v3698_v12 = vadd.f32 %v3342_v26, %v3446_v25  ;;  %v3702_v62 = vadd.f32 %v3342_v26, %v3450_v40  ;;  %v3706_v23 = vadd.f32 %v3342_v26, %v3454_v54 }
 0x233   :  { %v3710_v10 = vadd.f32 %v3342_v26, %v3458_v30  ;;  %v3714_v7 = vadd.f32 %v3342_v26, %v3462_v17  ;;  %v3718_v47 = vadd.f32 %v3342_v26, %v3466_v22  ;;  %v3722_v25 = vadd.f32 %v3342_v26, %v3470_v39 }
 0x234   :  { %v3726_v40 = vadd.f32 %v3342_v26, %v3474_v51  ;;  %v3730_v54 = vadd.f32 %v3342_v26, %v3478_v36  ;;  %v3734_v30 = vadd.f32 %v3342_v26, %v3482_v46  ;;  %v3738_v17 = vadd.f32 %v3342_v26, %v3486_v41  ;;  %v1788_v36 = vld [vmem:[%s4112_s4 + $0x10] sm:$0xff]  ;;  %v1786_v46 = vld [vmem:[%s4112_s4] sm:$0xff]  ;;  %v1789_v41 = vld [vmem:[%s4112_s4 + $0x18] sm:$0xff] }
 0x235   :  { %4192 = vst [vmem:[#allocation9_spill] sm:$0xff] %v3714_v7  ;;  %4193 = vst [vmem:[#allocation11_spill] sm:$0xff] %v3718_v47  ;;  %v3742_v22 = vadd.f32 %v3342_v26, %v3490_v38  ;;  %v3746_v39 = vadd.f32 %v3342_v26, %v3494_v14  ;;  %v3750_v51 = vadd.f32 %v3342_v26, %v3498_v49  ;;  %v1787_v38 = vld [vmem:[%s4112_s4 + $0x8] sm:$0xff]  ;;  %v1800_v47 = vld [vmem:[%s4112_s4 + $0x70] sm:$0xff] }
 0x236   :  { %4194 = vst [vmem:[#allocation14_spill] sm:$0xff] %v3722_v25  ;;  %4195 = vst [vmem:[#allocation16_spill] sm:$0xff] %v3726_v40  ;;  %v3766_v14 = vadd.f32 %v3342_v26, %v3502_v5  ;;  %v3770_v49 = vadd.f32 %v3342_v26, %v3506_v19  ;;  %v1790_v5 = vld [vmem:[%s4112_s4 + $0x20] sm:$0xff]  ;;  %v1793_v19 = vld [vmem:[%s4112_s4 + $0x38] sm:$0xff] }
 0x237   :  { %4196 = vst [vmem:[#allocation13_spill] sm:$0xff] %v3730_v54  ;;  %4197 = vst [vmem:[#allocation15_spill] sm:$0xff] %v3734_v30  ;;  %v1796_v30 = vld [vmem:[%s4112_s4 + $0x50] sm:$0xff]  ;;  %v4218_v40 = vld [vmem:[#allocation12_spill] sm:$0xff] }
 0x238   :  { %4198 = vst [vmem:[#allocation17_spill] sm:$0xff] %v3738_v17  ;;  %4199 = vst [vmem:[#allocation18_spill] sm:$0xff] %v3742_v22  ;;  %v1792_v22 = vld [vmem:[%s4112_s4 + $0x30] sm:$0xff]  ;;  %v3834_v25 = vadd.f32 %v3342_v26, %v4218_v40  ;;  %v3850_v40 = vadd.f32 %v3342_v26, %v3550_v57  ;;  %v1802_v57 = vld [vmem:[%s4112_s4 + $0x80] sm:$0xff] }
 0x239   :  { %4200 = vst [vmem:[#allocation19_spill] sm:$0xff] %v3746_v39  ;;  %4201 = vst [vmem:[#allocation20_spill] sm:$0xff] %v3750_v51  ;;  %v3774_v51 = vadd.f32 %v3342_v26, %v3510_v0  ;;  %v3778_v39 = vadd.f32 %v3342_v26, %v3514_v45  ;;  %v1791_v0 = vld [vmem:[%s4112_s4 + $0x28] sm:$0xff]  ;;  %v3794_v45 = vadd.f32 %v3342_v26, %v3518_v29  ;;  %v1794_v29 = vld [vmem:[%s4112_s4 + $0x40] sm:$0xff] }
 0x23a   :  { %4202 = vst [vmem:[#allocation21_spill] sm:$0xff] %v3766_v14  ;;  %4203 = vst [vmem:[#allocation22_spill] sm:$0xff] %v3770_v49  ;;  %v4210_v14 = vld [vmem:[#allocation8_spill] sm:$0xff]  ;;  %v1806_v7 = vld [vmem:[%s4112_s4 + $0xa0] sm:$0xff] }
 0x23b   :  { %4204 = vst [vmem:[#allocation24_spill] sm:$0xff] %v3774_v51  ;;  %4205 = vst [vmem:[#allocation26_spill] sm:$0xff] %v3778_v39  ;;  %v3798_v39 = vadd.f32 %v3342_v26, %v3522_v35  ;;  %v4208_v51 = vld [vmem:[#allocation6_spill] sm:$0xff]  ;;  %v3806_v17 = vadd.f32 %v3342_v26, %v4210_v14  ;;  %v1797_v35 = vld [vmem:[%s4112_s4 + $0x58] sm:$0xff] }
 0x23c   :  { %4206 = vst [vmem:[#allocation23_spill] sm:$0xff] %v3794_v45  ;;  %v3802_v49 = vadd.f32 %v3342_v26, %v4208_v51  ;;  %v1795_v51 = vld [vmem:[%s4112_s4 + $0x48] sm:$0xff] }
 0x23d   :  { %4207 = vst [vmem:[#allocation25_spill] sm:$0xff] %v3798_v39  ;;  %4211 = vst [vmem:[#allocation27_spill] sm:$0xff] %v3806_v17  ;;  %v4214_v17 = vld [vmem:[#allocation7_spill] sm:$0xff]  ;;  %v4216_v45 = vld [vmem:[#allocation10_spill] sm:$0xff] }
 0x23e   :  { %4209 = vst [vmem:[#allocation28_spill] sm:$0xff] %v3802_v49  ;;  %v4212_v49 = vld [vmem:[#allocation5_spill] sm:$0xff]  ;;  %v3826_v39 = vadd.f32 %v3342_v26, %v4214_v17  ;;  %v3830_v54 = vadd.f32 %v3342_v26, %v4216_v45  ;;  %4219 = vst [vmem:[#allocation7_spill] sm:$0xff] %v3834_v25  ;;  %v1801_v17 = vld [vmem:[%s4112_s4 + $0x78] sm:$0xff]  ;;  %v3854_v25 = vadd.f32 %v3342_v26, %v3554_v53 }
 0x23f   :  { %v3822_v14 = vadd.f32 %v3342_v26, %v4212_v49  ;;  %v1798_v49 = vld [vmem:[%s4112_s4 + $0x60] sm:$0xff]  ;;  %v1799_v45 = vld [vmem:[%s4112_s4 + $0x68] sm:$0xff]  ;;  %4220 = vst [vmem:[#allocation10_spill] sm:$0xff] %v3850_v40  ;;  %v1805_v53 = vld [vmem:[%s4112_s4 + $0x98] sm:$0xff] }
 0x240   :  { %4215 = vst [vmem:[#allocation8_spill] sm:$0xff] %v3826_v39  ;;  %4217 = vst [vmem:[#allocation5_spill] sm:$0xff] %v3830_v54  ;;  %v3858_v54 = vadd.f32 %v3342_v26, %v3558_v18  ;;  %v3862_v39 = vadd.f32 %v3342_v26, %v3562_v6  ;;  %v1803_v18 = vld [vmem:[%s4112_s4 + $0x88] sm:$0xff]  ;;  %v3878_v6 = vadd.f32 %v3342_v26, %v3566_v58  ;;  %v1808_v40 = vld [vmem:[%s4112_s4 + $0xb0] sm:$0xff] }
 0x241   :  { %4213 = vst [vmem:[#allocation6_spill] sm:$0xff] %v3822_v14  ;;  %4221 = vst [vmem:[#allocation12_spill] sm:$0xff] %v3854_v25  ;;  %v1804_v14 = vld [vmem:[%s4112_s4 + $0x90] sm:$0xff]  ;;  %v1850_v25 = vadd.f32 %v1786_v46, %v3578_v31  ;;  %v1809_v58 = vld [vmem:[%s4112_s4 + $0xb8] sm:$0xff]  ;;  %v1853_v31 = vadd.f32 %v1789_v41, %v3590_v21  ;;  %v1854_v46 = vadd.f32 %v1790_v5, %v3594_v50 }
 0x242   :  { %4222 = vst [vmem:[#allocation29_spill] sm:$0xff] %v3858_v54  ;;  %4223 = vst [vmem:[#allocation30_spill] sm:$0xff] %v3862_v39  ;;  %v3882_v39 = vadd.f32 %v3342_v26, %v3570_v24  ;;  %v3886_v54 = vadd.f32 %v3342_v26, %v3574_v32  ;;  %v1807_v24 = vld [vmem:[%s4112_s4 + $0xa8] sm:$0xff]  ;;  %v1851_v26 = vadd.f32 %v1787_v38, %v3582_v8  ;;  %v1816_v41 = vld [vmem:[%s4112_s4 + $0xf0] sm:$0xff] }
 0x243   :  { %4224 = vst [vmem:[#allocation31_spill] sm:$0xff] %v3878_v6  ;;  %v1852_v32 = vadd.f32 %v1788_v36, %v3586_v2  ;;  %v1813_v6 = vld [vmem:[%s4112_s4 + $0xd8] sm:$0xff]  ;;  %v1811_v8 = vld [vmem:[%s4112_s4 + $0xc8] sm:$0xff]  ;;  %v1855_v2 = vadd.f32 %v1791_v0, %v3598_v48  ;;  %v1856_v21 = vadd.f32 %v1792_v22, %v3602_v34  ;;  %v1857_v50 = vadd.f32 %v1793_v19, %v3606_v13  ;;  %v1814_v38 = vld [vmem:[%s4112_s4 + $0xe0] sm:$0xff] }
 0x244   :  { %4225 = vst [vmem:[#allocation32_spill] sm:$0xff] %v3882_v39  ;;  %4226 = vst [vmem:[#allocation33_spill] sm:$0xff] %v3886_v54  ;;  %v1812_v54 = vld [vmem:[%s4112_s4 + $0xd0] sm:$0xff]  ;;  %v1810_v39 = vld [vmem:[%s4112_s4 + $0xc0] sm:$0xff]  ;;  %v1858_v36 = vadd.f32 %v1794_v29, %v3610_v52  ;;  %v1859_v48 = vadd.f32 %v1795_v51, %v3614_v42  ;;  %v1860_v34 = vadd.f32 %v1796_v30, %v3618_v56 }
 0x245   :  { %1914 = vst [vmem:[#allocation2] sm:$0xff] %v1850_v25  ;;  %v1817_v5 = vld [vmem:[%s4112_s4 + $0xf8] sm:$0xff]  ;;  %v1861_v13 = vadd.f32 %v1797_v35, %v3622_v4  ;;  %v1862_v52 = vadd.f32 %v1798_v49, %v3626_v16  ;;  %1915 = vst [vmem:[#allocation2 + $0x8] sm:$0xff] %v1851_v26  ;;  %v1815_v25 = vld [vmem:[%s4112_s4 + $0xe8] sm:$0xff]  ;;  %v1863_v56 = vadd.f32 %v1799_v45, %v3630_v63 }
 0x246   :  { %1916 = vst [vmem:[#allocation2 + $0x10] sm:$0xff] %v1852_v32  ;;  %1917 = vst [vmem:[#allocation2 + $0x18] sm:$0xff] %v1853_v31  ;;  %v1818_v22 = vld [vmem:[%s4112_s4 + $0x100] sm:$0xff]  ;;  %v1819_v42 = vld [vmem:[%s4112_s4 + $0x108] sm:$0xff]  ;;  %v1864_v4 = vadd.f32 %v1800_v47, %v3634_v11  ;;  %v1865_v16 = vadd.f32 %v1801_v17, %v3638_v55  ;;  %v1866_v30 = vadd.f32 %v1802_v57, %v3642_v61 }
 0x247   :  { %1918 = vst [vmem:[#allocation2 + $0x20] sm:$0xff] %v1854_v46  ;;  %1919 = vst [vmem:[#allocation2 + $0x28] sm:$0xff] %v1855_v2  ;;  %v1820_v19 = vld [vmem:[%s4112_s4 + $0x110] sm:$0xff]  ;;  %v1821_v0 = vld [vmem:[%s4112_s4 + $0x118] sm:$0xff]  ;;  %v1867_v11 = vadd.f32 %v1803_v18, %v3646_v44  ;;  %v1868_v55 = vadd.f32 %v1804_v14, %v3650_v20  ;;  %v1869_v61 = vadd.f32 %v1805_v53, %v3654_v59 }
 0x248   :  { %1920 = vst [vmem:[#allocation2 + $0x30] sm:$0xff] %v1856_v21  ;;  %1921 = vst [vmem:[#allocation2 + $0x38] sm:$0xff] %v1857_v50  ;;  %v1822_v63 = vld [vmem:[%s4112_s4 + $0x120] sm:$0xff]  ;;  %v1870_v47 = vadd.f32 %v1806_v7, %v3658_v43  ;;  %v1823_v29 = vld [vmem:[%s4112_s4 + $0x128] sm:$0xff]  ;;  %v1871_v20 = vadd.f32 %v1807_v24, %v3662_v15  ;;  %v1872_v59 = vadd.f32 %v1808_v40, %v3666_v28 }
 0x249   :  { %1922 = vst [vmem:[#allocation2 + $0x40] sm:$0xff] %v1858_v36  ;;  %1923 = vst [vmem:[#allocation2 + $0x48] sm:$0xff] %v1859_v48  ;;  %v1824_v35 = vld [vmem:[%s4112_s4 + $0x130] sm:$0xff]  ;;  %v1825_v44 = vld [vmem:[%s4112_s4 + $0x138] sm:$0xff]  ;;  %v1873_v43 = vadd.f32 %v1809_v58, %v3670_v3  ;;  %v1874_v7 = vadd.f32 %v1810_v39, %v3674_v33  ;;  %v1875_v28 = vadd.f32 %v1811_v8, %v3678_v9 }
 0x24a   :  { %1924 = vst [vmem:[#allocation2 + $0x50] sm:$0xff] %v1860_v34  ;;  %1925 = vst [vmem:[#allocation2 + $0x58] sm:$0xff] %v1861_v13  ;;  %v1826_v51 = vld [vmem:[%s4112_s4 + $0x140] sm:$0xff]  ;;  %v1827_v15 = vld [vmem:[%s4112_s4 + $0x148] sm:$0xff]  ;;  %v1876_v3 = vadd.f32 %v1812_v54, %v3682_v1  ;;  %v1877_v33 = vadd.f32 %v1813_v6, %v3686_v60  ;;  %v1878_v39 = vadd.f32 %v1814_v38, %v3690_v27 }
 0x24b   :  { %1926 = vst [vmem:[#allocation2 + $0x60] sm:$0xff] %v1862_v52  ;;  %1927 = vst [vmem:[#allocation2 + $0x68] sm:$0xff] %v1863_v56  ;;  %v3979_v14 = vld [vmem:[%s4112_s4 + $0x180] sm:$0xff]  ;;  %v3991_v49 = vld [vmem:[%s4112_s4 + $0x190] sm:$0xff]  ;;  %v1879_v54 = vadd.f32 %v1815_v25, %v3694_v37  ;;  %v1880_v45 = vadd.f32 %v1816_v41, %v3698_v12  ;;  %v1881_v40 = vadd.f32 %v1817_v5, %v3702_v62 }
 0x24c   :  { %1928 = vst [vmem:[#allocation2 + $0x70] sm:$0xff] %v1864_v4  ;;  %1929 = vst [vmem:[#allocation2 + $0x78] sm:$0xff] %v1865_v16  ;;  %v3996_v17 = vld [vmem:[%s4112_s4 + $0x198] sm:$0xff]  ;;  %v1835_v9 = vld [vmem:[%s4112_s4 + $0x188] sm:$0xff]  ;;  %v1882_v57 = vadd.f32 %v1818_v22, %v3706_v23  ;;  %v1883_v12 = vadd.f32 %v1819_v42, %v3710_v10 }
 0x24d   :  { %1930 = vst [vmem:[#allocation2 + $0x80] sm:$0xff] %v1866_v30  ;;  %1931 = vst [vmem:[#allocation2 + $0x88] sm:$0xff] %v1867_v11  ;;  %v1828_v1 = vld [vmem:[%s4112_s4 + $0x150] sm:$0xff]  ;;  %v1829_v60 = vld [vmem:[%s4112_s4 + $0x158] sm:$0xff] }
 0x24e   :  { %1932 = vst [vmem:[#allocation2 + $0x90] sm:$0xff] %v1868_v55  ;;  %1933 = vst [vmem:[#allocation2 + $0x98] sm:$0xff] %v1869_v61  ;;  %v1830_v27 = vld [vmem:[%s4112_s4 + $0x160] sm:$0xff]  ;;  %v1831_v53 = vld [vmem:[%s4112_s4 + $0x168] sm:$0xff] }
 0x24f   :  { %1934 = vst [vmem:[#allocation2 + $0xa0] sm:$0xff] %v1870_v47  ;;  %1935 = vst [vmem:[#allocation2 + $0xa8] sm:$0xff] %v1871_v20  ;;  %v1832_v18 = vld [vmem:[%s4112_s4 + $0x170] sm:$0xff]  ;;  %v1833_v37 = vld [vmem:[%s4112_s4 + $0x178] sm:$0xff] }
 0x250   :  { %1936 = vst [vmem:[#allocation2 + $0xb0] sm:$0xff] %v1872_v59  ;;  %1937 = vst [vmem:[#allocation2 + $0xb8] sm:$0xff] %v1873_v43  ;;  %v4227_v62 = vld [vmem:[#allocation9_spill] sm:$0xff]  ;;  %v4228_v6 = vld [vmem:[#allocation11_spill] sm:$0xff] }
 0x251   :  { %1938 = vst [vmem:[#allocation2 + $0xc0] sm:$0xff] %v1874_v7  ;;  %v1884_v23 = vadd.f32 %v1820_v19, %v4227_v62  ;;  %v1885_v58 = vadd.f32 %v1821_v0, %v4228_v6  ;;  %v4229_v24 = vld [vmem:[#allocation14_spill] sm:$0xff]  ;;  %1939 = vst [vmem:[#allocation2 + $0xc8] sm:$0xff] %v1875_v28  ;;  %v1840_v32 = vld [vmem:[%s4112_s4 + $0x1b0] sm:$0xff] }
 0x252   :  { %v1886_v26 = vadd.f32 %v1822_v63, %v4229_v24  ;;  %1940 = vst [vmem:[#allocation2 + $0xd0] sm:$0xff] %v1876_v3  ;;  %1941 = vst [vmem:[#allocation2 + $0xd8] sm:$0xff] %v1877_v33  ;;  %v1838_v31 = vld [vmem:[%s4112_s4 + $0x1a0] sm:$0xff]  ;;  %v1841_v10 = vld [vmem:[%s4112_s4 + $0x1b8] sm:$0xff] }
 0x253   :  { %1942 = vst [vmem:[#allocation2 + $0xe0] sm:$0xff] %v1878_v39  ;;  %v4230_v46 = vld [vmem:[#allocation16_spill] sm:$0xff]  ;;  %v4231_v2 = vld [vmem:[#allocation13_spill] sm:$0xff]  ;;  %v4232_v50 = vld [vmem:[#allocation15_spill] sm:$0xff] }
 0x254   :  { %v1887_v8 = vadd.f32 %v1823_v29, %v4230_v46  ;;  %v1888_v21 = vadd.f32 %v1824_v35, %v4231_v2  ;;  %v1889_v36 = vadd.f32 %v1825_v44, %v4232_v50  ;;  %v4233_v41 = vld [vmem:[#allocation17_spill] sm:$0xff]  ;;  %1943 = vst [vmem:[#allocation2 + $0xe8] sm:$0xff] %v1879_v54  ;;  %1944 = vst [vmem:[#allocation2 + $0xf0] sm:$0xff] %v1880_v45  ;;  %v1839_v5 = vld [vmem:[%s4112_s4 + $0x1a8] sm:$0xff] }
 0x255   :  { %v1890_v38 = vadd.f32 %v1826_v51, %v4233_v41  ;;  %1945 = vst [vmem:[#allocation2 + $0xf8] sm:$0xff] %v1881_v40  ;;  %1946 = vst [vmem:[#allocation2 + $0x100] sm:$0xff] %v1882_v57  ;;  %v1844_v48 = vld [vmem:[%s4112_s4 + $0x1d0] sm:$0xff]  ;;  %v1842_v34 = vld [vmem:[%s4112_s4 + $0x1c0] sm:$0xff] }
 0x256   :  { %v4234_v13 = vld [vmem:[#allocation18_spill] sm:$0xff]  ;;  %v4235_v25 = vld [vmem:[#allocation19_spill] sm:$0xff]  ;;  %v4236_v42 = vld [vmem:[#allocation20_spill] sm:$0xff]  ;;  %1947 = vst [vmem:[#allocation2 + $0x108] sm:$0xff] %v1883_v12 }
 0x257   :  { %v1891_v52 = vadd.f32 %v1827_v15, %v4234_v13  ;;  %v1892_v22 = vadd.f32 %v1828_v1, %v4235_v25  ;;  %v1893_v56 = vadd.f32 %v1829_v60, %v4236_v42  ;;  %v4237_v4 = vld [vmem:[#allocation21_spill] sm:$0xff]  ;;  %1948 = vst [vmem:[#allocation2 + $0x110] sm:$0xff] %v1884_v23  ;;  %1949 = vst [vmem:[#allocation2 + $0x118] sm:$0xff] %v1885_v58  ;;  %v1845_v30 = vld [vmem:[%s4112_s4 + $0x1d8] sm:$0xff] }
 0x258   :  { %v1894_v16 = vadd.f32 %v1830_v27, %v4237_v4  ;;  %1950 = vst [vmem:[#allocation2 + $0x120] sm:$0xff] %v1886_v26  ;;  %v1843_v19 = vld [vmem:[%s4112_s4 + $0x1c8] sm:$0xff]  ;;  %v1846_v0 = vld [vmem:[%s4112_s4 + $0x1e0] sm:$0xff]  ;;  %v4239_v55 = vld [vmem:[#allocation24_spill] sm:$0xff] }
 0x259   :  { %v4238_v63 = vld [vmem:[#allocation22_spill] sm:$0xff]  ;;  %v1896_v61 = vadd.f32 %v1832_v18, %v4239_v55  ;;  %v4241_v35 = vld [vmem:[#allocation23_spill] sm:$0xff]  ;;  %1951 = vst [vmem:[#allocation2 + $0x128] sm:$0xff] %v1887_v8  ;;  %1952 = vst [vmem:[#allocation2 + $0x130] sm:$0xff] %v1888_v21 }
 0x25a   :  { %v1895_v11 = vadd.f32 %v1831_v53, %v4238_v63  ;;  %v4240_v47 = vld [vmem:[#allocation26_spill] sm:$0xff]  ;;  %v1898_v44 = vadd.f32 %v3979_v14, %v4241_v35  ;;  %1953 = vst [vmem:[#allocation2 + $0x138] sm:$0xff] %v1889_v36  ;;  %1954 = vst [vmem:[#allocation2 + $0x140] sm:$0xff] %v1890_v38  ;;  %v1848_v20 = vld [vmem:[%s4112_s4 + $0x1f0] sm:$0xff] }
 0x25b   :  { %v1897_v29 = vadd.f32 %v1833_v37, %v4240_v47  ;;  %v1849_v59 = vld [vmem:[%s4112_s4 + $0x1f8] sm:$0xff]  ;;  %v4242_v43 = vld [vmem:[#allocation25_spill] sm:$0xff]  ;;  %v4244_v14 = vld [vmem:[#allocation27_spill] sm:$0xff]  ;;  %1955 = vst [vmem:[#allocation2 + $0x148] sm:$0xff] %v1891_v52  ;;  %s2424_s4 = scalar_lea.vmem %s4087_s11, 8192 }
 0x25c   :  { %v1899_v7 = vadd.f32 %v1835_v9, %v4242_v43  ;;  %v4243_v51 = vld [vmem:[#allocation28_spill] sm:$0xff]  ;;  %v1901_v28 = vadd.f32 %v3996_v17, %v4244_v14  ;;  %v4245_v3 = vld [vmem:[#allocation6_spill] sm:$0xff]  ;;  %1956 = vst [vmem:[#allocation2 + $0x150] sm:$0xff] %v1892_v22  ;;  %1957 = vst [vmem:[#allocation2 + $0x158] sm:$0xff] %v1893_v56  ;;  %p2425_p0 = scmp.ne.s32.totalorder %s4087_s11, %s2424_s4  ;;  %p2430_p2 = scmp.lt.s32.totalorder %s2424_s4, %s2424_s4 }
 0x25d   :  { %v1900_v15 = vadd.f32 %v3991_v49, %v4243_v51  ;;  %v1902_v33 = vadd.f32 %v1838_v31, %v4245_v3  ;;  %1958 = vst [vmem:[#allocation2 + $0x160] sm:$0xff] %v1894_v16  ;;  %v4246_v39 = vld [vmem:[#allocation8_spill] sm:$0xff]  ;;  %v4247_v60 = vld [vmem:[#allocation5_spill] sm:$0xff]  ;;  %v4248_v54 = vld [vmem:[#allocation7_spill] sm:$0xff] }
 0x25e   :  { %v1903_v1 = vadd.f32 %v1839_v5, %v4246_v39  ;;  %v1904_v27 = vadd.f32 %v1840_v32, %v4247_v60  ;;  %v1905_v45 = vadd.f32 %v1841_v10, %v4248_v54  ;;  %v4249_v40 = vld [vmem:[#allocation10_spill] sm:$0xff]  ;;  %1959 = vst [vmem:[#allocation2 + $0x168] sm:$0xff] %v1895_v11  ;;  %1960 = vst [vmem:[#allocation2 + $0x170] sm:$0xff] %v1896_v61  ;;  %v4250_v49 = vld [vmem:[#allocation12_spill] sm:$0xff]  ;;  %p2431_p3 = por %p2430_p2, %p2429_p1 }
 0x25f   :  { %v1906_v9 = vadd.f32 %v1842_v34, %v4249_v40  ;;  %1961 = vst [vmem:[#allocation2 + $0x178] sm:$0xff] %v1897_v29  ;;  %1962 = vst [vmem:[#allocation2 + $0x180] sm:$0xff] %v1898_v44  ;;  %v1907_v17 = vadd.f32 %v1843_v19, %v4250_v49  ;;  %v4251_v57 = vld [vmem:[#allocation29_spill] sm:$0xff]  ;;  %v4252_v18 = vld [vmem:[#allocation30_spill] sm:$0xff] }
 0x260   :  { %v1908_v53 = vadd.f32 %v1844_v48, %v4251_v57  ;;  %v1909_v37 = vadd.f32 %v1845_v30, %v4252_v18  ;;  %v4253_v12 = vld [vmem:[#allocation31_spill] sm:$0xff]  ;;  %1963 = vst [vmem:[#allocation2 + $0x188] sm:$0xff] %v1899_v7  ;;  %1964 = vst [vmem:[#allocation2 + $0x190] sm:$0xff] %v1900_v15  ;;  %v4254_v23 = vld [vmem:[#allocation32_spill] sm:$0xff]  ;;  %p2432_p4 = pnand %p2431_p3, %p2425_p0 }
 0x261   :  { %v1910_v62 = vadd.f32 %v1846_v0, %v4253_v12  ;;  %1965 = vst [vmem:[#allocation2 + $0x198] sm:$0xff] %v1901_v28  ;;  %1966 = vst [vmem:[#allocation2 + $0x1a0] sm:$0xff] %v1902_v33  ;;  %v1912_v6 = vadd.f32 %v1848_v20, %v4254_v23  ;;  %v4255_v58 = vld [vmem:[#allocation33_spill] sm:$0xff] }
 0x262   :  { %v1913_v24 = vadd.f32 %v1849_v59, %v4255_v58  ;;  %1967 = vst [vmem:[#allocation2 + $0x1a8] sm:$0xff] %v1903_v1  ;;  %1968 = vst [vmem:[#allocation2 + $0x1b0] sm:$0xff] %v1904_v27 }
 0x263   :  { %1969 = vst [vmem:[#allocation2 + $0x1b8] sm:$0xff] %v1905_v45  ;;  %1970 = vst [vmem:[#allocation2 + $0x1c0] sm:$0xff] %v1906_v9 }
 0x264   :  { %1971 = vst [vmem:[#allocation2 + $0x1c8] sm:$0xff] %v1907_v17  ;;  %1972 = vst [vmem:[#allocation2 + $0x1d0] sm:$0xff] %v1908_v53 }
 0x265   :  { %1973 = vst [vmem:[#allocation2 + $0x1d8] sm:$0xff] %v1909_v37  ;;  %1974 = vst [vmem:[#allocation2 + $0x1e0] sm:$0xff] %v1910_v62 }
 0x266   :  { %1976 = vst [vmem:[#allocation2 + $0x1f0] sm:$0xff] %v1912_v6  ;;  %1977 = vst [vmem:[#allocation2 + $0x1f8] sm:$0xff] %v1913_v24 }
 0x267   :  { %2435 = shalt.err (!%p2432_p4)
}
 0x268   :  { %s2436_s18 = scalar_lea.hbm %s4113_s5, 8192 }
 0x269   :  { %p2437_p5 = scmp.ne.s32.totalorder %s4113_s5, %s2436_s18  ;;  %p2440_p6 = scmp.lt.u32.totalorder %s2436_s18, %s4113_s5 }
 0x26b   :  { %p2442_p7 = pnand %p2440_p6, %p2437_p5 }
 0x26d   :  { %2445 = shalt.err (!%p2442_p7)
}
 0x26e   :  { %s2450_s23 = smov 128   ;;  %s2451_s24 = smov 8  }
 0x26f   :  { %1989 = dma.vmem_to_hbm [thread:$0]  %s4087_s11, 8192, %s4113_s5, [#allocation3], %s2450_s23, %s2450_s23, %s2451_s24  }
 0x270   :  { %2446 = dma.done.wait [#allocation3], 8192  }
 0x271   :  { %2447 = vsyncadd [#allocation3], 4294959104 }
 0x272   :  { %1993 = vsyncpa [#allocation3], 1 }

</bundles_post_ra>
